<compile_context>
chip_gen: v6e
topology: v6e:2x2x1
jax: 0.10.0
libtpu: 0.0.40
codegen_flags: <defaults>
</compile_context>

<pallas_src>
import functools

import jax
import jax.numpy as jnp
from jax.experimental import pallas as pl
from jax.experimental.pallas import tpu as pltpu


TM = 512     # row tile (adjacency rows / output rows)
TK = 512     # contraction tile (adjacency cols / dense-operand rows)
LANE = 128   # feature-dim padding multiple
_NPAD = 512  # lcm(TM, TK): node-count padding multiple
_VMEM_LIMIT = 32 * 1024 * 1024


def _round_up(x, m):
    return (x + m - 1) // m * m


def _pad2d(a, rows, cols):
    r, c = a.shape
    return jnp.pad(a, ((0, rows - r), (0, cols - c)))


# ---------------- pass 1: feature transform XW = X @ W (tiny, row-tiled) ----------------
def linear_kernel(x_ref, w_ref, o_ref):
    o_ref[...] = jnp.dot(
        x_ref[...], w_ref[...], preferred_element_type=jnp.float32
    ).astype(o_ref.dtype)


def feature_transform(x_bf16, w_bf16):
    n_pad, fin = x_bf16.shape
    fout = w_bf16.shape[1]
    return pl.pallas_call(
        linear_kernel,
        out_shape=jax.ShapeDtypeStruct((n_pad, fout), jnp.bfloat16),
        grid_spec=pltpu.PrefetchScalarGridSpec(
            num_scalar_prefetch=0,
            grid=(n_pad // TM,),
            in_specs=[
                pl.BlockSpec((TM, fin), lambda i: (i, 0)),
                pl.BlockSpec((fin, fout), lambda i: (0, 0)),
            ],
            out_specs=pl.BlockSpec((TM, fout), lambda i: (i, 0)),
        ),
        compiler_params=pltpu.CompilerParams(
            dimension_semantics=("parallel",),
            vmem_limit_bytes=_VMEM_LIMIT,
        ),
    )(x_bf16, w_bf16)


# -------- pass 2: fused layer-1 aggregation + layer-2 linear --------
#   HW2 = relu(A_norm @ XW1 + b1) @ W2
def fused_agg_linear_kernel(adj_ref, xw_ref, b_ref, w2_ref, o_ref, acc_ref):
    k = pl.program_id(1)

    @pl.when(k == 0)
    def _():
        acc_ref[...] = jnp.zeros_like(acc_ref)

    acc_ref[...] += jnp.dot(
        adj_ref[...], xw_ref[...], preferred_element_type=jnp.float32
    )

    @pl.when(k == pl.num_programs(1) - 1)
    def _():
        h1 = jnp.maximum(acc_ref[...] + b_ref[...], 0.0)      # bias + ReLU in f32
        o_ref[...] = jnp.dot(
            h1.astype(jnp.bfloat16), w2_ref[...],
            preferred_element_type=jnp.float32,
        ).astype(o_ref.dtype)


def fused_graph_conv_linear(adj_bf16, xw_bf16, b_f32, w2_bf16):
    n_pad = adj_bf16.shape[0]
    fh = xw_bf16.shape[1]
    fc = w2_bf16.shape[1]
    flops = 2 * n_pad * n_pad * fh + 2 * n_pad * fh * fc
    bytes_accessed = (
        n_pad * n_pad * 2                                 # adjacency (bf16), dominant
        + (n_pad // TM) * n_pad * fh * 2                  # XW1 re-reads per row tile
        + n_pad * fc * 2                                  # output (bf16)
    )
    return pl.pallas_call(
        fused_agg_linear_kernel,
        out_shape=jax.ShapeDtypeStruct((n_pad, fc), jnp.bfloat16),
        grid_spec=pltpu.PrefetchScalarGridSpec(
            num_scalar_prefetch=0,
            grid=(n_pad // TM, n_pad // TK),
            in_specs=[
                pl.BlockSpec((TM, TK), lambda i, k: (i, k)),    # A_norm tile
                pl.BlockSpec((TK, fh), lambda i, k: (k, 0)),    # XW1 tile
                pl.BlockSpec((1, fh), lambda i, k: (0, 0)),     # bias b1 (full)
                pl.BlockSpec((fh, fc), lambda i, k: (0, 0)),    # W2 (full, resident)
            ],
            out_specs=pl.BlockSpec((TM, fc), lambda i, k: (i, 0)),
            scratch_shapes=[pltpu.VMEM((TM, fh), jnp.float32)],
        ),
        compiler_params=pltpu.CompilerParams(
            dimension_semantics=("parallel", "arbitrary"),
            vmem_limit_bytes=_VMEM_LIMIT,
        ),
        cost_estimate=pl.CostEstimate(
            flops=flops, transcendentals=0, bytes_accessed=bytes_accessed
        ),
    )(adj_bf16, xw_bf16, b_f32, w2_bf16)


# -------- pass 3: final aggregation OUT = A_norm @ HW2 + b2 --------
def aggregate_kernel(adj_ref, xw_ref, b_ref, o_ref, acc_ref):
    k = pl.program_id(1)

    @pl.when(k == 0)
    def _():
        acc_ref[...] = jnp.zeros_like(acc_ref)

    acc_ref[...] += jnp.dot(
        adj_ref[...], xw_ref[...], preferred_element_type=jnp.float32
    )

    @pl.when(k == pl.num_programs(1) - 1)
    def _():
        o_ref[...] = (acc_ref[...] + b_ref[...]).astype(o_ref.dtype)


def graph_conv(adj_bf16, xw_bf16, b_f32, *, out_dtype):
    n_pad = adj_bf16.shape[0]
    fout = xw_bf16.shape[1]
    flops = 2 * n_pad * n_pad * fout
    bytes_accessed = (
        n_pad * n_pad * 2
        + (n_pad // TM) * n_pad * fout * 2
        + n_pad * fout * jnp.dtype(out_dtype).itemsize
    )
    return pl.pallas_call(
        aggregate_kernel,
        out_shape=jax.ShapeDtypeStruct((n_pad, fout), out_dtype),
        grid_spec=pltpu.PrefetchScalarGridSpec(
            num_scalar_prefetch=0,
            grid=(n_pad // TM, n_pad // TK),
            in_specs=[
                pl.BlockSpec((TM, TK), lambda i, k: (i, k)),
                pl.BlockSpec((TK, fout), lambda i, k: (k, 0)),
                pl.BlockSpec((1, fout), lambda i, k: (0, 0)),
            ],
            out_specs=pl.BlockSpec((TM, fout), lambda i, k: (i, 0)),
            scratch_shapes=[pltpu.VMEM((TM, fout), jnp.float32)],
        ),
        compiler_params=pltpu.CompilerParams(
            dimension_semantics=("parallel", "arbitrary"),
            vmem_limit_bytes=_VMEM_LIMIT,
        ),
        cost_estimate=pl.CostEstimate(
            flops=flops, transcendentals=0, bytes_accessed=bytes_accessed
        ),
    )(adj_bf16, xw_bf16, b_f32)


# ---------------- full GCN forward ----------------
@jax.jit
def gcn_forward(adj_norm, x, w1, b1, w2, b2):
    n = x.shape[0]
    in_feats = x.shape[1]
    h_feats = w1.shape[1]
    num_classes = w2.shape[1]

    n_pad = _round_up(n, _NPAD)
    fin_p = _round_up(in_feats, LANE)
    fh_p = _round_up(h_feats, LANE)
    fc_p = _round_up(num_classes, LANE)

    adj_p = _pad2d(adj_norm, n_pad, n_pad).astype(jnp.bfloat16)
    x_p = _pad2d(x, n_pad, fin_p).astype(jnp.bfloat16)
    w1_p = _pad2d(w1, fin_p, fh_p).astype(jnp.bfloat16)
    w2_p = _pad2d(w2, fh_p, fc_p).astype(jnp.bfloat16)
    b1_p = _pad2d(b1.reshape(1, -1), 1, fh_p).astype(jnp.float32)
    b2_p = _pad2d(b2.reshape(1, -1), 1, fc_p).astype(jnp.float32)

    # pass 1: XW1 = X @ W1
    xw1 = feature_transform(x_p, w1_p)
    # pass 2: HW2 = relu(A @ XW1 + b1) @ W2   (layer-1 aggregation + layer-2 linear, fused)
    hw2 = fused_graph_conv_linear(adj_p, xw1, b1_p, w2_p)
    # pass 3: OUT = A @ HW2 + b2              (dropout -> identity in eval mode)
    out = graph_conv(adj_p, hw2, b2_p, out_dtype=jnp.float32)

    return out[:n, :num_classes]


def normalize_adj(adj):
    """DGL GraphConv norm='both': D^{-1/2} A D^{-1/2} (degrees clamped to >= 1)."""
    deg = jnp.maximum(adj.sum(axis=1), 1.0)
    d_inv_sqrt = 1.0 / jnp.sqrt(deg)
    return adj * d_inv_sqrt[:, None] * d_inv_sqrt[None, :]


if __name__ == "__main__":
    key = jax.random.PRNGKey(0)
    k_adj, k_x, k_w1, k_w2 = jax.random.split(key, 4)

    # Small synthetic graph / feature sizes.
    N = 8
    in_feats = 16
    h_feats = 32
    num_classes = 4

    # Deterministic random undirected graph (dense adjacency, no self loops).
    upper = (jax.random.uniform(k_adj, (N, N)) < 0.4).astype(jnp.float32)
    upper = jnp.triu(upper, k=1)
    adj = upper + upper.T
    adj_norm = normalize_adj(adj)

    # Node features.
    x = jax.random.normal(k_x, (N, in_feats), dtype=jnp.float32)

    # GraphConv parameters (xavier-uniform-ish deterministic init; zero bias like DGL).
    lim1 = (6.0 / (in_feats + h_feats)) ** 0.5
    w1 = jax.random.uniform(k_w1, (in_feats, h_feats), minval=-lim1, maxval=lim1,
                            dtype=jnp.float32)
    b1 = jnp.zeros((1, h_feats), dtype=jnp.float32)

    lim2 = (6.0 / (h_feats + num_classes)) ** 0.5
    w2 = jax.random.uniform(k_w2, (h_feats, num_classes), minval=-lim2, maxval=lim2,
                            dtype=jnp.float32)
    b2 = jnp.zeros((1, num_classes), dtype=jnp.float32)

    out = gcn_forward(adj_norm, x, w1, b1, w2, b2)
    out = jax.block_until_ready(out)

    # Reference in plain f32 JAX (kernel uses bf16 inputs with f32 accumulation -> loose tol).
    h_ref = jnp.maximum(adj_norm @ (x @ w1) + b1, 0.0)
    out_ref = adj_norm @ (h_ref @ w2) + b2
    assert out.shape == (N, num_classes)
    assert jnp.allclose(out, out_ref, atol=5e-2, rtol=5e-2), (
        f"max abs err {jnp.max(jnp.abs(out - out_ref))}")

    print("KERNEL_OK")
</pallas_src>

<mosaic_0001>
module attributes {stable_mosaic.version = 11 : i64} {
  func.func @linear_kernel(%arg0: i32, %arg1: memref<512x128xbf16, #tpu.memory_space<vmem>>, %arg2: memref<128x128xbf16, #tpu.memory_space<vmem>>, %arg3: memref<512x128xbf16, #tpu.memory_space<vmem>>) attributes {dimension_semantics = [#tpu.dimension_semantics<parallel>], iteration_bounds = array<i64: 1>, scalar_prefetch = 0 : i64, scratch_operands = 0 : i64, tpu.core_type = #tpu.core_type<tc>, window_params = [{transform_indices = @transform_0, window_bounds = array<i64: 512, 128>}, {pipeline_mode = #tpu.pipeline_mode<synchronous>, transform_indices = @transform_1, window_bounds = array<i64: 128, 128>}, {transform_indices = @transform_2, window_bounds = array<i64: 512, 128>}]} {
    %c0 = arith.constant 0 : index
    %c0_0 = arith.constant 0 : index
    %0 = vector.load %arg1[%c0, %c0_0] : memref<512x128xbf16, #tpu.memory_space<vmem>>, vector<512x128xbf16>
    %c0_1 = arith.constant 0 : index
    %c0_2 = arith.constant 0 : index
    %1 = vector.load %arg2[%c0_1, %c0_2] : memref<128x128xbf16, #tpu.memory_space<vmem>>, vector<128x128xbf16>
    %cst = arith.constant dense<0.000000e+00> : vector<512x128xf32>
    %2 = tpu.matmul %0, %1, %cst {dimension_numbers = #tpu.dot_dimension_numbers<[1], [0], [0], [1], [0, 0, 1, 1], [], []>} : vector<512x128xbf16>, vector<128x128xbf16>, vector<512x128xf32> -> vector<512x128xf32>
    %3 = arith.truncf %2 : vector<512x128xf32> to vector<512x128xbf16>
    %c0_3 = arith.constant 0 : index
    %c0_4 = arith.constant 0 : index
    %4 = vector.load %arg3[%c0_3, %c0_4] : memref<512x128xbf16, #tpu.memory_space<vmem>>, vector<512x128xbf16>
    tpu.vector_store %arg3[%c0_3, %c0_4], %3 {strides = array<i32>} : memref<512x128xbf16, #tpu.memory_space<vmem>>, vector<512x128xbf16>,
    return
  }
  func.func @transform_0(%arg0: i32) -> (i32, i32) {
    %c0_i32 = arith.constant 0 : i32
    %c0_i32_0 = arith.constant 0 : i32
    return %arg0, %c0_i32 : i32, i32
  }
  func.func @transform_1(%arg0: i32) -> (i32, i32) {
    %c0_i32 = arith.constant 0 : i32
    %c0_i32_0 = arith.constant 0 : i32
    %c0_i32_1 = arith.constant 0 : i32
    return %c0_i32, %c0_i32_0 : i32, i32
  }
  func.func @transform_2(%arg0: i32) -> (i32, i32) {
    %c0_i32 = arith.constant 0 : i32
    %c0_i32_0 = arith.constant 0 : i32
    return %arg0, %c0_i32 : i32, i32
  }
}

module attributes {stable_mosaic.version = 11 : i64} {
  func.func @fused_agg_linear_kernel(%arg0: i32, %arg1: i32, %arg2: memref<512x512xbf16, #tpu.memory_space<vmem>>, %arg3: memref<512x128xbf16, #tpu.memory_space<vmem>>, %arg4: memref<1x128xf32, #tpu.memory_space<vmem>>, %arg5: memref<128x128xbf16, #tpu.memory_space<vmem>>, %arg6: memref<512x128xbf16, #tpu.memory_space<vmem>>, %arg7: memref<512x128xf32, #tpu.memory_space<vmem>>) attributes {dimension_semantics = [#tpu.dimension_semantics<parallel>, #tpu.dimension_semantics<arbitrary>], iteration_bounds = array<i64: 1, 1>, scalar_prefetch = 0 : i64, scratch_operands = 1 : i64, tpu.core_type = #tpu.core_type<tc>, window_params = [{transform_indices = @transform_0, window_bounds = array<i64: 512, 512>}, {transform_indices = @transform_1, window_bounds = array<i64: 512, 128>}, {pipeline_mode = #tpu.pipeline_mode<synchronous>, transform_indices = @transform_2, window_bounds = array<i64: 1, 128>}, {pipeline_mode = #tpu.pipeline_mode<synchronous>, transform_indices = @transform_3, window_bounds = array<i64: 128, 128>}, {transform_indices = @transform_4, window_bounds = array<i64: 512, 128>}]} {
    %c0_i32 = arith.constant 0 : i32
    %0 = arith.cmpi eq, %arg1, %c0_i32 : i32
    %1 = arith.extui %0 : i1 to i32
    %c0_i32_0 = arith.constant 0 : i32
    %2 = arith.cmpi ne, %1, %c0_i32_0 : i32
    scf.if %2 {
      %cst_10 = arith.constant 0.000000e+00 : f32
      %12 = vector.broadcast %cst_10 : f32 to vector<512x128xf32>
      %c0_11 = arith.constant 0 : index
      %c0_12 = arith.constant 0 : index
      %13 = vector.load %arg7[%c0_11, %c0_12] : memref<512x128xf32, #tpu.memory_space<vmem>>, vector<512x128xf32>
      tpu.vector_store %arg7[%c0_11, %c0_12], %12 {strides = array<i32>} : memref<512x128xf32, #tpu.memory_space<vmem>>, vector<512x128xf32>,
    } else {
    }
    %c0 = arith.constant 0 : index
    %c0_1 = arith.constant 0 : index
    %3 = vector.load %arg7[%c0, %c0_1] : memref<512x128xf32, #tpu.memory_space<vmem>>, vector<512x128xf32>
    %c0_2 = arith.constant 0 : index
    %c0_3 = arith.constant 0 : index
    %4 = vector.load %arg2[%c0_2, %c0_3] : memref<512x512xbf16, #tpu.memory_space<vmem>>, vector<512x512xbf16>
    %c0_4 = arith.constant 0 : index
    %c0_5 = arith.constant 0 : index
    %5 = vector.load %arg3[%c0_4, %c0_5] : memref<512x128xbf16, #tpu.memory_space<vmem>>, vector<512x128xbf16>
    %cst = arith.constant dense<0.000000e+00> : vector<512x128xf32>
    %6 = tpu.matmul %4, %5, %cst {dimension_numbers = #tpu.dot_dimension_numbers<[1], [0], [0], [1], [0, 0, 1, 1], [], []>} : vector<512x512xbf16>, vector<512x128xbf16>, vector<512x128xf32> -> vector<512x128xf32>
    %7 = arith.addf %3, %6 : vector<512x128xf32>
    %c0_6 = arith.constant 0 : index
    %c0_7 = arith.constant 0 : index
    %8 = vector.load %arg7[%c0_6, %c0_7] : memref<512x128xf32, #tpu.memory_space<vmem>>, vector<512x128xf32>
    tpu.vector_store %arg7[%c0_6, %c0_7], %7 {strides = array<i32>} : memref<512x128xf32, #tpu.memory_space<vmem>>, vector<512x128xf32>,
    %c0_i32_8 = arith.constant 0 : i32
    %9 = arith.cmpi eq, %arg1, %c0_i32_8 : i32
    %10 = arith.extui %9 : i1 to i32
    %c0_i32_9 = arith.constant 0 : i32
    %11 = arith.cmpi ne, %10, %c0_i32_9 : i32
    scf.if %11 {
      %c0_10 = arith.constant 0 : index
      %c0_11 = arith.constant 0 : index
      %12 = vector.load %arg7[%c0_10, %c0_11] : memref<512x128xf32, #tpu.memory_space<vmem>>, vector<512x128xf32>
      %c0_12 = arith.constant 0 : index
      %c0_13 = arith.constant 0 : index
      %13 = vector.load %arg4[%c0_12, %c0_13] : memref<1x128xf32, #tpu.memory_space<vmem>>, vector<1x128xf32>
      %14 = vector.broadcast %13 : vector<1x128xf32> to vector<512x128xf32>
      %15 = arith.addf %12, %14 : vector<512x128xf32>
      %cst_14 = arith.constant 0.000000e+00 : f32
      %16 = vector.broadcast %cst_14 : f32 to vector<512x128xf32>
      %17 = arith.maximumf %15, %16 : vector<512x128xf32>
      %18 = arith.truncf %17 : vector<512x128xf32> to vector<512x128xbf16>
      %c0_15 = arith.constant 0 : index
      %c0_16 = arith.constant 0 : index
      %19 = vector.load %arg5[%c0_15, %c0_16] : memref<128x128xbf16, #tpu.memory_space<vmem>>, vector<128x128xbf16>
      %cst_17 = arith.constant dense<0.000000e+00> : vector<512x128xf32>
      %20 = tpu.matmul %18, %19, %cst_17 {dimension_numbers = #tpu.dot_dimension_numbers<[1], [0], [0], [1], [0, 0, 1, 1], [], []>} : vector<512x128xbf16>, vector<128x128xbf16>, vector<512x128xf32> -> vector<512x128xf32>
      %21 = arith.truncf %20 : vector<512x128xf32> to vector<512x128xbf16>
      %c0_18 = arith.constant 0 : index
      %c0_19 = arith.constant 0 : index
      %22 = vector.load %arg6[%c0_18, %c0_19] : memref<512x128xbf16, #tpu.memory_space<vmem>>, vector<512x128xbf16>
      tpu.vector_store %arg6[%c0_18, %c0_19], %21 {strides = array<i32>} : memref<512x128xbf16, #tpu.memory_space<vmem>>, vector<512x128xbf16>,
    } else {
    }
    return
  }
  func.func @transform_0(%arg0: i32, %arg1: i32) -> (i32, i32) {
    %c0_i32 = arith.constant 0 : i32
    return %arg0, %arg1 : i32, i32
  }
  func.func @transform_1(%arg0: i32, %arg1: i32) -> (i32, i32) {
    %c0_i32 = arith.constant 0 : i32
    %c0_i32_0 = arith.constant 0 : i32
    return %arg1, %c0_i32 : i32, i32
  }
  func.func @transform_2(%arg0: i32, %arg1: i32) -> (i32, i32) {
    %c0_i32 = arith.constant 0 : i32
    %c0_i32_0 = arith.constant 0 : i32
    %c0_i32_1 = arith.constant 0 : i32
    return %c0_i32, %c0_i32_0 : i32, i32
  }
  func.func @transform_3(%arg0: i32, %arg1: i32) -> (i32, i32) {
    %c0_i32 = arith.constant 0 : i32
    %c0_i32_0 = arith.constant 0 : i32
    %c0_i32_1 = arith.constant 0 : i32
    return %c0_i32, %c0_i32_0 : i32, i32
  }
  func.func @transform_4(%arg0: i32, %arg1: i32) -> (i32, i32) {
    %c0_i32 = arith.constant 0 : i32
    %c0_i32_0 = arith.constant 0 : i32
    return %arg0, %c0_i32 : i32, i32
  }
}

module attributes {stable_mosaic.version = 11 : i64} {
  func.func @aggregate_kernel(%arg0: i32, %arg1: i32, %arg2: memref<512x512xbf16, #tpu.memory_space<vmem>>, %arg3: memref<512x128xbf16, #tpu.memory_space<vmem>>, %arg4: memref<1x128xf32, #tpu.memory_space<vmem>>, %arg5: memref<512x128xf32, #tpu.memory_space<vmem>>, %arg6: memref<512x128xf32, #tpu.memory_space<vmem>>) attributes {dimension_semantics = [#tpu.dimension_semantics<parallel>, #tpu.dimension_semantics<arbitrary>], iteration_bounds = array<i64: 1, 1>, scalar_prefetch = 0 : i64, scratch_operands = 1 : i64, tpu.core_type = #tpu.core_type<tc>, window_params = [{transform_indices = @transform_0, window_bounds = array<i64: 512, 512>}, {transform_indices = @transform_1, window_bounds = array<i64: 512, 128>}, {pipeline_mode = #tpu.pipeline_mode<synchronous>, transform_indices = @transform_2, window_bounds = array<i64: 1, 128>}, {transform_indices = @transform_3, window_bounds = array<i64: 512, 128>}]} {
    %c0_i32 = arith.constant 0 : i32
    %0 = arith.cmpi eq, %arg1, %c0_i32 : i32
    %1 = arith.extui %0 : i1 to i32
    %c0_i32_0 = arith.constant 0 : i32
    %2 = arith.cmpi ne, %1, %c0_i32_0 : i32
    scf.if %2 {
      %cst_10 = arith.constant 0.000000e+00 : f32
      %12 = vector.broadcast %cst_10 : f32 to vector<512x128xf32>
      %c0_11 = arith.constant 0 : index
      %c0_12 = arith.constant 0 : index
      %13 = vector.load %arg6[%c0_11, %c0_12] : memref<512x128xf32, #tpu.memory_space<vmem>>, vector<512x128xf32>
      tpu.vector_store %arg6[%c0_11, %c0_12], %12 {strides = array<i32>} : memref<512x128xf32, #tpu.memory_space<vmem>>, vector<512x128xf32>,
    } else {
    }
    %c0 = arith.constant 0 : index
    %c0_1 = arith.constant 0 : index
    %3 = vector.load %arg6[%c0, %c0_1] : memref<512x128xf32, #tpu.memory_space<vmem>>, vector<512x128xf32>
    %c0_2 = arith.constant 0 : index
    %c0_3 = arith.constant 0 : index
    %4 = vector.load %arg2[%c0_2, %c0_3] : memref<512x512xbf16, #tpu.memory_space<vmem>>, vector<512x512xbf16>
    %c0_4 = arith.constant 0 : index
    %c0_5 = arith.constant 0 : index
    %5 = vector.load %arg3[%c0_4, %c0_5] : memref<512x128xbf16, #tpu.memory_space<vmem>>, vector<512x128xbf16>
    %cst = arith.constant dense<0.000000e+00> : vector<512x128xf32>
    %6 = tpu.matmul %4, %5, %cst {dimension_numbers = #tpu.dot_dimension_numbers<[1], [0], [0], [1], [0, 0, 1, 1], [], []>} : vector<512x512xbf16>, vector<512x128xbf16>, vector<512x128xf32> -> vector<512x128xf32>
    %7 = arith.addf %3, %6 : vector<512x128xf32>
    %c0_6 = arith.constant 0 : index
    %c0_7 = arith.constant 0 : index
    %8 = vector.load %arg6[%c0_6, %c0_7] : memref<512x128xf32, #tpu.memory_space<vmem>>, vector<512x128xf32>
    tpu.vector_store %arg6[%c0_6, %c0_7], %7 {strides = array<i32>} : memref<512x128xf32, #tpu.memory_space<vmem>>, vector<512x128xf32>,
    %c0_i32_8 = arith.constant 0 : i32
    %9 = arith.cmpi eq, %arg1, %c0_i32_8 : i32
    %10 = arith.extui %9 : i1 to i32
    %c0_i32_9 = arith.constant 0 : i32
    %11 = arith.cmpi ne, %10, %c0_i32_9 : i32
    scf.if %11 {
      %c0_10 = arith.constant 0 : index
      %c0_11 = arith.constant 0 : index
      %12 = vector.load %arg6[%c0_10, %c0_11] : memref<512x128xf32, #tpu.memory_space<vmem>>, vector<512x128xf32>
      %c0_12 = arith.constant 0 : index
      %c0_13 = arith.constant 0 : index
      %13 = vector.load %arg4[%c0_12, %c0_13] : memref<1x128xf32, #tpu.memory_space<vmem>>, vector<1x128xf32>
      %14 = vector.broadcast %13 : vector<1x128xf32> to vector<512x128xf32>
      %15 = arith.addf %12, %14 : vector<512x128xf32>
      %c0_14 = arith.constant 0 : index
      %c0_15 = arith.constant 0 : index
      %16 = vector.load %arg5[%c0_14, %c0_15] : memref<512x128xf32, #tpu.memory_space<vmem>>, vector<512x128xf32>
      tpu.vector_store %arg5[%c0_14, %c0_15], %15 {strides = array<i32>} : memref<512x128xf32, #tpu.memory_space<vmem>>, vector<512x128xf32>,
    } else {
    }
    return
  }
  func.func @transform_0(%arg0: i32, %arg1: i32) -> (i32, i32) {
    %c0_i32 = arith.constant 0 : i32
    return %arg0, %arg1 : i32, i32
  }
  func.func @transform_1(%arg0: i32, %arg1: i32) -> (i32, i32) {
    %c0_i32 = arith.constant 0 : i32
    %c0_i32_0 = arith.constant 0 : i32
    return %arg1, %c0_i32 : i32, i32
  }
  func.func @transform_2(%arg0: i32, %arg1: i32) -> (i32, i32) {
    %c0_i32 = arith.constant 0 : i32
    %c0_i32_0 = arith.constant 0 : i32
    %c0_i32_1 = arith.constant 0 : i32
    return %c0_i32, %c0_i32_0 : i32, i32
  }
  func.func @transform_3(%arg0: i32, %arg1: i32) -> (i32, i32) {
    %c0_i32 = arith.constant 0 : i32
    %c0_i32_0 = arith.constant 0 : i32
    return %arg0, %c0_i32 : i32, i32
  }
}

</mosaic_0001>

<bundles_post_ra>
// kernel: gcn_forward.3
= control target key start
LH: loop header
LB: loop body
LE: loop exit
PB: predicated region body
PF: predicated region fallthrough
CT: control target
= control target key end

     0   :  { %s1711_s1 = inlined_call_operand.vmem [shape: bf16[128,128], index: 1, kind: input, shape index: {}]   ;;  %s1712_s0 = inlined_call_operand.vmem [shape: bf16[512,128], index: 0, kind: input, shape index: {}]   ;;  %s1713_s2 = inlined_call_operand.vmem [shape: bf16[512,128], index: 2, kind: output, shape index: {}]  }
   0x1   :  { %v1440_v0 = vld [vmem:[%s1711_s1 + $0x38] sm:$0xff]   ;;  %v1441_v1 = vld [vmem:[%s1711_s1 + $0x30] sm:$0xff]   ;;  %v1442_v2 = vld [vmem:[%s1711_s1 + $0x28] sm:$0xff]  }
   0x2   :  { %1344 = vmatprep.subr.bf16.mxu0 %v1440_v0  ;;  %1424 = vmatprep.subr.bf16.mxu1 %v1440_v0  ;;  %v1443_v3 = vld [vmem:[%s1711_s1 + $0x20] sm:$0xff]   ;;  %v1444_v6 = vld [vmem:[%s1711_s1 + $0x18] sm:$0xff]   ;;  %v1445_v7 = vld [vmem:[%s1711_s1 + $0x10] sm:$0xff]  }
   0x3   :  { %1345 = vmatpush3.bf16.msra.mxu0 %v1440_v0  ;;  %1432 = vmatpush3.bf16.msra.mxu1 %v1440_v0  ;;  %v1448_v4 = vld [vmem:[%s1712_s0] sm:$0xff]   ;;  %v1446_v8 = vld [vmem:[%s1711_s1 + $0x8] sm:$0xff]   ;;  %v1452_v12 = vld [vmem:[%s1712_s0 + $0x10] sm:$0xff]  }
   0x4   :  { %1346 = vmatprep.subr.bf16.mxu0 %v1441_v1  ;;  %1425 = vmatprep.subr.bf16.mxu1 %v1441_v1  ;;  %v1449_v5 = vld [vmem:[%s1712_s0 + $0x80] sm:$0xff]   ;;  %v1450_v10 = vld [vmem:[%s1712_s0 + $0x8] sm:$0xff]   ;;  %v1453_v13 = vld [vmem:[%s1712_s0 + $0x90] sm:$0xff]  }
   0x5   :  { %1360 = vmatprep.mubr.bf16.mxu0 %v1448_v4  ;;  %1392 = vmatprep.mubr.bf16.mxu1 %v1449_v5  ;;  %v1447_v9 = vld [vmem:[%s1711_s1] sm:$0xff]   ;;  %v1451_v11 = vld [vmem:[%s1712_s0 + $0x88] sm:$0xff]   ;;  %v1454_v14 = vld [vmem:[%s1712_s0 + $0x18] sm:$0xff]  }
   0x6   :  { %v1455_v15 = vld [vmem:[%s1712_s0 + $0x98] sm:$0xff]   ;;  %v1456_v16 = vld [vmem:[%s1712_s0 + $0x20] sm:$0xff]   ;;  %v1458_v18 = vld [vmem:[%s1712_s0 + $0x28] sm:$0xff]  }
   0x7   :  { %1347 = vmatpush3.bf16.msra.mxu0 %v1441_v1  ;;  %1433 = vmatpush3.bf16.msra.mxu1 %v1441_v1  ;;  %v1457_v17 = vld [vmem:[%s1712_s0 + $0xa0] sm:$0xff]   ;;  %v1459_v19 = vld [vmem:[%s1712_s0 + $0xa8] sm:$0xff]   ;;  %v1460_v20 = vld [vmem:[%s1712_s0 + $0x30] sm:$0xff]  }
   0x8   :  { %1348 = vmatprep.subr.bf16.mxu0 %v1442_v2  ;;  %1426 = vmatprep.subr.bf16.mxu1 %v1442_v2  ;;  %v1461_v21 = vld [vmem:[%s1712_s0 + $0xb0] sm:$0xff]   ;;  %v1462_v22 = vld [vmem:[%s1712_s0 + $0x38] sm:$0xff]   ;;  %v1464_v24 = vld [vmem:[%s1712_s0 + $0x40] sm:$0xff]  }
   0x9   :  { %v1463_v23 = vld [vmem:[%s1712_s0 + $0xb8] sm:$0xff]   ;;  %v1465_v25 = vld [vmem:[%s1712_s0 + $0xc0] sm:$0xff]   ;;  %v1466_v26 = vld [vmem:[%s1712_s0 + $0x48] sm:$0xff]  }
   0xa   :  { %v1467_v27 = vld [vmem:[%s1712_s0 + $0xc8] sm:$0xff]   ;;  %v1468_v28 = vld [vmem:[%s1712_s0 + $0x50] sm:$0xff]   ;;  %v1470_v30 = vld [vmem:[%s1712_s0 + $0x58] sm:$0xff]  }
   0xb   :  { %1349 = vmatpush3.bf16.msra.mxu0 %v1442_v2  ;;  %1434 = vmatpush3.bf16.msra.mxu1 %v1442_v2  ;;  %v1469_v29 = vld [vmem:[%s1712_s0 + $0xd0] sm:$0xff]   ;;  %v1471_v31 = vld [vmem:[%s1712_s0 + $0xd8] sm:$0xff]   ;;  %v1472_v32 = vld [vmem:[%s1712_s0 + $0x60] sm:$0xff]  }
   0xc   :  { %1350 = vmatprep.subr.bf16.mxu0 %v1443_v3  ;;  %1427 = vmatprep.subr.bf16.mxu1 %v1443_v3  ;;  %v1473_v33 = vld [vmem:[%s1712_s0 + $0xe0] sm:$0xff]   ;;  %v1474_v34 = vld [vmem:[%s1712_s0 + $0x68] sm:$0xff]   ;;  %v1476_v36 = vld [vmem:[%s1712_s0 + $0x70] sm:$0xff]  }
   0xd   :  { %v1475_v35 = vld [vmem:[%s1712_s0 + $0xe8] sm:$0xff]   ;;  %v1477_v37 = vld [vmem:[%s1712_s0 + $0xf0] sm:$0xff]   ;;  %v1478_v38 = vld [vmem:[%s1712_s0 + $0x78] sm:$0xff]  }
   0xe   :  { %v1479_v39 = vld [vmem:[%s1712_s0 + $0xf8] sm:$0xff]  }
   0xf   :  { %1351 = vmatpush3.bf16.msra.mxu0 %v1443_v3  ;;  %1435 = vmatpush3.bf16.msra.mxu1 %v1443_v3 }
  0x10   :  { %1352 = vmatprep.subr.bf16.mxu0 %v1444_v6  ;;  %1428 = vmatprep.subr.bf16.mxu1 %v1444_v6 }
  0x13   :  { %1353 = vmatpush3.bf16.msra.mxu0 %v1444_v6  ;;  %1436 = vmatpush3.bf16.msra.mxu1 %v1444_v6 }
  0x14   :  { %1354 = vmatprep.subr.bf16.mxu0 %v1445_v7  ;;  %1429 = vmatprep.subr.bf16.mxu1 %v1445_v7 }
  0x17   :  { %1355 = vmatpush3.bf16.msra.mxu0 %v1445_v7  ;;  %1437 = vmatpush3.bf16.msra.mxu1 %v1445_v7 }
  0x18   :  { %1356 = vmatprep.subr.bf16.mxu0 %v1446_v8  ;;  %1430 = vmatprep.subr.bf16.mxu1 %v1446_v8 }
  0x1b   :  { %1357 = vmatpush3.bf16.msra.mxu0 %v1446_v8  ;;  %1438 = vmatpush3.bf16.msra.mxu1 %v1446_v8 }
  0x1c   :  { %1358 = vmatprep.subr.bf16.mxu0 %v1447_v9  ;;  %1431 = vmatprep.subr.bf16.mxu1 %v1447_v9 }
  0x1f   :  { %1359 = vmatpush3.bf16.msra.mxu0 %v1447_v9  ;;  %1439 = vmatpush3.bf16.msra.mxu1 %v1447_v9 }
  0x22   :  { %1361 = vmatmul.mubr.bf16.vlgmr.msra.gmra.mxu0 %v1450_v10  ;;  %1393 = vmatmul.mubr.bf16.vlgmr.msra.gmra.mxu1 %v1451_v11 }
  0x23   :  { %1364 = vmatprep.mubr.bf16.mxu0 %v1452_v12  ;;  %1396 = vmatprep.mubr.bf16.mxu1 %v1453_v13 }
  0x2a   :  { %1365 = vmatmul.mubr.bf16.gmra.mxu0 %v1454_v14  ;;  %1397 = vmatmul.mubr.bf16.gmra.mxu1 %v1455_v15 }
  0x2b   :  { %1368 = vmatprep.mubr.bf16.mxu0 %v1456_v16  ;;  %1400 = vmatprep.mubr.bf16.mxu1 %v1457_v17 }
  0x32   :  { %1369 = vmatmul.mubr.bf16.gmra.mxu0 %v1458_v18  ;;  %1401 = vmatmul.mubr.bf16.gmra.mxu1 %v1459_v19 }
  0x33   :  { %1372 = vmatprep.mubr.bf16.mxu0 %v1460_v20  ;;  %1404 = vmatprep.mubr.bf16.mxu1 %v1461_v21 }
  0x3a   :  { %1373 = vmatmul.mubr.bf16.gmra.mxu0 %v1462_v22  ;;  %1405 = vmatmul.mubr.bf16.gmra.mxu1 %v1463_v23 }
  0x3b   :  { %1376 = vmatprep.mubr.bf16.mxu0 %v1464_v24  ;;  %1408 = vmatprep.mubr.bf16.mxu1 %v1465_v25 }
  0x42   :  { %1377 = vmatmul.mubr.bf16.gmra.mxu0 %v1466_v26  ;;  %1409 = vmatmul.mubr.bf16.gmra.mxu1 %v1467_v27 }
  0x43   :  { %1380 = vmatprep.mubr.bf16.mxu0 %v1468_v28  ;;  %1412 = vmatprep.mubr.bf16.mxu1 %v1469_v29 }
  0x4a   :  { %1381 = vmatmul.mubr.bf16.gmra.mxu0 %v1470_v30  ;;  %1413 = vmatmul.mubr.bf16.gmra.mxu1 %v1471_v31 }
  0x4b   :  { %1384 = vmatprep.mubr.bf16.mxu0 %v1472_v32  ;;  %1416 = vmatprep.mubr.bf16.mxu1 %v1473_v33 }
  0x52   :  { %1385 = vmatmul.mubr.bf16.gmra.mxu0 %v1474_v34  ;;  %1417 = vmatmul.mubr.bf16.gmra.mxu1 %v1475_v35 }
  0x53   :  { %1388 = vmatprep.mubr.bf16.mxu0 %v1476_v36  ;;  %1420 = vmatprep.mubr.bf16.mxu1 %v1477_v37 }
  0x5a   :  { %1389 = vmatmul.mubr.bf16.gmra.mxu0 %v1478_v38  ;;  %1421 = vmatmul.mubr.bf16.gmra.mxu1 %v1479_v39 }
  0xe2   :  { %v1362_v40 = vpop.f32.mrf.mxu0  ;;  %v1394_v41 = vpop.f32.mrf.mxu1 }
  0xe4   :  { %v366_v42 = vpop.f32.mrf.mxu0  ;;  %v494_v43 = vpop.f32.mrf.mxu1 }
  0xe6   :  { %v1363_v44 = vpop.f32.mrf.mxu0  ;;  %v1395_v45 = vpop.f32.mrf.mxu1 }
  0xe7   :  { %v1121_v46 = vpack.c.bf16 %v1363_v44, %v1362_v40  ;;  %v1201_v47 = vpack.c.bf16 %v1395_v45, %v1394_v41 }
  0xe8   :  { %v369_v48 = vpop.f32.mrf.mxu0  ;;  %v497_v49 = vpop.f32.mrf.mxu1 }
  0xe9   :  { %1273 = vst [vmem:[%s1713_s2 + $0x8] sm:$0xff] %v1121_v46   ;;  %1289 = vst [vmem:[%s1713_s2 + $0x88] sm:$0xff] %v1201_v47   ;;  %v1116_v50 = vpack.c.bf16 %v369_v48, %v366_v42  ;;  %v1196_v51 = vpack.c.bf16 %v497_v49, %v494_v43 }
  0xea   :  { %v1366_v52 = vpop.f32.mrf.mxu0  ;;  %v1398_v53 = vpop.f32.mrf.mxu1 }
  0xeb   :  { %1117 = vst [vmem:[%s1713_s2] sm:$0xff] %v1116_v50   ;;  %1288 = vst [vmem:[%s1713_s2 + $0x80] sm:$0xff] %v1196_v51  }
  0xec   :  { %v382_v54 = vpop.f32.mrf.mxu0  ;;  %v510_v55 = vpop.f32.mrf.mxu1 }
  0xee   :  { %v1367_v56 = vpop.f32.mrf.mxu0  ;;  %v1399_v57 = vpop.f32.mrf.mxu1 }
  0xef   :  { %v1131_v58 = vpack.c.bf16 %v1367_v56, %v1366_v52  ;;  %v1211_v59 = vpack.c.bf16 %v1399_v57, %v1398_v53 }
  0xf0   :  { %v385_v60 = vpop.f32.mrf.mxu0  ;;  %v513_v61 = vpop.f32.mrf.mxu1 }
  0xf1   :  { %1275 = vst [vmem:[%s1713_s2 + $0x18] sm:$0xff] %v1131_v58   ;;  %1291 = vst [vmem:[%s1713_s2 + $0x98] sm:$0xff] %v1211_v59   ;;  %v1126_v62 = vpack.c.bf16 %v385_v60, %v382_v54  ;;  %v1206_v63 = vpack.c.bf16 %v513_v61, %v510_v55 }
  0xf2   :  { %v1370_v0 = vpop.f32.mrf.mxu0  ;;  %v1402_v1 = vpop.f32.mrf.mxu1 }
  0xf3   :  { %1274 = vst [vmem:[%s1713_s2 + $0x10] sm:$0xff] %v1126_v62   ;;  %1290 = vst [vmem:[%s1713_s2 + $0x90] sm:$0xff] %v1206_v63  }
  0xf4   :  { %v398_v2 = vpop.f32.mrf.mxu0  ;;  %v526_v3 = vpop.f32.mrf.mxu1 }
  0xf6   :  { %v1371_v4 = vpop.f32.mrf.mxu0  ;;  %v1403_v5 = vpop.f32.mrf.mxu1 }
  0xf7   :  { %v1141_v6 = vpack.c.bf16 %v1371_v4, %v1370_v0  ;;  %v1221_v7 = vpack.c.bf16 %v1403_v5, %v1402_v1 }
  0xf8   :  { %v401_v8 = vpop.f32.mrf.mxu0  ;;  %v529_v9 = vpop.f32.mrf.mxu1 }
  0xf9   :  { %1277 = vst [vmem:[%s1713_s2 + $0x28] sm:$0xff] %v1141_v6   ;;  %1293 = vst [vmem:[%s1713_s2 + $0xa8] sm:$0xff] %v1221_v7   ;;  %v1136_v10 = vpack.c.bf16 %v401_v8, %v398_v2  ;;  %v1216_v11 = vpack.c.bf16 %v529_v9, %v526_v3 }
  0xfa   :  { %v1374_v12 = vpop.f32.mrf.mxu0  ;;  %v1406_v13 = vpop.f32.mrf.mxu1 }
  0xfb   :  { %1276 = vst [vmem:[%s1713_s2 + $0x20] sm:$0xff] %v1136_v10   ;;  %1292 = vst [vmem:[%s1713_s2 + $0xa0] sm:$0xff] %v1216_v11  }
  0xfc   :  { %v414_v14 = vpop.f32.mrf.mxu0  ;;  %v542_v15 = vpop.f32.mrf.mxu1 }
  0xfe   :  { %v1375_v16 = vpop.f32.mrf.mxu0  ;;  %v1407_v17 = vpop.f32.mrf.mxu1 }
  0xff   :  { %v1151_v18 = vpack.c.bf16 %v1375_v16, %v1374_v12  ;;  %v1231_v19 = vpack.c.bf16 %v1407_v17, %v1406_v13 }
 0x100   :  { %v417_v20 = vpop.f32.mrf.mxu0  ;;  %v545_v21 = vpop.f32.mrf.mxu1 }
 0x101   :  { %1279 = vst [vmem:[%s1713_s2 + $0x38] sm:$0xff] %v1151_v18   ;;  %1295 = vst [vmem:[%s1713_s2 + $0xb8] sm:$0xff] %v1231_v19   ;;  %v1146_v22 = vpack.c.bf16 %v417_v20, %v414_v14  ;;  %v1226_v23 = vpack.c.bf16 %v545_v21, %v542_v15 }
 0x102   :  { %v1378_v24 = vpop.f32.mrf.mxu0  ;;  %v1410_v25 = vpop.f32.mrf.mxu1 }
 0x103   :  { %1278 = vst [vmem:[%s1713_s2 + $0x30] sm:$0xff] %v1146_v22   ;;  %1294 = vst [vmem:[%s1713_s2 + $0xb0] sm:$0xff] %v1226_v23  }
 0x104   :  { %v430_v26 = vpop.f32.mrf.mxu0  ;;  %v558_v27 = vpop.f32.mrf.mxu1 }
 0x106   :  { %v1379_v28 = vpop.f32.mrf.mxu0  ;;  %v1411_v29 = vpop.f32.mrf.mxu1 }
 0x107   :  { %v1161_v30 = vpack.c.bf16 %v1379_v28, %v1378_v24  ;;  %v1241_v31 = vpack.c.bf16 %v1411_v29, %v1410_v25 }
 0x108   :  { %v433_v32 = vpop.f32.mrf.mxu0  ;;  %v561_v33 = vpop.f32.mrf.mxu1 }
 0x109   :  { %1281 = vst [vmem:[%s1713_s2 + $0x48] sm:$0xff] %v1161_v30   ;;  %1297 = vst [vmem:[%s1713_s2 + $0xc8] sm:$0xff] %v1241_v31   ;;  %v1156_v34 = vpack.c.bf16 %v433_v32, %v430_v26  ;;  %v1236_v35 = vpack.c.bf16 %v561_v33, %v558_v27 }
 0x10a   :  { %v1382_v36 = vpop.f32.mrf.mxu0  ;;  %v1414_v37 = vpop.f32.mrf.mxu1 }
 0x10b   :  { %1280 = vst [vmem:[%s1713_s2 + $0x40] sm:$0xff] %v1156_v34   ;;  %1296 = vst [vmem:[%s1713_s2 + $0xc0] sm:$0xff] %v1236_v35  }
 0x10c   :  { %v446_v38 = vpop.f32.mrf.mxu0  ;;  %v574_v39 = vpop.f32.mrf.mxu1 }
 0x10e   :  { %v1383_v40 = vpop.f32.mrf.mxu0  ;;  %v1415_v41 = vpop.f32.mrf.mxu1 }
 0x10f   :  { %v1171_v42 = vpack.c.bf16 %v1383_v40, %v1382_v36  ;;  %v1251_v43 = vpack.c.bf16 %v1415_v41, %v1414_v37 }
 0x110   :  { %v449_v44 = vpop.f32.mrf.mxu0  ;;  %v577_v45 = vpop.f32.mrf.mxu1 }
 0x111   :  { %1283 = vst [vmem:[%s1713_s2 + $0x58] sm:$0xff] %v1171_v42   ;;  %1299 = vst [vmem:[%s1713_s2 + $0xd8] sm:$0xff] %v1251_v43   ;;  %v1166_v46 = vpack.c.bf16 %v449_v44, %v446_v38  ;;  %v1246_v47 = vpack.c.bf16 %v577_v45, %v574_v39 }
 0x112   :  { %v1386_v48 = vpop.f32.mrf.mxu0  ;;  %v1418_v49 = vpop.f32.mrf.mxu1 }
 0x113   :  { %1282 = vst [vmem:[%s1713_s2 + $0x50] sm:$0xff] %v1166_v46   ;;  %1298 = vst [vmem:[%s1713_s2 + $0xd0] sm:$0xff] %v1246_v47  }
 0x114   :  { %v462_v50 = vpop.f32.mrf.mxu0  ;;  %v590_v51 = vpop.f32.mrf.mxu1 }
 0x116   :  { %v1387_v52 = vpop.f32.mrf.mxu0  ;;  %v1419_v53 = vpop.f32.mrf.mxu1 }
 0x117   :  { %v1181_v54 = vpack.c.bf16 %v1387_v52, %v1386_v48  ;;  %v1261_v55 = vpack.c.bf16 %v1419_v53, %v1418_v49 }
 0x118   :  { %v465_v56 = vpop.f32.mrf.mxu0  ;;  %v593_v57 = vpop.f32.mrf.mxu1 }
 0x119   :  { %1285 = vst [vmem:[%s1713_s2 + $0x68] sm:$0xff] %v1181_v54   ;;  %1301 = vst [vmem:[%s1713_s2 + $0xe8] sm:$0xff] %v1261_v55   ;;  %v1176_v58 = vpack.c.bf16 %v465_v56, %v462_v50  ;;  %v1256_v59 = vpack.c.bf16 %v593_v57, %v590_v51 }
 0x11a   :  { %v1390_v60 = vpop.f32.mrf.mxu0  ;;  %v1422_v61 = vpop.f32.mrf.mxu1 }
 0x11b   :  { %1284 = vst [vmem:[%s1713_s2 + $0x60] sm:$0xff] %v1176_v58   ;;  %1300 = vst [vmem:[%s1713_s2 + $0xe0] sm:$0xff] %v1256_v59  }
 0x11c   :  { %v478_v62 = vpop.f32.mrf.mxu0  ;;  %v606_v63 = vpop.f32.mrf.mxu1 }
 0x11e   :  { %v1391_v0 = vpop.f32.mrf.mxu0  ;;  %v1423_v1 = vpop.f32.mrf.mxu1 }
 0x11f   :  { %v1191_v2 = vpack.c.bf16 %v1391_v0, %v1390_v60  ;;  %v1271_v3 = vpack.c.bf16 %v1423_v1, %v1422_v61 }
 0x120   :  { %v481_v4 = vpop.f32.mrf.mxu0  ;;  %v609_v5 = vpop.f32.mrf.mxu1 }
 0x121   :  { %1287 = vst [vmem:[%s1713_s2 + $0x78] sm:$0xff] %v1191_v2   ;;  %1303 = vst [vmem:[%s1713_s2 + $0xf8] sm:$0xff] %v1271_v3   ;;  %v1186_v6 = vpack.c.bf16 %v481_v4, %v478_v62  ;;  %v1266_v7 = vpack.c.bf16 %v609_v5, %v606_v63 }
 0x123   :  { %1286 = vst [vmem:[%s1713_s2 + $0x70] sm:$0xff] %v1186_v6   ;;  %1302 = vst [vmem:[%s1713_s2 + $0xf0] sm:$0xff] %v1266_v7  }

// kernel: gcn_forward.5
= control target key start
LH: loop header
LB: loop body
LE: loop exit
PB: predicated region body
PF: predicated region fallthrough
CT: control target
= control target key end

     0   :  { %v2469_v0 = vmov 0   ;;  %s3263_s1 = inlined_call_operand.vmem [shape: bf16[512,128], index: 1, kind: input, shape index: {}]   ;;  %s3264_s0 = inlined_call_operand.vmem [shape: bf16[512,512], index: 0, kind: input, shape index: {}]   ;;  %s3265_s2 = inlined_call_operand.vmem [shape: f32[1,128], index: 2, kind: input, shape index: {}]   ;;  %s3266_s3 = inlined_call_operand.vmem [shape: f32[512,128], index: 3, kind: output, shape index: {}]  }
   0x1   :  { %1171 = vmatprep.subr.bf16.mxu0 %v2469_v0  ;;  %1460 = vmatprep.subr.bf16.mxu1 %v2469_v0  ;;  %v2245_v1 = vld [vmem:[%s3263_s1 + $0x38] sm:$0xff]   ;;  %v2247_v3 = vld [vmem:[%s3263_s1 + $0x30] sm:$0xff]   ;;  %v2249_v5 = vld [vmem:[%s3263_s1 + $0x28] sm:$0xff]  }
   0x2   :  { %v2246_v2 = vld [vmem:[%s3263_s1 + $0xb8] sm:$0xff]   ;;  %1172 = vmatpush1.bf16.msra.mxu0 %v2245_v1  ;;  %v2248_v4 = vld [vmem:[%s3263_s1 + $0xb0] sm:$0xff]   ;;  %v2250_v6 = vld [vmem:[%s3263_s1 + $0xa8] sm:$0xff]  }
   0x3   :  { %1461 = vmatpush1.bf16.msra.mxu1 %v2246_v2  ;;  %1173 = vmatprep.subr.bf16.mxu0 %v2469_v0  ;;  %v2251_v7 = vld [vmem:[%s3263_s1 + $0x20] sm:$0xff]   ;;  %v2253_v9 = vld [vmem:[%s3263_s1 + $0x18] sm:$0xff]   ;;  %v2255_v11 = vld [vmem:[%s3263_s1 + $0x10] sm:$0xff]  }
   0x4   :  { %1462 = vmatprep.subr.bf16.mxu1 %v2469_v0  ;;  %v2252_v8 = vld [vmem:[%s3263_s1 + $0xa0] sm:$0xff]   ;;  %v2254_v10 = vld [vmem:[%s3263_s1 + $0x98] sm:$0xff]   ;;  %v2256_v12 = vld [vmem:[%s3263_s1 + $0x90] sm:$0xff]  }
   0x5   :  { %v2257_v13 = vld [vmem:[%s3263_s1 + $0x8] sm:$0xff]   ;;  %v2259_v15 = vld [vmem:[%s3263_s1] sm:$0xff]   ;;  %v2261_v17 = vld [vmem:[%s3263_s1 + $0x78] sm:$0xff]  }
   0x6   :  { %1174 = vmatpush1.bf16.msra.mxu0 %v2247_v3  ;;  %v2258_v14 = vld [vmem:[%s3263_s1 + $0x88] sm:$0xff]   ;;  %v2260_v16 = vld [vmem:[%s3263_s1 + $0x80] sm:$0xff]   ;;  %v2262_v18 = vld [vmem:[%s3263_s1 + $0xf8] sm:$0xff]  }
   0x7   :  { %1463 = vmatpush1.bf16.msra.mxu1 %v2248_v4  ;;  %1175 = vmatprep.subr.bf16.mxu0 %v2469_v0  ;;  %v2279_v19 = vld [vmem:[%s3264_s0 + $0x4] ss:$16 sps:$4 sm:$0xff]   ;;  %v2282_v21 = vld [vmem:[%s3264_s0 + $0xc] ss:$16 sps:$4 sm:$0xff]   ;;  %v2277_v35 = vld [vmem:[%s3264_s0] ss:$16 sps:$4 sm:$0xff]  }
   0x8   :  { %1464 = vmatprep.subr.bf16.mxu1 %v2469_v0  ;;  %v2263_v20 = vld [vmem:[%s3263_s1 + $0x70] sm:$0xff]   ;;  %1203 = vmatprep.mubr.bf16.mxu0 %v2279_v19  ;;  %v2265_v23 = vld [vmem:[%s3263_s1 + $0x68] sm:$0xff]   ;;  %v2267_v25 = vld [vmem:[%s3263_s1 + $0x60] sm:$0xff]  }
   0x9   :  { %v2264_v22 = vld [vmem:[%s3263_s1 + $0xf0] sm:$0xff]   ;;  %1492 = vmatprep.mubr.bf16.mxu1 %v2282_v21  ;;  %v2266_v24 = vld [vmem:[%s3263_s1 + $0xe8] sm:$0xff]   ;;  %v2268_v26 = vld [vmem:[%s3263_s1 + $0xe0] sm:$0xff]  }
   0xa   :  { %1176 = vmatpush1.bf16.msra.mxu0 %v2249_v5  ;;  %v2269_v27 = vld [vmem:[%s3263_s1 + $0x58] sm:$0xff]   ;;  %v2271_v29 = vld [vmem:[%s3263_s1 + $0x50] sm:$0xff]   ;;  %v2273_v31 = vld [vmem:[%s3263_s1 + $0x48] sm:$0xff]  }
   0xb   :  { %1465 = vmatpush1.bf16.msra.mxu1 %v2250_v6  ;;  %1177 = vmatprep.subr.bf16.mxu0 %v2469_v0  ;;  %v2270_v28 = vld [vmem:[%s3263_s1 + $0xd8] sm:$0xff]   ;;  %v2272_v30 = vld [vmem:[%s3263_s1 + $0xd0] sm:$0xff]   ;;  %v2274_v32 = vld [vmem:[%s3263_s1 + $0xc8] sm:$0xff]  }
   0xc   :  { %1466 = vmatprep.subr.bf16.mxu1 %v2469_v0  ;;  %v2275_v33 = vld [vmem:[%s3263_s1 + $0x40] sm:$0xff]   ;;  %v2280_v36 = vld [vmem:[%s3264_s0 + $0x8] ss:$16 sps:$4 sm:$0xff]   ;;  %v2285_v38 = vld [vmem:[%s3264_s0 + $0x2c] ss:$16 sps:$4 sm:$0xff]  }
   0xd   :  { %v2276_v34 = vld [vmem:[%s3263_s1 + $0xc0] sm:$0xff]   ;;  %v2288_v40 = vld [vmem:[%s3264_s0 + $0x28] ss:$16 sps:$4 sm:$0xff]   ;;  %v2291_v42 = vld [vmem:[%s3264_s0 + $0x4c] ss:$16 sps:$4 sm:$0xff]  }
   0xe   :  { %1178 = vmatpush1.bf16.msra.mxu0 %v2251_v7  ;;  %v2283_v37 = vld [vmem:[%s3264_s0 + $0x24] ss:$16 sps:$4 sm:$0xff]   ;;  %v2287_v39 = vld [vmem:[%s3264_s0 + $0x20] ss:$16 sps:$4 sm:$0xff]   ;;  %v2294_v44 = vld [vmem:[%s3264_s0 + $0x48] ss:$16 sps:$4 sm:$0xff]  }
   0xf   :  { %1467 = vmatpush1.bf16.msra.mxu1 %v2252_v8  ;;  %1179 = vmatprep.subr.bf16.mxu0 %v2469_v0  ;;  %v2289_v41 = vld [vmem:[%s3264_s0 + $0x44] ss:$16 sps:$4 sm:$0xff]   ;;  %v2293_v43 = vld [vmem:[%s3264_s0 + $0x40] ss:$16 sps:$4 sm:$0xff]   ;;  %v2297_v46 = vld [vmem:[%s3264_s0 + $0x6c] ss:$16 sps:$4 sm:$0xff]  }
  0x10   :  { %1468 = vmatprep.subr.bf16.mxu1 %v2469_v0  ;;  %v2295_v45 = vld [vmem:[%s3264_s0 + $0x64] ss:$16 sps:$4 sm:$0xff]   ;;  %v2299_v47 = vld [vmem:[%s3264_s0 + $0x60] ss:$16 sps:$4 sm:$0xff]   ;;  %v2300_v48 = vld [vmem:[%s3264_s0 + $0x68] ss:$16 sps:$4 sm:$0xff]  }
  0x11   :  { %v2301_v49 = vld [vmem:[%s3264_s0 + $0x84] ss:$16 sps:$4 sm:$0xff]   ;;  %v2303_v50 = vld [vmem:[%s3264_s0 + $0x8c] ss:$16 sps:$4 sm:$0xff]   ;;  %v2305_v51 = vld [vmem:[%s3264_s0 + $0x80] ss:$16 sps:$4 sm:$0xff]  }
  0x12   :  { %1180 = vmatpush1.bf16.msra.mxu0 %v2253_v9  ;;  %v2306_v52 = vld [vmem:[%s3264_s0 + $0x88] ss:$16 sps:$4 sm:$0xff]   ;;  %v2307_v53 = vld [vmem:[%s3264_s0 + $0xa4] ss:$16 sps:$4 sm:$0xff]   ;;  %v2309_v54 = vld [vmem:[%s3264_s0 + $0xac] ss:$16 sps:$4 sm:$0xff]  }
  0x13   :  { %1469 = vmatpush1.bf16.msra.mxu1 %v2254_v10  ;;  %1181 = vmatprep.subr.bf16.mxu0 %v2469_v0  ;;  %v2311_v55 = vld [vmem:[%s3264_s0 + $0xa0] ss:$16 sps:$4 sm:$0xff]   ;;  %v2312_v56 = vld [vmem:[%s3264_s0 + $0xa8] ss:$16 sps:$4 sm:$0xff]   ;;  %v2313_v57 = vld [vmem:[%s3264_s0 + $0xc4] ss:$16 sps:$4 sm:$0xff]  }
  0x14   :  { %1470 = vmatprep.subr.bf16.mxu1 %v2469_v0  ;;  %v2315_v58 = vld [vmem:[%s3264_s0 + $0xcc] ss:$16 sps:$4 sm:$0xff]   ;;  %v2317_v59 = vld [vmem:[%s3264_s0 + $0xc0] ss:$16 sps:$4 sm:$0xff]   ;;  %v2318_v60 = vld [vmem:[%s3264_s0 + $0xc8] ss:$16 sps:$4 sm:$0xff]  }
  0x15   :  { %v2319_v61 = vld [vmem:[%s3264_s0 + $0xe4] ss:$16 sps:$4 sm:$0xff]   ;;  %v2321_v62 = vld [vmem:[%s3264_s0 + $0xec] ss:$16 sps:$4 sm:$0xff]   ;;  %v2323_v63 = vld [vmem:[%s3264_s0 + $0xe0] ss:$16 sps:$4 sm:$0xff]  }
  0x16   :  { %1182 = vmatpush1.bf16.msra.mxu0 %v2255_v11  ;;  %v2325_v1 = vld [vmem:[%s3264_s0 + $0x104] ss:$16 sps:$4 sm:$0xff]   ;;  %v2327_v2 = vld [vmem:[%s3264_s0 + $0x10c] ss:$16 sps:$4 sm:$0xff]   ;;  %v2329_v3 = vld [vmem:[%s3264_s0 + $0x100] ss:$16 sps:$4 sm:$0xff]  }
  0x17   :  { %1471 = vmatpush1.bf16.msra.mxu1 %v2256_v12  ;;  %1183 = vmatprep.subr.bf16.mxu0 %v2469_v0  ;;  %v2330_v4 = vld [vmem:[%s3264_s0 + $0x108] ss:$16 sps:$4 sm:$0xff]   ;;  %v2331_v5 = vld [vmem:[%s3264_s0 + $0x124] ss:$16 sps:$4 sm:$0xff]   ;;  %v2333_v6 = vld [vmem:[%s3264_s0 + $0x12c] ss:$16 sps:$4 sm:$0xff]  }
  0x18   :  { %1472 = vmatprep.subr.bf16.mxu1 %v2469_v0  ;;  %v2335_v7 = vld [vmem:[%s3264_s0 + $0x120] ss:$16 sps:$4 sm:$0xff]   ;;  %v2336_v8 = vld [vmem:[%s3264_s0 + $0x128] ss:$16 sps:$4 sm:$0xff]   ;;  %v2337_v9 = vld [vmem:[%s3264_s0 + $0x144] ss:$16 sps:$4 sm:$0xff]  }
  0x19   :  { %v2339_v10 = vld [vmem:[%s3264_s0 + $0x14c] ss:$16 sps:$4 sm:$0xff]   ;;  %v2341_v11 = vld [vmem:[%s3264_s0 + $0x140] ss:$16 sps:$4 sm:$0xff]   ;;  %v2342_v12 = vld [vmem:[%s3264_s0 + $0x148] ss:$16 sps:$4 sm:$0xff]  }
  0x1a   :  { %1184 = vmatpush1.bf16.msra.mxu0 %v2257_v13  ;;  %v2343_v13 = vld [vmem:[%s3264_s0 + $0x164] ss:$16 sps:$4 sm:$0xff]   ;;  %v2353_v19 = vld [vmem:[%s3264_s0 + $0x180] ss:$16 sps:$4 sm:$0xff]  }
  0x1b   :  { %1473 = vmatpush1.bf16.msra.mxu1 %v2258_v14  ;;  %1185 = vmatprep.subr.bf16.mxu0 %v2469_v0  ;;  %v2345_v14 = vld [vmem:[%s3264_s0 + $0x16c] ss:$16 sps:$4 sm:$0xff]   ;;  %v2355_v21 = vld [vmem:[%s3264_s0 + $0x1a4] ss:$16 sps:$4 sm:$0xff]  }
  0x1c   :  { %1474 = vmatprep.subr.bf16.mxu1 %v2469_v0 }
  0x1e   :  { %1186 = vmatpush1.bf16.msra.mxu0 %v2259_v15  ;;  %v2347_v15 = vld [vmem:[%s3264_s0 + $0x160] ss:$16 sps:$4 sm:$0xff]  }
  0x1f   :  { %1475 = vmatpush1.bf16.msra.mxu1 %v2260_v16  ;;  %1187 = vmatprep.subr.bf16.mxu0 %v2469_v0  ;;  %v2348_v16 = vld [vmem:[%s3264_s0 + $0x168] ss:$16 sps:$4 sm:$0xff]  }
  0x20   :  { %1476 = vmatprep.subr.bf16.mxu1 %v2469_v0 }
  0x22   :  { %1188 = vmatpush2.bf16.msra.mxu0 %v2261_v17  ;;  %v2349_v17 = vld [vmem:[%s3264_s0 + $0x184] ss:$16 sps:$4 sm:$0xff]  }
  0x23   :  { %1477 = vmatpush2.bf16.msra.mxu1 %v2262_v18  ;;  %1189 = vmatprep.subr.bf16.mxu0 %v2469_v0  ;;  %v2351_v18 = vld [vmem:[%s3264_s0 + $0x18c] ss:$16 sps:$4 sm:$0xff]  }
  0x24   :  { %1478 = vmatprep.subr.bf16.mxu1 %v2469_v0 }
  0x26   :  { %1190 = vmatpush2.bf16.msra.mxu0 %v2263_v20  ;;  %v2354_v20 = vld [vmem:[%s3264_s0 + $0x188] ss:$16 sps:$4 sm:$0xff]  }
  0x27   :  { %1479 = vmatpush2.bf16.msra.mxu1 %v2264_v22  ;;  %1191 = vmatprep.subr.bf16.mxu0 %v2469_v0  ;;  %v2357_v22 = vld [vmem:[%s3264_s0 + $0x1ac] ss:$16 sps:$4 sm:$0xff]  }
  0x28   :  { %1480 = vmatprep.subr.bf16.mxu1 %v2469_v0 }
  0x2a   :  { %1192 = vmatpush2.bf16.msra.mxu0 %v2265_v23  ;;  %v2359_v23 = vld [vmem:[%s3264_s0 + $0x1a0] ss:$16 sps:$4 sm:$0xff]  }
  0x2b   :  { %1481 = vmatpush2.bf16.msra.mxu1 %v2266_v24  ;;  %1193 = vmatprep.subr.bf16.mxu0 %v2469_v0  ;;  %v2360_v24 = vld [vmem:[%s3264_s0 + $0x1a8] ss:$16 sps:$4 sm:$0xff]  }
  0x2c   :  { %1482 = vmatprep.subr.bf16.mxu1 %v2469_v0 }
  0x2e   :  { %1194 = vmatpush2.bf16.msra.mxu0 %v2267_v25  ;;  %v2361_v25 = vld [vmem:[%s3264_s0 + $0x1c4] ss:$16 sps:$4 sm:$0xff]  }
  0x2f   :  { %1483 = vmatpush2.bf16.msra.mxu1 %v2268_v26  ;;  %1195 = vmatprep.subr.bf16.mxu0 %v2469_v0  ;;  %v2363_v26 = vld [vmem:[%s3264_s0 + $0x1cc] ss:$16 sps:$4 sm:$0xff]  }
  0x30   :  { %1484 = vmatprep.subr.bf16.mxu1 %v2469_v0 }
  0x32   :  { %1196 = vmatpush2.bf16.msra.mxu0 %v2269_v27  ;;  %v2365_v27 = vld [vmem:[%s3264_s0 + $0x1c0] ss:$16 sps:$4 sm:$0xff]  }
  0x33   :  { %1485 = vmatpush2.bf16.msra.mxu1 %v2270_v28  ;;  %1197 = vmatprep.subr.bf16.mxu0 %v2469_v0  ;;  %v2366_v28 = vld [vmem:[%s3264_s0 + $0x1c8] ss:$16 sps:$4 sm:$0xff]  }
  0x34   :  { %1486 = vmatprep.subr.bf16.mxu1 %v2469_v0 }
  0x36   :  { %1198 = vmatpush2.bf16.msra.mxu0 %v2271_v29  ;;  %v2367_v29 = vld [vmem:[%s3264_s0 + $0x1e4] ss:$16 sps:$4 sm:$0xff]  }
  0x37   :  { %1487 = vmatpush2.bf16.msra.mxu1 %v2272_v30  ;;  %1199 = vmatprep.subr.bf16.mxu0 %v2469_v0  ;;  %v2369_v30 = vld [vmem:[%s3264_s0 + $0x1ec] ss:$16 sps:$4 sm:$0xff]  }
  0x38   :  { %1488 = vmatprep.subr.bf16.mxu1 %v2469_v0 }
  0x3a   :  { %1200 = vmatpush2.bf16.msra.mxu0 %v2273_v31  ;;  %v2371_v31 = vld [vmem:[%s3264_s0 + $0x1e0] ss:$16 sps:$4 sm:$0xff]  }
  0x3b   :  { %1489 = vmatpush2.bf16.msra.mxu1 %v2274_v32  ;;  %1201 = vmatprep.subr.bf16.mxu0 %v2469_v0  ;;  %v2372_v32 = vld [vmem:[%s3264_s0 + $0x1e8] ss:$16 sps:$4 sm:$0xff]  }
  0x3c   :  { %1490 = vmatprep.subr.bf16.mxu1 %v2469_v0  ;;  %v2324_v0 = vld [vmem:[%s3264_s0 + $0xe8] ss:$16 sps:$4 sm:$0xff]  }
  0x3e   :  { %1202 = vmatpush2.bf16.msra.mxu0 %v2275_v33  ;;  %v2373_v33 = vld [vmem:[%s3264_s0 + $0x204] ss:$16 sps:$4 sm:$0xff]  }
  0x3f   :  { %1491 = vmatpush2.bf16.msra.mxu1 %v2276_v34  ;;  %v2375_v34 = vld [vmem:[%s3264_s0 + $0x20c] ss:$16 sps:$4 sm:$0xff]  }
  0x41   :  { %1204 = vmatmul.mubr.bf16.vlgmr.msra.gmra.mxu0 %v2277_v35  ;;  %v2377_v35 = vld [vmem:[%s3264_s0 + $0x200] ss:$16 sps:$4 sm:$0xff]  }
  0x42   :  { %1493 = vmatmul.mubr.bf16.vlgmr.msra.gmra.mxu1 %v2280_v36  ;;  %1211 = vmatprep.mubr.bf16.mxu0 %v2283_v37  ;;  %v2378_v36 = vld [vmem:[%s3264_s0 + $0x208] ss:$16 sps:$4 sm:$0xff]   ;;  %v2379_v37 = vld [vmem:[%s3264_s0 + $0x224] ss:$16 sps:$4 sm:$0xff]  }
  0x43   :  { %1500 = vmatprep.mubr.bf16.mxu1 %v2285_v38  ;;  %v2381_v38 = vld [vmem:[%s3264_s0 + $0x22c] ss:$16 sps:$4 sm:$0xff]  }
  0x49   :  { %1212 = vmatmul.mubr.bf16.gmra.mxu0 %v2287_v39  ;;  %v2383_v39 = vld [vmem:[%s3264_s0 + $0x220] ss:$16 sps:$4 sm:$0xff]  }
  0x4a   :  { %1501 = vmatmul.mubr.bf16.gmra.mxu1 %v2288_v40  ;;  %1219 = vmatprep.mubr.bf16.mxu0 %v2289_v41  ;;  %v2384_v40 = vld [vmem:[%s3264_s0 + $0x228] ss:$16 sps:$4 sm:$0xff]   ;;  %v2385_v41 = vld [vmem:[%s3264_s0 + $0x244] ss:$16 sps:$4 sm:$0xff]  }
  0x4b   :  { %1508 = vmatprep.mubr.bf16.mxu1 %v2291_v42  ;;  %v2387_v42 = vld [vmem:[%s3264_s0 + $0x24c] ss:$16 sps:$4 sm:$0xff]  }
  0x51   :  { %1220 = vmatmul.mubr.bf16.gmra.mxu0 %v2293_v43  ;;  %v2389_v43 = vld [vmem:[%s3264_s0 + $0x240] ss:$16 sps:$4 sm:$0xff]  }
  0x52   :  { %1509 = vmatmul.mubr.bf16.gmra.mxu1 %v2294_v44  ;;  %1227 = vmatprep.mubr.bf16.mxu0 %v2295_v45  ;;  %v2390_v44 = vld [vmem:[%s3264_s0 + $0x248] ss:$16 sps:$4 sm:$0xff]   ;;  %v2391_v45 = vld [vmem:[%s3264_s0 + $0x264] ss:$16 sps:$4 sm:$0xff]  }
  0x53   :  { %1516 = vmatprep.mubr.bf16.mxu1 %v2297_v46  ;;  %v2393_v46 = vld [vmem:[%s3264_s0 + $0x26c] ss:$16 sps:$4 sm:$0xff]  }
  0x59   :  { %1228 = vmatmul.mubr.bf16.gmra.mxu0 %v2299_v47  ;;  %v2395_v47 = vld [vmem:[%s3264_s0 + $0x260] ss:$16 sps:$4 sm:$0xff]  }
  0x5a   :  { %1517 = vmatmul.mubr.bf16.gmra.mxu1 %v2300_v48  ;;  %1235 = vmatprep.mubr.bf16.mxu0 %v2301_v49  ;;  %v2396_v48 = vld [vmem:[%s3264_s0 + $0x268] ss:$16 sps:$4 sm:$0xff]   ;;  %v2397_v49 = vld [vmem:[%s3264_s0 + $0x284] ss:$16 sps:$4 sm:$0xff]  }
  0x5b   :  { %1524 = vmatprep.mubr.bf16.mxu1 %v2303_v50  ;;  %v2399_v50 = vld [vmem:[%s3264_s0 + $0x28c] ss:$16 sps:$4 sm:$0xff]  }
  0x61   :  { %1236 = vmatmul.mubr.bf16.gmra.mxu0 %v2305_v51  ;;  %v2401_v51 = vld [vmem:[%s3264_s0 + $0x280] ss:$16 sps:$4 sm:$0xff]  }
  0x62   :  { %1525 = vmatmul.mubr.bf16.gmra.mxu1 %v2306_v52  ;;  %1243 = vmatprep.mubr.bf16.mxu0 %v2307_v53  ;;  %v2402_v52 = vld [vmem:[%s3264_s0 + $0x288] ss:$16 sps:$4 sm:$0xff]   ;;  %v2403_v53 = vld [vmem:[%s3264_s0 + $0x2a4] ss:$16 sps:$4 sm:$0xff]  }
  0x63   :  { %1532 = vmatprep.mubr.bf16.mxu1 %v2309_v54  ;;  %v2405_v54 = vld [vmem:[%s3264_s0 + $0x2ac] ss:$16 sps:$4 sm:$0xff]  }
  0x69   :  { %1244 = vmatmul.mubr.bf16.gmra.mxu0 %v2311_v55  ;;  %v2407_v55 = vld [vmem:[%s3264_s0 + $0x2a0] ss:$16 sps:$4 sm:$0xff]  }
  0x6a   :  { %1533 = vmatmul.mubr.bf16.gmra.mxu1 %v2312_v56  ;;  %1251 = vmatprep.mubr.bf16.mxu0 %v2313_v57  ;;  %v2408_v56 = vld [vmem:[%s3264_s0 + $0x2a8] ss:$16 sps:$4 sm:$0xff]   ;;  %v2409_v57 = vld [vmem:[%s3264_s0 + $0x2c4] ss:$16 sps:$4 sm:$0xff]  }
  0x6b   :  { %1540 = vmatprep.mubr.bf16.mxu1 %v2315_v58  ;;  %v2411_v58 = vld [vmem:[%s3264_s0 + $0x2cc] ss:$16 sps:$4 sm:$0xff]  }
  0x71   :  { %1252 = vmatmul.mubr.bf16.gmra.mxu0 %v2317_v59  ;;  %v2413_v59 = vld [vmem:[%s3264_s0 + $0x2c0] ss:$16 sps:$4 sm:$0xff]  }
  0x72   :  { %1541 = vmatmul.mubr.bf16.gmra.mxu1 %v2318_v60  ;;  %1259 = vmatprep.mubr.bf16.mxu0 %v2319_v61  ;;  %v2414_v60 = vld [vmem:[%s3264_s0 + $0x2c8] ss:$16 sps:$4 sm:$0xff]   ;;  %v2415_v61 = vld [vmem:[%s3264_s0 + $0x2e4] ss:$16 sps:$4 sm:$0xff]  }
  0x73   :  { %1548 = vmatprep.mubr.bf16.mxu1 %v2321_v62  ;;  %v2417_v62 = vld [vmem:[%s3264_s0 + $0x2ec] ss:$16 sps:$4 sm:$0xff]  }
  0x79   :  { %1260 = vmatmul.mubr.bf16.gmra.mxu0 %v2323_v63  ;;  %v2419_v63 = vld [vmem:[%s3264_s0 + $0x2e0] ss:$16 sps:$4 sm:$0xff]  }
  0x7a   :  { %1549 = vmatmul.mubr.bf16.gmra.mxu1 %v2324_v0  ;;  %1267 = vmatprep.mubr.bf16.mxu0 %v2325_v1  ;;  %v2420_v0 = vld [vmem:[%s3264_s0 + $0x2e8] ss:$16 sps:$4 sm:$0xff]   ;;  %v2421_v1 = vld [vmem:[%s3264_s0 + $0x304] ss:$16 sps:$4 sm:$0xff]  }
  0x7b   :  { %1556 = vmatprep.mubr.bf16.mxu1 %v2327_v2  ;;  %v2423_v2 = vld [vmem:[%s3264_s0 + $0x30c] ss:$16 sps:$4 sm:$0xff]  }
  0x81   :  { %1268 = vmatmul.mubr.bf16.gmra.mxu0 %v2329_v3  ;;  %v2425_v3 = vld [vmem:[%s3264_s0 + $0x300] ss:$16 sps:$4 sm:$0xff]  }
  0x82   :  { %1557 = vmatmul.mubr.bf16.gmra.mxu1 %v2330_v4  ;;  %1275 = vmatprep.mubr.bf16.mxu0 %v2331_v5  ;;  %v2426_v4 = vld [vmem:[%s3264_s0 + $0x308] ss:$16 sps:$4 sm:$0xff]   ;;  %v2427_v5 = vld [vmem:[%s3264_s0 + $0x324] ss:$16 sps:$4 sm:$0xff]  }
  0x83   :  { %1564 = vmatprep.mubr.bf16.mxu1 %v2333_v6  ;;  %v2429_v6 = vld [vmem:[%s3264_s0 + $0x32c] ss:$16 sps:$4 sm:$0xff]  }
  0x89   :  { %1276 = vmatmul.mubr.bf16.gmra.mxu0 %v2335_v7 }
  0x8a   :  { %1565 = vmatmul.mubr.bf16.gmra.mxu1 %v2336_v8  ;;  %1283 = vmatprep.mubr.bf16.mxu0 %v2337_v9  ;;  %v2927_v9 = vld [vmem:[%s3265_s2] ss:$0 sm:$0xff] }
  0x8b   :  { %1572 = vmatprep.mubr.bf16.mxu1 %v2339_v10 }
  0x91   :  { %1284 = vmatmul.mubr.bf16.gmra.mxu0 %v2341_v11 }
  0x92   :  { %1573 = vmatmul.mubr.bf16.gmra.mxu1 %v2342_v12  ;;  %1291 = vmatprep.mubr.bf16.mxu0 %v2343_v13 }
  0x93   :  { %1580 = vmatprep.mubr.bf16.mxu1 %v2345_v14 }
  0x99   :  { %1292 = vmatmul.mubr.bf16.gmra.mxu0 %v2347_v15  ;;  %v2431_v15 = vld [vmem:[%s3264_s0 + $0x320] ss:$16 sps:$4 sm:$0xff]  }
  0x9a   :  { %1581 = vmatmul.mubr.bf16.gmra.mxu1 %v2348_v16  ;;  %1299 = vmatprep.mubr.bf16.mxu0 %v2349_v17  ;;  %v2432_v17 = vld [vmem:[%s3264_s0 + $0x328] ss:$16 sps:$4 sm:$0xff]  }
  0x9b   :  { %1588 = vmatprep.mubr.bf16.mxu1 %v2351_v18  ;;  %v2433_v18 = vld [vmem:[%s3264_s0 + $0x344] ss:$16 sps:$4 sm:$0xff]  }
  0xa1   :  { %1300 = vmatmul.mubr.bf16.gmra.mxu0 %v2353_v19 }
  0xa2   :  { %1589 = vmatmul.mubr.bf16.gmra.mxu1 %v2354_v20  ;;  %1307 = vmatprep.mubr.bf16.mxu0 %v2355_v21  ;;  %v2435_v21 = vld [vmem:[%s3264_s0 + $0x34c] ss:$16 sps:$4 sm:$0xff]  }
  0xa3   :  { %1596 = vmatprep.mubr.bf16.mxu1 %v2357_v22 }
  0xa9   :  { %1308 = vmatmul.mubr.bf16.gmra.mxu0 %v2359_v23 }
  0xaa   :  { %1597 = vmatmul.mubr.bf16.gmra.mxu1 %v2360_v24  ;;  %1315 = vmatprep.mubr.bf16.mxu0 %v2361_v25 }
  0xab   :  { %1604 = vmatprep.mubr.bf16.mxu1 %v2363_v26 }
  0xb1   :  { %1316 = vmatmul.mubr.bf16.gmra.mxu0 %v2365_v27 }
  0xb2   :  { %1605 = vmatmul.mubr.bf16.gmra.mxu1 %v2366_v28  ;;  %1323 = vmatprep.mubr.bf16.mxu0 %v2367_v29 }
  0xb3   :  { %1612 = vmatprep.mubr.bf16.mxu1 %v2369_v30 }
  0xb9   :  { %1324 = vmatmul.mubr.bf16.gmra.mxu0 %v2371_v31  ;;  %v2437_v31 = vld [vmem:[%s3264_s0 + $0x340] ss:$16 sps:$4 sm:$0xff]  }
  0xba   :  { %1613 = vmatmul.mubr.bf16.gmra.mxu1 %v2372_v32  ;;  %1331 = vmatprep.mubr.bf16.mxu0 %v2373_v33  ;;  %v2438_v33 = vld [vmem:[%s3264_s0 + $0x348] ss:$16 sps:$4 sm:$0xff]  }
  0xbb   :  { %1620 = vmatprep.mubr.bf16.mxu1 %v2375_v34  ;;  %v2439_v34 = vld [vmem:[%s3264_s0 + $0x364] ss:$16 sps:$4 sm:$0xff]  }
  0xc1   :  { %1332 = vmatmul.mubr.bf16.gmra.mxu0 %v2377_v35 }
  0xc2   :  { %1621 = vmatmul.mubr.bf16.gmra.mxu1 %v2378_v36  ;;  %1339 = vmatprep.mubr.bf16.mxu0 %v2379_v37  ;;  %v2441_v37 = vld [vmem:[%s3264_s0 + $0x36c] ss:$16 sps:$4 sm:$0xff]  }
  0xc3   :  { %1628 = vmatprep.mubr.bf16.mxu1 %v2381_v38 }
  0xc9   :  { %1340 = vmatmul.mubr.bf16.gmra.mxu0 %v2383_v39 }
  0xca   :  { %1629 = vmatmul.mubr.bf16.gmra.mxu1 %v2384_v40  ;;  %1347 = vmatprep.mubr.bf16.mxu0 %v2385_v41 }
  0xcb   :  { %1636 = vmatprep.mubr.bf16.mxu1 %v2387_v42 }
  0xd1   :  { %1348 = vmatmul.mubr.bf16.gmra.mxu0 %v2389_v43 }
  0xd2   :  { %1637 = vmatmul.mubr.bf16.gmra.mxu1 %v2390_v44  ;;  %1355 = vmatprep.mubr.bf16.mxu0 %v2391_v45 }
  0xd3   :  { %1644 = vmatprep.mubr.bf16.mxu1 %v2393_v46 }
  0xd9   :  { %1356 = vmatmul.mubr.bf16.gmra.mxu0 %v2395_v47  ;;  %v2443_v47 = vld [vmem:[%s3264_s0 + $0x360] ss:$16 sps:$4 sm:$0xff]  }
  0xda   :  { %1645 = vmatmul.mubr.bf16.gmra.mxu1 %v2396_v48  ;;  %1363 = vmatprep.mubr.bf16.mxu0 %v2397_v49  ;;  %v2444_v49 = vld [vmem:[%s3264_s0 + $0x368] ss:$16 sps:$4 sm:$0xff]  }
  0xdb   :  { %1652 = vmatprep.mubr.bf16.mxu1 %v2399_v50  ;;  %v2447_v50 = vld [vmem:[%s3264_s0 + $0x384] ss:$16 sps:$4 sm:$0xff]  }
  0xe1   :  { %1364 = vmatmul.mubr.bf16.gmra.mxu0 %v2401_v51 }
  0xe2   :  { %1653 = vmatmul.mubr.bf16.gmra.mxu1 %v2402_v52  ;;  %1371 = vmatprep.mubr.bf16.mxu0 %v2403_v53  ;;  %v2450_v53 = vld [vmem:[%s3264_s0 + $0x38c] ss:$16 sps:$4 sm:$0xff]  }
  0xe3   :  { %1660 = vmatprep.mubr.bf16.mxu1 %v2405_v54 }
  0xe9   :  { %1372 = vmatmul.mubr.bf16.gmra.mxu0 %v2407_v55 }
  0xea   :  { %1661 = vmatmul.mubr.bf16.gmra.mxu1 %v2408_v56  ;;  %1379 = vmatprep.mubr.bf16.mxu0 %v2409_v57 }
  0xeb   :  { %1668 = vmatprep.mubr.bf16.mxu1 %v2411_v58 }
  0xf1   :  { %1380 = vmatmul.mubr.bf16.gmra.mxu0 %v2413_v59 }
  0xf2   :  { %1669 = vmatmul.mubr.bf16.gmra.mxu1 %v2414_v60  ;;  %1387 = vmatprep.mubr.bf16.mxu0 %v2415_v61 }
  0xf3   :  { %1676 = vmatprep.mubr.bf16.mxu1 %v2417_v62 }
  0xf9   :  { %1388 = vmatmul.mubr.bf16.gmra.mxu0 %v2419_v63  ;;  %v2445_v63 = vld [vmem:[%s3264_s0 + $0x380] ss:$16 sps:$4 sm:$0xff]  }
  0xfa   :  { %1677 = vmatmul.mubr.bf16.gmra.mxu1 %v2420_v0  ;;  %1395 = vmatprep.mubr.bf16.mxu0 %v2421_v1  ;;  %v2448_v1 = vld [vmem:[%s3264_s0 + $0x388] ss:$16 sps:$4 sm:$0xff]  }
  0xfb   :  { %1684 = vmatprep.mubr.bf16.mxu1 %v2423_v2  ;;  %v2453_v2 = vld [vmem:[%s3264_s0 + $0x3a4] ss:$16 sps:$4 sm:$0xff]  }
 0x101   :  { %v1205_v7 = vpop.f32.mrf.mxu0  ;;  %1396 = vmatmul.mubr.bf16.gmra.mxu0 %v2425_v3 }
 0x102   :  { %v1494_v8 = vpop.f32.mrf.mxu1  ;;  %1685 = vmatmul.mubr.bf16.gmra.mxu1 %v2426_v4  ;;  %1403 = vmatprep.mubr.bf16.mxu0 %v2427_v5  ;;  %v2456_v5 = vld [vmem:[%s3264_s0 + $0x3ac] ss:$16 sps:$4 sm:$0xff]  }
 0x103   :  { %v1495_v10 = vadd.f32 %v1494_v8, %v1205_v7  ;;  %v1207_v11 = vpop.f32.mrf.mxu0  ;;  %1692 = vmatprep.mubr.bf16.mxu1 %v2429_v6 }
 0x104   :  { %v1496_v12 = vpop.f32.mrf.mxu1 }
 0x105   :  { %v1951_v13 = vadd.f32 %v2927_v9, %v1495_v10  ;;  %v1208_v14 = vpop.f32.mrf.mxu0 }
 0x106   :  { %v1497_v16 = vpop.f32.mrf.mxu1 }
 0x107   :  { %2015 = vst [vmem:[%s3266_s3] sm:$0xff] %v1951_v13  ;;  %v1498_v19 = vadd.f32 %v1497_v16, %v1208_v14  ;;  %v1210_v20 = vpop.f32.mrf.mxu0  ;;  %v2451_v16 = vld [vmem:[%s3264_s0 + $0x3a0] ss:$16 sps:$4 sm:$0xff]  }
 0x108   :  { %v1499_v22 = vpop.f32.mrf.mxu1 }
 0x109   :  { %v1952_v23 = vadd.f32 %v2927_v9, %v1498_v19  ;;  %v1213_v24 = vpop.f32.mrf.mxu0  ;;  %1404 = vmatmul.mubr.bf16.gmra.mxu0 %v2431_v15  ;;  %v2459_v19 = vld [vmem:[%s3264_s0 + $0x3c4] ss:$16 sps:$4 sm:$0xff]   ;;  %v2462_v22 = vld [vmem:[%s3264_s0 + $0x3cc] ss:$16 sps:$4 sm:$0xff]  }
 0x10a   :  { %v1502_v25 = vpop.f32.mrf.mxu1  ;;  %1693 = vmatmul.mubr.bf16.gmra.mxu1 %v2432_v17  ;;  %1411 = vmatprep.mubr.bf16.mxu0 %v2433_v18  ;;  %v2454_v18 = vld [vmem:[%s3264_s0 + $0x3a8] ss:$16 sps:$4 sm:$0xff]  }
 0x10b   :  { %2016 = vst [vmem:[%s3266_s3 + $0x8] sm:$0xff] %v1952_v23  ;;  %v1503_v26 = vadd.f32 %v1502_v25, %v1213_v24  ;;  %v1215_v27 = vpop.f32.mrf.mxu0  ;;  %1700 = vmatprep.mubr.bf16.mxu1 %v2435_v21 }
 0x10c   :  { %v1504_v28 = vpop.f32.mrf.mxu1 }
 0x10d   :  { %v1953_v29 = vadd.f32 %v2927_v9, %v1503_v26  ;;  %v1216_v30 = vpop.f32.mrf.mxu0 }
 0x10e   :  { %v1505_v32 = vpop.f32.mrf.mxu1 }
 0x10f   :  { %2017 = vst [vmem:[%s3266_s3 + $0x10] sm:$0xff] %v1953_v29  ;;  %v1506_v35 = vadd.f32 %v1505_v32, %v1216_v30  ;;  %v1218_v36 = vpop.f32.mrf.mxu0  ;;  %v2457_v32 = vld [vmem:[%s3264_s0 + $0x3c0] ss:$16 sps:$4 sm:$0xff]  }
 0x110   :  { %v1507_v38 = vpop.f32.mrf.mxu1 }
 0x111   :  { %v1954_v39 = vadd.f32 %v2927_v9, %v1506_v35  ;;  %v1221_v40 = vpop.f32.mrf.mxu0  ;;  %1412 = vmatmul.mubr.bf16.gmra.mxu0 %v2437_v31  ;;  %v2465_v35 = vld [vmem:[%s3264_s0 + $0x3e4] ss:$16 sps:$4 sm:$0xff]   ;;  %v2468_v38 = vld [vmem:[%s3264_s0 + $0x3ec] ss:$16 sps:$4 sm:$0xff]  }
 0x112   :  { %v1510_v41 = vpop.f32.mrf.mxu1  ;;  %1701 = vmatmul.mubr.bf16.gmra.mxu1 %v2438_v33  ;;  %1419 = vmatprep.mubr.bf16.mxu0 %v2439_v34  ;;  %v2460_v34 = vld [vmem:[%s3264_s0 + $0x3c8] ss:$16 sps:$4 sm:$0xff]  }
 0x113   :  { %2018 = vst [vmem:[%s3266_s3 + $0x18] sm:$0xff] %v1954_v39  ;;  %v1511_v42 = vadd.f32 %v1510_v41, %v1221_v40  ;;  %v1223_v43 = vpop.f32.mrf.mxu0  ;;  %1708 = vmatprep.mubr.bf16.mxu1 %v2441_v37 }
 0x114   :  { %v1512_v44 = vpop.f32.mrf.mxu1 }
 0x115   :  { %v1955_v45 = vadd.f32 %v2927_v9, %v1511_v42  ;;  %v1224_v46 = vpop.f32.mrf.mxu0 }
 0x116   :  { %v1513_v48 = vpop.f32.mrf.mxu1 }
 0x117   :  { %2019 = vst [vmem:[%s3266_s3 + $0x20] sm:$0xff] %v1955_v45  ;;  %v1514_v51 = vadd.f32 %v1513_v48, %v1224_v46  ;;  %v1226_v52 = vpop.f32.mrf.mxu0  ;;  %v2463_v48 = vld [vmem:[%s3264_s0 + $0x3e0] ss:$16 sps:$4 sm:$0xff]  }
 0x118   :  { %v1515_v54 = vpop.f32.mrf.mxu1 }
 0x119   :  { %v1956_v55 = vadd.f32 %v2927_v9, %v1514_v51  ;;  %v1229_v56 = vpop.f32.mrf.mxu0  ;;  %1420 = vmatmul.mubr.bf16.gmra.mxu0 %v2443_v47 }
 0x11a   :  { %v1518_v57 = vpop.f32.mrf.mxu1  ;;  %1709 = vmatmul.mubr.bf16.gmra.mxu1 %v2444_v49  ;;  %1427 = vmatprep.mubr.bf16.mxu0 %v2447_v50  ;;  %v2466_v50 = vld [vmem:[%s3264_s0 + $0x3e8] ss:$16 sps:$4 sm:$0xff]  }
 0x11b   :  { %2020 = vst [vmem:[%s3266_s3 + $0x28] sm:$0xff] %v1956_v55  ;;  %v1519_v58 = vadd.f32 %v1518_v57, %v1229_v56  ;;  %v1231_v59 = vpop.f32.mrf.mxu0  ;;  %1716 = vmatprep.mubr.bf16.mxu1 %v2450_v53 }
 0x11c   :  { %v1520_v60 = vpop.f32.mrf.mxu1 }
 0x11d   :  { %v1957_v61 = vadd.f32 %v2927_v9, %v1519_v58  ;;  %v1232_v62 = vpop.f32.mrf.mxu0 }
 0x11e   :  { %v1521_v0 = vpop.f32.mrf.mxu1 }
 0x11f   :  { %2021 = vst [vmem:[%s3266_s3 + $0x30] sm:$0xff] %v1957_v61  ;;  %v1522_v3 = vadd.f32 %v1521_v0, %v1232_v62  ;;  %v1234_v4 = vpop.f32.mrf.mxu0 }
 0x120   :  { %v1523_v6 = vpop.f32.mrf.mxu1 }
 0x121   :  { %v1958_v7 = vadd.f32 %v2927_v9, %v1522_v3  ;;  %v1237_v8 = vpop.f32.mrf.mxu0  ;;  %1428 = vmatmul.mubr.bf16.gmra.mxu0 %v2445_v63 }
 0x122   :  { %v1526_v10 = vpop.f32.mrf.mxu1  ;;  %1717 = vmatmul.mubr.bf16.gmra.mxu1 %v2448_v1  ;;  %1435 = vmatprep.mubr.bf16.mxu0 %v2453_v2 }
 0x123   :  { %2022 = vst [vmem:[%s3266_s3 + $0x38] sm:$0xff] %v1958_v7  ;;  %v1527_v11 = vadd.f32 %v1526_v10, %v1237_v8  ;;  %v1239_v12 = vpop.f32.mrf.mxu0  ;;  %1724 = vmatprep.mubr.bf16.mxu1 %v2456_v5 }
 0x124   :  { %v1528_v13 = vpop.f32.mrf.mxu1 }
 0x125   :  { %v1959_v14 = vadd.f32 %v2927_v9, %v1527_v11  ;;  %v1240_v15 = vpop.f32.mrf.mxu0 }
 0x126   :  { %v1529_v17 = vpop.f32.mrf.mxu1 }
 0x127   :  { %2023 = vst [vmem:[%s3266_s3 + $0x40] sm:$0xff] %v1959_v14  ;;  %v1530_v20 = vadd.f32 %v1529_v17, %v1240_v15  ;;  %v1242_v21 = vpop.f32.mrf.mxu0 }
 0x128   :  { %v1531_v23 = vpop.f32.mrf.mxu1 }
 0x129   :  { %v1960_v24 = vadd.f32 %v2927_v9, %v1530_v20  ;;  %v1245_v25 = vpop.f32.mrf.mxu0  ;;  %1436 = vmatmul.mubr.bf16.gmra.mxu0 %v2451_v16 }
 0x12a   :  { %v1534_v26 = vpop.f32.mrf.mxu1  ;;  %1725 = vmatmul.mubr.bf16.gmra.mxu1 %v2454_v18  ;;  %1443 = vmatprep.mubr.bf16.mxu0 %v2459_v19 }
 0x12b   :  { %2024 = vst [vmem:[%s3266_s3 + $0x48] sm:$0xff] %v1960_v24  ;;  %v1535_v27 = vadd.f32 %v1534_v26, %v1245_v25  ;;  %v1247_v28 = vpop.f32.mrf.mxu0  ;;  %1732 = vmatprep.mubr.bf16.mxu1 %v2462_v22 }
 0x12c   :  { %v1536_v29 = vpop.f32.mrf.mxu1 }
 0x12d   :  { %v1961_v30 = vadd.f32 %v2927_v9, %v1535_v27  ;;  %v1248_v31 = vpop.f32.mrf.mxu0 }
 0x12e   :  { %v1537_v33 = vpop.f32.mrf.mxu1 }
 0x12f   :  { %2025 = vst [vmem:[%s3266_s3 + $0x50] sm:$0xff] %v1961_v30  ;;  %v1538_v36 = vadd.f32 %v1537_v33, %v1248_v31  ;;  %v1250_v37 = vpop.f32.mrf.mxu0 }
 0x130   :  { %v1539_v39 = vpop.f32.mrf.mxu1 }
 0x131   :  { %v1962_v40 = vadd.f32 %v2927_v9, %v1538_v36  ;;  %v1253_v41 = vpop.f32.mrf.mxu0  ;;  %1444 = vmatmul.mubr.bf16.gmra.mxu0 %v2457_v32 }
 0x132   :  { %v1542_v42 = vpop.f32.mrf.mxu1  ;;  %1733 = vmatmul.mubr.bf16.gmra.mxu1 %v2460_v34  ;;  %1451 = vmatprep.mubr.bf16.mxu0 %v2465_v35 }
 0x133   :  { %2026 = vst [vmem:[%s3266_s3 + $0x58] sm:$0xff] %v1962_v40  ;;  %v1543_v43 = vadd.f32 %v1542_v42, %v1253_v41  ;;  %v1255_v44 = vpop.f32.mrf.mxu0  ;;  %1740 = vmatprep.mubr.bf16.mxu1 %v2468_v38 }
 0x134   :  { %v1544_v45 = vpop.f32.mrf.mxu1 }
 0x135   :  { %v1963_v46 = vadd.f32 %v2927_v9, %v1543_v43  ;;  %v1256_v47 = vpop.f32.mrf.mxu0 }
 0x136   :  { %v1545_v49 = vpop.f32.mrf.mxu1 }
 0x137   :  { %2027 = vst [vmem:[%s3266_s3 + $0x60] sm:$0xff] %v1963_v46  ;;  %v1546_v51 = vadd.f32 %v1545_v49, %v1256_v47  ;;  %v1258_v52 = vpop.f32.mrf.mxu0 }
 0x138   :  { %v1547_v53 = vpop.f32.mrf.mxu1 }
 0x139   :  { %v1964_v54 = vadd.f32 %v2927_v9, %v1546_v51  ;;  %v1261_v55 = vpop.f32.mrf.mxu0  ;;  %1452 = vmatmul.mubr.bf16.gmra.mxu0 %v2463_v48 }
 0x13a   :  { %v1550_v56 = vpop.f32.mrf.mxu1  ;;  %1741 = vmatmul.mubr.bf16.gmra.mxu1 %v2466_v50 }
 0x13b   :  { %2028 = vst [vmem:[%s3266_s3 + $0x68] sm:$0xff] %v1964_v54  ;;  %v1551_v57 = vadd.f32 %v1550_v56, %v1261_v55  ;;  %v1263_v58 = vpop.f32.mrf.mxu0 }
 0x13c   :  { %v1552_v59 = vpop.f32.mrf.mxu1 }
 0x13d   :  { %v1965_v60 = vadd.f32 %v2927_v9, %v1551_v57  ;;  %v1264_v61 = vpop.f32.mrf.mxu0 }
 0x13e   :  { %v1553_v62 = vpop.f32.mrf.mxu1 }
 0x13f   :  { %2029 = vst [vmem:[%s3266_s3 + $0x70] sm:$0xff] %v1965_v60  ;;  %v1554_v63 = vadd.f32 %v1553_v62, %v1264_v61  ;;  %v1266_v0 = vpop.f32.mrf.mxu0 }
 0x140   :  { %v1555_v1 = vpop.f32.mrf.mxu1 }
 0x141   :  { %v1966_v2 = vadd.f32 %v2927_v9, %v1554_v63  ;;  %v1269_v3 = vpop.f32.mrf.mxu0 }
 0x142   :  { %v1558_v4 = vpop.f32.mrf.mxu1 }
 0x143   :  { %2030 = vst [vmem:[%s3266_s3 + $0x78] sm:$0xff] %v1966_v2  ;;  %v1559_v5 = vadd.f32 %v1558_v4, %v1269_v3  ;;  %v1271_v6 = vpop.f32.mrf.mxu0 }
 0x144   :  { %v1560_v7 = vpop.f32.mrf.mxu1 }
 0x145   :  { %v1967_v8 = vadd.f32 %v2927_v9, %v1559_v5  ;;  %v1272_v10 = vpop.f32.mrf.mxu0 }
 0x146   :  { %v1561_v11 = vpop.f32.mrf.mxu1 }
 0x147   :  { %2031 = vst [vmem:[%s3266_s3 + $0x80] sm:$0xff] %v1967_v8  ;;  %v1562_v12 = vadd.f32 %v1561_v11, %v1272_v10  ;;  %v1274_v13 = vpop.f32.mrf.mxu0 }
 0x148   :  { %v1563_v14 = vpop.f32.mrf.mxu1 }
 0x149   :  { %v1968_v15 = vadd.f32 %v2927_v9, %v1562_v12  ;;  %v1277_v16 = vpop.f32.mrf.mxu0 }
 0x14a   :  { %v1566_v17 = vpop.f32.mrf.mxu1 }
 0x14b   :  { %2032 = vst [vmem:[%s3266_s3 + $0x88] sm:$0xff] %v1968_v15  ;;  %v1567_v18 = vadd.f32 %v1566_v17, %v1277_v16  ;;  %v1279_v19 = vpop.f32.mrf.mxu0 }
 0x14c   :  { %v1568_v20 = vpop.f32.mrf.mxu1 }
 0x14d   :  { %v1969_v21 = vadd.f32 %v2927_v9, %v1567_v18  ;;  %v1280_v22 = vpop.f32.mrf.mxu0 }
 0x14e   :  { %v1569_v23 = vpop.f32.mrf.mxu1 }
 0x14f   :  { %2033 = vst [vmem:[%s3266_s3 + $0x90] sm:$0xff] %v1969_v21  ;;  %v1570_v24 = vadd.f32 %v1569_v23, %v1280_v22  ;;  %v1282_v25 = vpop.f32.mrf.mxu0 }
 0x150   :  { %v1571_v26 = vpop.f32.mrf.mxu1 }
 0x151   :  { %v1970_v27 = vadd.f32 %v2927_v9, %v1570_v24  ;;  %v1285_v28 = vpop.f32.mrf.mxu0 }
 0x152   :  { %v1574_v29 = vpop.f32.mrf.mxu1 }
 0x153   :  { %2034 = vst [vmem:[%s3266_s3 + $0x98] sm:$0xff] %v1970_v27  ;;  %v1575_v30 = vadd.f32 %v1574_v29, %v1285_v28  ;;  %v1287_v31 = vpop.f32.mrf.mxu0 }
 0x154   :  { %v1576_v32 = vpop.f32.mrf.mxu1 }
 0x155   :  { %v1971_v33 = vadd.f32 %v2927_v9, %v1575_v30  ;;  %v1288_v34 = vpop.f32.mrf.mxu0 }
 0x156   :  { %v1577_v35 = vpop.f32.mrf.mxu1 }
 0x157   :  { %2035 = vst [vmem:[%s3266_s3 + $0xa0] sm:$0xff] %v1971_v33  ;;  %v1578_v36 = vadd.f32 %v1577_v35, %v1288_v34  ;;  %v1290_v37 = vpop.f32.mrf.mxu0 }
 0x158   :  { %v1579_v38 = vpop.f32.mrf.mxu1 }
 0x159   :  { %v1972_v39 = vadd.f32 %v2927_v9, %v1578_v36  ;;  %v1293_v40 = vpop.f32.mrf.mxu0 }
 0x15a   :  { %v1582_v41 = vpop.f32.mrf.mxu1 }
 0x15b   :  { %2036 = vst [vmem:[%s3266_s3 + $0xa8] sm:$0xff] %v1972_v39  ;;  %v1583_v42 = vadd.f32 %v1582_v41, %v1293_v40  ;;  %v1295_v43 = vpop.f32.mrf.mxu0 }
 0x15c   :  { %v1584_v44 = vpop.f32.mrf.mxu1 }
 0x15d   :  { %v1973_v45 = vadd.f32 %v2927_v9, %v1583_v42  ;;  %v1296_v46 = vpop.f32.mrf.mxu0 }
 0x15e   :  { %v1585_v47 = vpop.f32.mrf.mxu1 }
 0x15f   :  { %2037 = vst [vmem:[%s3266_s3 + $0xb0] sm:$0xff] %v1973_v45  ;;  %v1586_v48 = vadd.f32 %v1585_v47, %v1296_v46  ;;  %v1298_v49 = vpop.f32.mrf.mxu0 }
 0x160   :  { %v1587_v50 = vpop.f32.mrf.mxu1 }
 0x161   :  { %v1974_v51 = vadd.f32 %v2927_v9, %v1586_v48  ;;  %v1301_v52 = vpop.f32.mrf.mxu0 }
 0x162   :  { %v1590_v53 = vpop.f32.mrf.mxu1 }
 0x163   :  { %2038 = vst [vmem:[%s3266_s3 + $0xb8] sm:$0xff] %v1974_v51  ;;  %v1591_v54 = vadd.f32 %v1590_v53, %v1301_v52  ;;  %v1303_v55 = vpop.f32.mrf.mxu0 }
 0x164   :  { %v1592_v56 = vpop.f32.mrf.mxu1 }
 0x165   :  { %v1975_v57 = vadd.f32 %v2927_v9, %v1591_v54  ;;  %v1304_v58 = vpop.f32.mrf.mxu0 }
 0x166   :  { %v1593_v59 = vpop.f32.mrf.mxu1 }
 0x167   :  { %2039 = vst [vmem:[%s3266_s3 + $0xc0] sm:$0xff] %v1975_v57  ;;  %v1594_v60 = vadd.f32 %v1593_v59, %v1304_v58  ;;  %v1306_v61 = vpop.f32.mrf.mxu0 }
 0x168   :  { %v1595_v62 = vpop.f32.mrf.mxu1 }
 0x169   :  { %v1976_v63 = vadd.f32 %v2927_v9, %v1594_v60  ;;  %v1309_v0 = vpop.f32.mrf.mxu0 }
 0x16a   :  { %v1598_v1 = vpop.f32.mrf.mxu1 }
 0x16b   :  { %2040 = vst [vmem:[%s3266_s3 + $0xc8] sm:$0xff] %v1976_v63  ;;  %v1599_v2 = vadd.f32 %v1598_v1, %v1309_v0  ;;  %v1311_v3 = vpop.f32.mrf.mxu0 }
 0x16c   :  { %v1600_v4 = vpop.f32.mrf.mxu1 }
 0x16d   :  { %v1977_v5 = vadd.f32 %v2927_v9, %v1599_v2  ;;  %v1312_v6 = vpop.f32.mrf.mxu0 }
 0x16e   :  { %v1601_v7 = vpop.f32.mrf.mxu1 }
 0x16f   :  { %2041 = vst [vmem:[%s3266_s3 + $0xd0] sm:$0xff] %v1977_v5  ;;  %v1602_v8 = vadd.f32 %v1601_v7, %v1312_v6  ;;  %v1314_v10 = vpop.f32.mrf.mxu0 }
 0x170   :  { %v1603_v11 = vpop.f32.mrf.mxu1 }
 0x171   :  { %v1978_v12 = vadd.f32 %v2927_v9, %v1602_v8  ;;  %v1317_v13 = vpop.f32.mrf.mxu0 }
 0x172   :  { %v1606_v14 = vpop.f32.mrf.mxu1 }
 0x173   :  { %2042 = vst [vmem:[%s3266_s3 + $0xd8] sm:$0xff] %v1978_v12  ;;  %v1607_v15 = vadd.f32 %v1606_v14, %v1317_v13  ;;  %v1319_v16 = vpop.f32.mrf.mxu0 }
 0x174   :  { %v1608_v17 = vpop.f32.mrf.mxu1 }
 0x175   :  { %v1979_v18 = vadd.f32 %v2927_v9, %v1607_v15  ;;  %v1320_v19 = vpop.f32.mrf.mxu0 }
 0x176   :  { %v1609_v20 = vpop.f32.mrf.mxu1 }
 0x177   :  { %2043 = vst [vmem:[%s3266_s3 + $0xe0] sm:$0xff] %v1979_v18  ;;  %v1610_v21 = vadd.f32 %v1609_v20, %v1320_v19  ;;  %v1322_v22 = vpop.f32.mrf.mxu0 }
 0x178   :  { %v1611_v23 = vpop.f32.mrf.mxu1 }
 0x179   :  { %v1980_v24 = vadd.f32 %v2927_v9, %v1610_v21  ;;  %v1325_v25 = vpop.f32.mrf.mxu0 }
 0x17a   :  { %v1614_v26 = vpop.f32.mrf.mxu1 }
 0x17b   :  { %2044 = vst [vmem:[%s3266_s3 + $0xe8] sm:$0xff] %v1980_v24  ;;  %v1615_v27 = vadd.f32 %v1614_v26, %v1325_v25  ;;  %v1327_v28 = vpop.f32.mrf.mxu0 }
 0x17c   :  { %v1616_v29 = vpop.f32.mrf.mxu1 }
 0x17d   :  { %v1981_v30 = vadd.f32 %v2927_v9, %v1615_v27  ;;  %v1328_v31 = vpop.f32.mrf.mxu0 }
 0x17e   :  { %v1617_v32 = vpop.f32.mrf.mxu1 }
 0x17f   :  { %2045 = vst [vmem:[%s3266_s3 + $0xf0] sm:$0xff] %v1981_v30  ;;  %v1618_v33 = vadd.f32 %v1617_v32, %v1328_v31  ;;  %v1330_v34 = vpop.f32.mrf.mxu0 }
 0x180   :  { %v1619_v35 = vpop.f32.mrf.mxu1 }
 0x181   :  { %v1982_v36 = vadd.f32 %v2927_v9, %v1618_v33  ;;  %v1333_v37 = vpop.f32.mrf.mxu0 }
 0x182   :  { %v1622_v38 = vpop.f32.mrf.mxu1 }
 0x183   :  { %2046 = vst [vmem:[%s3266_s3 + $0xf8] sm:$0xff] %v1982_v36  ;;  %v1623_v39 = vadd.f32 %v1622_v38, %v1333_v37  ;;  %v1335_v40 = vpop.f32.mrf.mxu0 }
 0x184   :  { %v1624_v41 = vpop.f32.mrf.mxu1 }
 0x185   :  { %v1983_v42 = vadd.f32 %v2927_v9, %v1623_v39  ;;  %v1336_v43 = vpop.f32.mrf.mxu0 }
 0x186   :  { %v1625_v44 = vpop.f32.mrf.mxu1 }
 0x187   :  { %2047 = vst [vmem:[%s3266_s3 + $0x100] sm:$0xff] %v1983_v42  ;;  %v1626_v45 = vadd.f32 %v1625_v44, %v1336_v43  ;;  %v1338_v46 = vpop.f32.mrf.mxu0 }
 0x188   :  { %v1627_v47 = vpop.f32.mrf.mxu1 }
 0x189   :  { %v1984_v48 = vadd.f32 %v2927_v9, %v1626_v45  ;;  %v1341_v49 = vpop.f32.mrf.mxu0 }
 0x18a   :  { %v1630_v50 = vpop.f32.mrf.mxu1 }
 0x18b   :  { %2048 = vst [vmem:[%s3266_s3 + $0x108] sm:$0xff] %v1984_v48  ;;  %v1631_v51 = vadd.f32 %v1630_v50, %v1341_v49  ;;  %v1343_v52 = vpop.f32.mrf.mxu0 }
 0x18c   :  { %v1632_v53 = vpop.f32.mrf.mxu1 }
 0x18d   :  { %v1985_v54 = vadd.f32 %v2927_v9, %v1631_v51  ;;  %v1344_v55 = vpop.f32.mrf.mxu0 }
 0x18e   :  { %v1633_v56 = vpop.f32.mrf.mxu1 }
 0x18f   :  { %2049 = vst [vmem:[%s3266_s3 + $0x110] sm:$0xff] %v1985_v54  ;;  %v1634_v57 = vadd.f32 %v1633_v56, %v1344_v55  ;;  %v1346_v58 = vpop.f32.mrf.mxu0 }
 0x190   :  { %v1635_v59 = vpop.f32.mrf.mxu1 }
 0x191   :  { %v1986_v60 = vadd.f32 %v2927_v9, %v1634_v57  ;;  %v1349_v61 = vpop.f32.mrf.mxu0 }
 0x192   :  { %v1638_v62 = vpop.f32.mrf.mxu1 }
 0x193   :  { %2050 = vst [vmem:[%s3266_s3 + $0x118] sm:$0xff] %v1986_v60  ;;  %v1639_v63 = vadd.f32 %v1638_v62, %v1349_v61  ;;  %v1351_v0 = vpop.f32.mrf.mxu0 }
 0x194   :  { %v1640_v1 = vpop.f32.mrf.mxu1 }
 0x195   :  { %v1987_v2 = vadd.f32 %v2927_v9, %v1639_v63  ;;  %v1352_v3 = vpop.f32.mrf.mxu0 }
 0x196   :  { %v1641_v4 = vpop.f32.mrf.mxu1 }
 0x197   :  { %2051 = vst [vmem:[%s3266_s3 + $0x120] sm:$0xff] %v1987_v2  ;;  %v1642_v5 = vadd.f32 %v1641_v4, %v1352_v3  ;;  %v1354_v6 = vpop.f32.mrf.mxu0 }
 0x198   :  { %v1643_v7 = vpop.f32.mrf.mxu1 }
 0x199   :  { %v1988_v8 = vadd.f32 %v2927_v9, %v1642_v5  ;;  %v1357_v10 = vpop.f32.mrf.mxu0 }
 0x19a   :  { %v1646_v11 = vpop.f32.mrf.mxu1 }
 0x19b   :  { %2052 = vst [vmem:[%s3266_s3 + $0x128] sm:$0xff] %v1988_v8  ;;  %v1647_v12 = vadd.f32 %v1646_v11, %v1357_v10  ;;  %v1359_v13 = vpop.f32.mrf.mxu0 }
 0x19c   :  { %v1648_v14 = vpop.f32.mrf.mxu1 }
 0x19d   :  { %v1989_v15 = vadd.f32 %v2927_v9, %v1647_v12  ;;  %v1360_v16 = vpop.f32.mrf.mxu0 }
 0x19e   :  { %v1649_v17 = vpop.f32.mrf.mxu1 }
 0x19f   :  { %2053 = vst [vmem:[%s3266_s3 + $0x130] sm:$0xff] %v1989_v15  ;;  %v1650_v18 = vadd.f32 %v1649_v17, %v1360_v16  ;;  %v1362_v19 = vpop.f32.mrf.mxu0 }
 0x1a0   :  { %v1651_v20 = vpop.f32.mrf.mxu1 }
 0x1a1   :  { %v1990_v21 = vadd.f32 %v2927_v9, %v1650_v18  ;;  %v1365_v22 = vpop.f32.mrf.mxu0 }
 0x1a2   :  { %v1654_v23 = vpop.f32.mrf.mxu1 }
 0x1a3   :  { %2054 = vst [vmem:[%s3266_s3 + $0x138] sm:$0xff] %v1990_v21  ;;  %v1655_v24 = vadd.f32 %v1654_v23, %v1365_v22  ;;  %v1367_v25 = vpop.f32.mrf.mxu0 }
 0x1a4   :  { %v1656_v26 = vpop.f32.mrf.mxu1 }
 0x1a5   :  { %v1991_v27 = vadd.f32 %v2927_v9, %v1655_v24  ;;  %v1368_v28 = vpop.f32.mrf.mxu0 }
 0x1a6   :  { %v1657_v29 = vpop.f32.mrf.mxu1 }
 0x1a7   :  { %2055 = vst [vmem:[%s3266_s3 + $0x140] sm:$0xff] %v1991_v27  ;;  %v1658_v30 = vadd.f32 %v1657_v29, %v1368_v28  ;;  %v1370_v31 = vpop.f32.mrf.mxu0 }
 0x1a8   :  { %v1659_v32 = vpop.f32.mrf.mxu1 }
 0x1a9   :  { %v1992_v33 = vadd.f32 %v2927_v9, %v1658_v30  ;;  %v1373_v34 = vpop.f32.mrf.mxu0 }
 0x1aa   :  { %v1662_v35 = vpop.f32.mrf.mxu1 }
 0x1ab   :  { %2056 = vst [vmem:[%s3266_s3 + $0x148] sm:$0xff] %v1992_v33  ;;  %v1663_v36 = vadd.f32 %v1662_v35, %v1373_v34  ;;  %v1375_v37 = vpop.f32.mrf.mxu0 }
 0x1ac   :  { %v1664_v38 = vpop.f32.mrf.mxu1 }
 0x1ad   :  { %v1993_v39 = vadd.f32 %v2927_v9, %v1663_v36  ;;  %v1376_v40 = vpop.f32.mrf.mxu0 }
 0x1ae   :  { %v1665_v41 = vpop.f32.mrf.mxu1 }
 0x1af   :  { %2057 = vst [vmem:[%s3266_s3 + $0x150] sm:$0xff] %v1993_v39  ;;  %v1666_v42 = vadd.f32 %v1665_v41, %v1376_v40  ;;  %v1378_v43 = vpop.f32.mrf.mxu0 }
 0x1b0   :  { %v1667_v44 = vpop.f32.mrf.mxu1 }
 0x1b1   :  { %v1994_v45 = vadd.f32 %v2927_v9, %v1666_v42  ;;  %v1381_v46 = vpop.f32.mrf.mxu0 }
 0x1b2   :  { %v1670_v47 = vpop.f32.mrf.mxu1 }
 0x1b3   :  { %2058 = vst [vmem:[%s3266_s3 + $0x158] sm:$0xff] %v1994_v45  ;;  %v1671_v48 = vadd.f32 %v1670_v47, %v1381_v46  ;;  %v1383_v49 = vpop.f32.mrf.mxu0 }
 0x1b4   :  { %v1672_v50 = vpop.f32.mrf.mxu1 }
 0x1b5   :  { %v1995_v51 = vadd.f32 %v2927_v9, %v1671_v48  ;;  %v1384_v52 = vpop.f32.mrf.mxu0 }
 0x1b6   :  { %v1673_v53 = vpop.f32.mrf.mxu1 }
 0x1b7   :  { %2059 = vst [vmem:[%s3266_s3 + $0x160] sm:$0xff] %v1995_v51  ;;  %v1674_v54 = vadd.f32 %v1673_v53, %v1384_v52  ;;  %v1386_v55 = vpop.f32.mrf.mxu0 }
 0x1b8   :  { %v1675_v56 = vpop.f32.mrf.mxu1 }
 0x1b9   :  { %v1996_v57 = vadd.f32 %v2927_v9, %v1674_v54  ;;  %v1389_v58 = vpop.f32.mrf.mxu0 }
 0x1ba   :  { %v1678_v59 = vpop.f32.mrf.mxu1 }
 0x1bb   :  { %2060 = vst [vmem:[%s3266_s3 + $0x168] sm:$0xff] %v1996_v57  ;;  %v1679_v60 = vadd.f32 %v1678_v59, %v1389_v58  ;;  %v1391_v61 = vpop.f32.mrf.mxu0 }
 0x1bc   :  { %v1680_v62 = vpop.f32.mrf.mxu1 }
 0x1bd   :  { %v1997_v63 = vadd.f32 %v2927_v9, %v1679_v60  ;;  %v1392_v0 = vpop.f32.mrf.mxu0 }
 0x1be   :  { %v1681_v1 = vpop.f32.mrf.mxu1 }
 0x1bf   :  { %2061 = vst [vmem:[%s3266_s3 + $0x170] sm:$0xff] %v1997_v63  ;;  %v1682_v2 = vadd.f32 %v1681_v1, %v1392_v0  ;;  %v1394_v3 = vpop.f32.mrf.mxu0 }
 0x1c0   :  { %v1683_v4 = vpop.f32.mrf.mxu1 }
 0x1c1   :  { %v1998_v5 = vadd.f32 %v2927_v9, %v1682_v2  ;;  %v1397_v6 = vpop.f32.mrf.mxu0 }
 0x1c2   :  { %v1686_v7 = vpop.f32.mrf.mxu1 }
 0x1c3   :  { %2062 = vst [vmem:[%s3266_s3 + $0x178] sm:$0xff] %v1998_v5  ;;  %v1687_v8 = vadd.f32 %v1686_v7, %v1397_v6  ;;  %v1399_v10 = vpop.f32.mrf.mxu0 }
 0x1c4   :  { %v1688_v11 = vpop.f32.mrf.mxu1 }
 0x1c5   :  { %v1999_v12 = vadd.f32 %v2927_v9, %v1687_v8  ;;  %v1400_v13 = vpop.f32.mrf.mxu0 }
 0x1c6   :  { %v1689_v14 = vpop.f32.mrf.mxu1 }
 0x1c7   :  { %2063 = vst [vmem:[%s3266_s3 + $0x180] sm:$0xff] %v1999_v12  ;;  %v1690_v15 = vadd.f32 %v1689_v14, %v1400_v13  ;;  %v1402_v16 = vpop.f32.mrf.mxu0 }
 0x1c8   :  { %v1691_v17 = vpop.f32.mrf.mxu1 }
 0x1c9   :  { %v2000_v18 = vadd.f32 %v2927_v9, %v1690_v15  ;;  %v1405_v19 = vpop.f32.mrf.mxu0 }
 0x1ca   :  { %v1694_v20 = vpop.f32.mrf.mxu1 }
 0x1cb   :  { %2064 = vst [vmem:[%s3266_s3 + $0x188] sm:$0xff] %v2000_v18  ;;  %v1695_v21 = vadd.f32 %v1694_v20, %v1405_v19  ;;  %v1407_v22 = vpop.f32.mrf.mxu0 }
 0x1cc   :  { %v1696_v23 = vpop.f32.mrf.mxu1 }
 0x1cd   :  { %v2001_v24 = vadd.f32 %v2927_v9, %v1695_v21  ;;  %v1408_v25 = vpop.f32.mrf.mxu0 }
 0x1ce   :  { %v1697_v26 = vpop.f32.mrf.mxu1 }
 0x1cf   :  { %2065 = vst [vmem:[%s3266_s3 + $0x190] sm:$0xff] %v2001_v24  ;;  %v1698_v27 = vadd.f32 %v1697_v26, %v1408_v25  ;;  %v1410_v28 = vpop.f32.mrf.mxu0 }
 0x1d0   :  { %v1699_v29 = vpop.f32.mrf.mxu1 }
 0x1d1   :  { %v2002_v30 = vadd.f32 %v2927_v9, %v1698_v27  ;;  %v1413_v31 = vpop.f32.mrf.mxu0 }
 0x1d2   :  { %v1702_v32 = vpop.f32.mrf.mxu1 }
 0x1d3   :  { %2066 = vst [vmem:[%s3266_s3 + $0x198] sm:$0xff] %v2002_v30  ;;  %v1703_v33 = vadd.f32 %v1702_v32, %v1413_v31  ;;  %v1415_v34 = vpop.f32.mrf.mxu0 }
 0x1d4   :  { %v1704_v35 = vpop.f32.mrf.mxu1 }
 0x1d5   :  { %v2003_v36 = vadd.f32 %v2927_v9, %v1703_v33  ;;  %v1416_v37 = vpop.f32.mrf.mxu0 }
 0x1d6   :  { %v1705_v38 = vpop.f32.mrf.mxu1 }
 0x1d7   :  { %2067 = vst [vmem:[%s3266_s3 + $0x1a0] sm:$0xff] %v2003_v36  ;;  %v1706_v39 = vadd.f32 %v1705_v38, %v1416_v37  ;;  %v1418_v40 = vpop.f32.mrf.mxu0 }
 0x1d8   :  { %v1707_v41 = vpop.f32.mrf.mxu1 }
 0x1d9   :  { %v2004_v42 = vadd.f32 %v2927_v9, %v1706_v39  ;;  %v1421_v43 = vpop.f32.mrf.mxu0 }
 0x1da   :  { %v1710_v44 = vpop.f32.mrf.mxu1 }
 0x1db   :  { %2068 = vst [vmem:[%s3266_s3 + $0x1a8] sm:$0xff] %v2004_v42  ;;  %v1711_v45 = vadd.f32 %v1710_v44, %v1421_v43  ;;  %v1423_v46 = vpop.f32.mrf.mxu0 }
 0x1dc   :  { %v1712_v47 = vpop.f32.mrf.mxu1 }
 0x1dd   :  { %v2005_v48 = vadd.f32 %v2927_v9, %v1711_v45  ;;  %v1424_v49 = vpop.f32.mrf.mxu0 }
 0x1de   :  { %v1713_v50 = vpop.f32.mrf.mxu1 }
 0x1df   :  { %2069 = vst [vmem:[%s3266_s3 + $0x1b0] sm:$0xff] %v2005_v48  ;;  %v1714_v51 = vadd.f32 %v1713_v50, %v1424_v49  ;;  %v1426_v52 = vpop.f32.mrf.mxu0 }
 0x1e0   :  { %v1715_v53 = vpop.f32.mrf.mxu1 }
 0x1e1   :  { %v2006_v54 = vadd.f32 %v2927_v9, %v1714_v51  ;;  %v1429_v55 = vpop.f32.mrf.mxu0 }
 0x1e2   :  { %v1718_v56 = vpop.f32.mrf.mxu1 }
 0x1e3   :  { %2070 = vst [vmem:[%s3266_s3 + $0x1b8] sm:$0xff] %v2006_v54  ;;  %v1719_v57 = vadd.f32 %v1718_v56, %v1429_v55  ;;  %v1431_v58 = vpop.f32.mrf.mxu0 }
 0x1e4   :  { %v1720_v59 = vpop.f32.mrf.mxu1 }
 0x1e5   :  { %v2007_v60 = vadd.f32 %v2927_v9, %v1719_v57  ;;  %v1432_v61 = vpop.f32.mrf.mxu0 }
 0x1e6   :  { %v1721_v62 = vpop.f32.mrf.mxu1 }
 0x1e7   :  { %2071 = vst [vmem:[%s3266_s3 + $0x1c0] sm:$0xff] %v2007_v60  ;;  %v1722_v63 = vadd.f32 %v1721_v62, %v1432_v61  ;;  %v1434_v0 = vpop.f32.mrf.mxu0 }
 0x1e8   :  { %v1723_v1 = vpop.f32.mrf.mxu1 }
 0x1e9   :  { %v2008_v2 = vadd.f32 %v2927_v9, %v1722_v63  ;;  %v1437_v3 = vpop.f32.mrf.mxu0 }
 0x1ea   :  { %v1726_v4 = vpop.f32.mrf.mxu1 }
 0x1eb   :  { %2072 = vst [vmem:[%s3266_s3 + $0x1c8] sm:$0xff] %v2008_v2  ;;  %v1727_v5 = vadd.f32 %v1726_v4, %v1437_v3  ;;  %v1439_v6 = vpop.f32.mrf.mxu0 }
 0x1ec   :  { %v1728_v7 = vpop.f32.mrf.mxu1 }
 0x1ed   :  { %v2009_v8 = vadd.f32 %v2927_v9, %v1727_v5  ;;  %v1440_v10 = vpop.f32.mrf.mxu0 }
 0x1ee   :  { %v1729_v11 = vpop.f32.mrf.mxu1 }
 0x1ef   :  { %2073 = vst [vmem:[%s3266_s3 + $0x1d0] sm:$0xff] %v2009_v8  ;;  %v1730_v12 = vadd.f32 %v1729_v11, %v1440_v10  ;;  %v1442_v13 = vpop.f32.mrf.mxu0 }
 0x1f0   :  { %v1731_v14 = vpop.f32.mrf.mxu1 }
 0x1f1   :  { %v2010_v15 = vadd.f32 %v2927_v9, %v1730_v12  ;;  %v1445_v16 = vpop.f32.mrf.mxu0 }
 0x1f2   :  { %v1734_v17 = vpop.f32.mrf.mxu1 }
 0x1f3   :  { %2074 = vst [vmem:[%s3266_s3 + $0x1d8] sm:$0xff] %v2010_v15  ;;  %v1735_v18 = vadd.f32 %v1734_v17, %v1445_v16  ;;  %v1447_v19 = vpop.f32.mrf.mxu0 }
 0x1f4   :  { %v1736_v20 = vpop.f32.mrf.mxu1 }
 0x1f5   :  { %v2011_v21 = vadd.f32 %v2927_v9, %v1735_v18  ;;  %v1448_v22 = vpop.f32.mrf.mxu0 }
 0x1f6   :  { %v1737_v23 = vpop.f32.mrf.mxu1 }
 0x1f7   :  { %2075 = vst [vmem:[%s3266_s3 + $0x1e0] sm:$0xff] %v2011_v21  ;;  %v1738_v24 = vadd.f32 %v1737_v23, %v1448_v22  ;;  %v1450_v25 = vpop.f32.mrf.mxu0 }
 0x1f8   :  { %v1739_v26 = vpop.f32.mrf.mxu1 }
 0x1f9   :  { %v2012_v27 = vadd.f32 %v2927_v9, %v1738_v24  ;;  %v1453_v28 = vpop.f32.mrf.mxu0 }
 0x1fa   :  { %v1742_v29 = vpop.f32.mrf.mxu1 }
 0x1fb   :  { %2076 = vst [vmem:[%s3266_s3 + $0x1e8] sm:$0xff] %v2012_v27  ;;  %v1743_v30 = vadd.f32 %v1742_v29, %v1453_v28  ;;  %v1455_v31 = vpop.f32.mrf.mxu0 }
 0x1fc   :  { %v1744_v32 = vpop.f32.mrf.mxu1 }
 0x1fd   :  { %v2013_v33 = vadd.f32 %v2927_v9, %v1743_v30  ;;  %v1456_v34 = vpop.f32.mrf.mxu0 }
 0x1fe   :  { %v1745_v35 = vpop.f32.mrf.mxu1 }
 0x1ff   :  { %2077 = vst [vmem:[%s3266_s3 + $0x1f0] sm:$0xff] %v2013_v33  ;;  %v1746_v36 = vadd.f32 %v1745_v35, %v1456_v34  ;;  %v1458_v37 = vpop.f32.mrf.mxu0 }
 0x200   :  { %v1747_v38 = vpop.f32.mrf.mxu1 }
 0x201   :  { %v2014_v39 = vadd.f32 %v2927_v9, %v1746_v36 }
 0x203   :  { %2078 = vst [vmem:[%s3266_s3 + $0x1f8] sm:$0xff] %v2014_v39 }

// kernel: gcn_forward.4
= control target key start
LH: loop header
LB: loop body
LE: loop exit
PB: predicated region body
PF: predicated region fallthrough
CT: control target
= control target key end

     0   :  { %v3664_v0 = vmov 0   ;;  %s4599_s1 = inlined_call_operand.vmem [shape: bf16[512,128], index: 1, kind: input, shape index: {}]   ;;  %s4600_s0 = inlined_call_operand.vmem [shape: bf16[512,512], index: 0, kind: input, shape index: {}]   ;;  %s4601_s3 = inlined_call_operand.vmem [shape: bf16[128,128], index: 3, kind: input, shape index: {}]   ;;  %s4602_s2 = inlined_call_operand.vmem [shape: f32[1,128], index: 2, kind: input, shape index: {}]   ;;  %s4603_s4 = inlined_call_operand.vmem [shape: bf16[512,128], index: 4, kind: output, shape index: {}]  }
   0x1   :  { %3399 = vmatprep.subr.bf16.mxu1 %v3664_v0  ;;  %v3432_v1 = vld [vmem:[%s4599_s1 + $0x38] sm:$0xff]   ;;  %1174 = vmatprep.subr.bf16.mxu0 %v3664_v0  ;;  %v3433_v2 = vld [vmem:[%s4599_s1 + $0x30] sm:$0xff]   ;;  %v3434_v3 = vld [vmem:[%s4599_s1 + $0x28] sm:$0xff]  }
   0x2   :  { %3415 = vmatpush1.bf16.msra.mxu1 %v3432_v1  ;;  %1175 = vmatpush1.bf16.msra.mxu0 %v3432_v1  ;;  %v3435_v4 = vld [vmem:[%s4599_s1 + $0x20] sm:$0xff]   ;;  %v3436_v5 = vld [vmem:[%s4599_s1 + $0x18] sm:$0xff]   ;;  %v3437_v7 = vld [vmem:[%s4599_s1 + $0x10] sm:$0xff]  }
   0x3   :  { %3400 = vmatprep.subr.bf16.mxu1 %v3664_v0  ;;  %1176 = vmatprep.subr.bf16.mxu0 %v3664_v0  ;;  %v3450_v6 = vld [vmem:[%s4600_s0 + $0x304] ss:$16 sps:$4 sm:$0xff]   ;;  %v3438_v8 = vld [vmem:[%s4599_s1 + $0x8] sm:$0xff]   ;;  %v3440_v10 = vld [vmem:[%s4599_s1 + $0x78] sm:$0xff]  }
   0x4   :  { %1398 = vmatprep.mubr.bf16.mxu1 %v3450_v6  ;;  %v3439_v9 = vld [vmem:[%s4599_s1] sm:$0xff]   ;;  %v3441_v11 = vld [vmem:[%s4599_s1 + $0x70] sm:$0xff]   ;;  %v3442_v12 = vld [vmem:[%s4599_s1 + $0x68] sm:$0xff]  }
   0x5   :  { %v3443_v13 = vld [vmem:[%s4599_s1 + $0x60] sm:$0xff]   ;;  %v3444_v15 = vld [vmem:[%s4599_s1 + $0x58] sm:$0xff]   ;;  %v3445_v16 = vld [vmem:[%s4599_s1 + $0x50] sm:$0xff]  }
   0x6   :  { %3416 = vmatpush1.bf16.msra.mxu1 %v3433_v2  ;;  %1177 = vmatpush1.bf16.msra.mxu0 %v3433_v2  ;;  %v3490_v14 = vld [vmem:[%s4600_s0 + $0x4] ss:$16 sps:$4 sm:$0xff]   ;;  %v3446_v17 = vld [vmem:[%s4599_s1 + $0x48] sm:$0xff]   ;;  %v3448_v19 = vld [vmem:[%s4600_s0 + $0x300] ss:$16 sps:$4 sm:$0xff]  }
   0x7   :  { %3401 = vmatprep.subr.bf16.mxu1 %v3664_v0  ;;  %1178 = vmatprep.subr.bf16.mxu0 %v3664_v0  ;;  %v3447_v18 = vld [vmem:[%s4599_s1 + $0x40] sm:$0xff]   ;;  %v3451_v20 = vld [vmem:[%s4599_s1 + $0xb8] sm:$0xff]   ;;  %v3452_v24 = vld [vmem:[%s4599_s1 + $0xb0] sm:$0xff]  }
   0x8   :  { %1206 = vmatprep.mubr.bf16.mxu0 %v3490_v14  ;;  %v3488_v21 = vld [vmem:[%s4600_s0] ss:$16 sps:$4 sm:$0xff]   ;;  %v3453_v22 = vld [vmem:[%s4600_s0 + $0x324] ss:$16 sps:$4 sm:$0xff]   ;;  %v3456_v26 = vld [vmem:[%s4599_s1 + $0xa8] sm:$0xff]  }
   0x9   :  { %v3494_v23 = vld [vmem:[%s4600_s0 + $0x24] ss:$16 sps:$4 sm:$0xff]   ;;  %v3455_v25 = vld [vmem:[%s4600_s0 + $0x320] ss:$16 sps:$4 sm:$0xff]   ;;  %v3461_v33 = vld [vmem:[%s4599_s1 + $0x98] sm:$0xff]  }
   0xa   :  { %3417 = vmatpush1.bf16.msra.mxu1 %v3434_v3  ;;  %1179 = vmatpush1.bf16.msra.mxu0 %v3434_v3  ;;  %v3458_v27 = vld [vmem:[%s4600_s0 + $0x344] ss:$16 sps:$4 sm:$0xff]   ;;  %v3498_v28 = vld [vmem:[%s4600_s0 + $0x20] ss:$16 sps:$4 sm:$0xff]   ;;  %v3466_v39 = vld [vmem:[%s4599_s1 + $0x88] sm:$0xff]  }
   0xb   :  { %3402 = vmatprep.subr.bf16.mxu1 %v3664_v0  ;;  %1180 = vmatprep.subr.bf16.mxu0 %v3664_v0  ;;  %v3500_v29 = vld [vmem:[%s4600_s0 + $0x44] ss:$16 sps:$4 sm:$0xff]   ;;  %v3460_v31 = vld [vmem:[%s4600_s0 + $0x340] ss:$16 sps:$4 sm:$0xff]   ;;  %v3471_v45 = vld [vmem:[%s4599_s1 + $0xf8] sm:$0xff]  }
   0xc   :  { %v3457_v30 = vld [vmem:[%s4599_s1 + $0xa0] sm:$0xff]   ;;  %v3462_v36 = vld [vmem:[%s4599_s1 + $0x90] sm:$0xff]   ;;  %v3476_v51 = vld [vmem:[%s4599_s1 + $0xe8] sm:$0xff]  }
   0xd   :  { %v3504_v32 = vld [vmem:[%s4600_s0 + $0x40] ss:$16 sps:$4 sm:$0xff]   ;;  %v3463_v34 = vld [vmem:[%s4600_s0 + $0x364] ss:$16 sps:$4 sm:$0xff]   ;;  %v3481_v57 = vld [vmem:[%s4599_s1 + $0xd8] sm:$0xff]  }
   0xe   :  { %3418 = vmatpush1.bf16.msra.mxu1 %v3435_v4  ;;  %1181 = vmatpush1.bf16.msra.mxu0 %v3435_v4  ;;  %v3506_v35 = vld [vmem:[%s4600_s0 + $0x64] ss:$16 sps:$4 sm:$0xff]   ;;  %v3465_v37 = vld [vmem:[%s4600_s0 + $0x360] ss:$16 sps:$4 sm:$0xff]   ;;  %v3486_v63 = vld [vmem:[%s4599_s1 + $0xc8] sm:$0xff]  }
   0xf   :  { %3403 = vmatprep.subr.bf16.mxu1 %v3664_v0  ;;  %1182 = vmatprep.subr.bf16.mxu0 %v3664_v0  ;;  %v3510_v38 = vld [vmem:[%s4600_s0 + $0x60] ss:$16 sps:$4 sm:$0xff]   ;;  %v3468_v40 = vld [vmem:[%s4600_s0 + $0x384] ss:$16 sps:$4 sm:$0xff]   ;;  %v3493_v1 = vld [vmem:[%s4600_s0 + $0xc] ss:$16 sps:$4 sm:$0xff]  }
  0x10   :  { %v3512_v41 = vld [vmem:[%s4600_s0 + $0x84] ss:$16 sps:$4 sm:$0xff]   ;;  %v3470_v43 = vld [vmem:[%s4600_s0 + $0x380] ss:$16 sps:$4 sm:$0xff]   ;;  %v3491_v4 = vld [vmem:[%s4600_s0 + $0x8] ss:$16 sps:$4 sm:$0xff]  }
  0x11   :  { %v3467_v42 = vld [vmem:[%s4599_s1 + $0x80] sm:$0xff]   ;;  %v3472_v48 = vld [vmem:[%s4599_s1 + $0xf0] sm:$0xff]   ;;  %v3496_v6 = vld [vmem:[%s4600_s0 + $0x2c] ss:$16 sps:$4 sm:$0xff]  }
  0x12   :  { %3419 = vmatpush1.bf16.msra.mxu1 %v3436_v5  ;;  %1183 = vmatpush1.bf16.msra.mxu0 %v3436_v5  ;;  %v3516_v44 = vld [vmem:[%s4600_s0 + $0x80] ss:$16 sps:$4 sm:$0xff]   ;;  %v3473_v46 = vld [vmem:[%s4600_s0 + $0x3a4] ss:$16 sps:$4 sm:$0xff]  }
  0x13   :  { %3404 = vmatprep.subr.bf16.mxu1 %v3664_v0  ;;  %1184 = vmatprep.subr.bf16.mxu0 %v3664_v0  ;;  %v3518_v47 = vld [vmem:[%s4600_s0 + $0xa4] ss:$16 sps:$4 sm:$0xff]   ;;  %v3475_v49 = vld [vmem:[%s4600_s0 + $0x3a0] ss:$16 sps:$4 sm:$0xff]  }
  0x14   :  { %v3522_v50 = vld [vmem:[%s4600_s0 + $0xa0] ss:$16 sps:$4 sm:$0xff]   ;;  %v3478_v52 = vld [vmem:[%s4600_s0 + $0x3c4] ss:$16 sps:$4 sm:$0xff]  }
  0x15   :  { %v3524_v53 = vld [vmem:[%s4600_s0 + $0xc4] ss:$16 sps:$4 sm:$0xff]   ;;  %v3480_v55 = vld [vmem:[%s4600_s0 + $0x3c0] ss:$16 sps:$4 sm:$0xff]  }
  0x16   :  { %3420 = vmatpush1.bf16.msra.mxu1 %v3437_v7  ;;  %1185 = vmatpush1.bf16.msra.mxu0 %v3437_v7  ;;  %v3477_v54 = vld [vmem:[%s4599_s1 + $0xe0] sm:$0xff]   ;;  %v3482_v60 = vld [vmem:[%s4599_s1 + $0xd0] sm:$0xff]  }
  0x17   :  { %3405 = vmatprep.subr.bf16.mxu1 %v3664_v0  ;;  %1186 = vmatprep.subr.bf16.mxu0 %v3664_v0  ;;  %v3528_v56 = vld [vmem:[%s4600_s0 + $0xc0] ss:$16 sps:$4 sm:$0xff]   ;;  %v3483_v58 = vld [vmem:[%s4600_s0 + $0x3e4] ss:$16 sps:$4 sm:$0xff]  }
  0x18   :  { %v3530_v59 = vld [vmem:[%s4600_s0 + $0xe4] ss:$16 sps:$4 sm:$0xff]   ;;  %v3485_v61 = vld [vmem:[%s4600_s0 + $0x3e0] ss:$16 sps:$4 sm:$0xff]  }
  0x19   :  { %v3534_v62 = vld [vmem:[%s4600_s0 + $0xe0] ss:$16 sps:$4 sm:$0xff]   ;;  %v3536_v2 = vld [vmem:[%s4600_s0 + $0x104] ss:$16 sps:$4 sm:$0xff]  }
  0x1a   :  { %3421 = vmatpush1.bf16.msra.mxu1 %v3438_v8  ;;  %1187 = vmatpush1.bf16.msra.mxu0 %v3438_v8  ;;  %v3487_v3 = vld [vmem:[%s4599_s1 + $0xc0] sm:$0xff]  }
  0x1b   :  { %3406 = vmatprep.subr.bf16.mxu1 %v3664_v0  ;;  %1188 = vmatprep.subr.bf16.mxu0 %v3664_v0  ;;  %v3540_v5 = vld [vmem:[%s4600_s0 + $0x100] ss:$16 sps:$4 sm:$0xff]   ;;  %v3542_v7 = vld [vmem:[%s4600_s0 + $0x124] ss:$16 sps:$4 sm:$0xff]  }
  0x1c   :  { %v3546_v8 = vld [vmem:[%s4600_s0 + $0x120] ss:$16 sps:$4 sm:$0xff]   ;;  %v3554_v14 = vld [vmem:[%s4600_s0 + $0x164] ss:$16 sps:$4 sm:$0xff]  }
  0x1e   :  { %3422 = vmatpush1.bf16.msra.mxu1 %v3439_v9  ;;  %1189 = vmatpush1.bf16.msra.mxu0 %v3439_v9  ;;  %v3502_v9 = vld [vmem:[%s4600_s0 + $0x4c] ss:$16 sps:$4 sm:$0xff]  }
  0x1f   :  { %3407 = vmatprep.subr.bf16.mxu1 %v3664_v0  ;;  %1190 = vmatprep.subr.bf16.mxu0 %v3664_v0 }
  0x22   :  { %3423 = vmatpush2.bf16.msra.mxu1 %v3440_v10  ;;  %1191 = vmatpush2.bf16.msra.mxu0 %v3440_v10  ;;  %v3548_v10 = vld [vmem:[%s4600_s0 + $0x144] ss:$16 sps:$4 sm:$0xff]  }
  0x23   :  { %3408 = vmatprep.subr.bf16.mxu1 %v3664_v0  ;;  %1192 = vmatprep.subr.bf16.mxu0 %v3664_v0 }
  0x26   :  { %3424 = vmatpush2.bf16.msra.mxu1 %v3441_v11  ;;  %1193 = vmatpush2.bf16.msra.mxu0 %v3441_v11  ;;  %v3505_v11 = vld [vmem:[%s4600_s0 + $0x48] ss:$16 sps:$4 sm:$0xff]  }
  0x27   :  { %3409 = vmatprep.subr.bf16.mxu1 %v3664_v0  ;;  %1194 = vmatprep.subr.bf16.mxu0 %v3664_v0 }
  0x2a   :  { %3425 = vmatpush2.bf16.msra.mxu1 %v3442_v12  ;;  %1195 = vmatpush2.bf16.msra.mxu0 %v3442_v12  ;;  %v3508_v12 = vld [vmem:[%s4600_s0 + $0x6c] ss:$16 sps:$4 sm:$0xff]  }
  0x2b   :  { %3410 = vmatprep.subr.bf16.mxu1 %v3664_v0  ;;  %1196 = vmatprep.subr.bf16.mxu0 %v3664_v0 }
  0x2e   :  { %3426 = vmatpush2.bf16.msra.mxu1 %v3443_v13  ;;  %1197 = vmatpush2.bf16.msra.mxu0 %v3443_v13  ;;  %v3552_v13 = vld [vmem:[%s4600_s0 + $0x140] ss:$16 sps:$4 sm:$0xff]  }
  0x2f   :  { %3411 = vmatprep.subr.bf16.mxu1 %v3664_v0  ;;  %1198 = vmatprep.subr.bf16.mxu0 %v3664_v0 }
  0x32   :  { %3427 = vmatpush2.bf16.msra.mxu1 %v3444_v15  ;;  %1199 = vmatpush2.bf16.msra.mxu0 %v3444_v15  ;;  %v3596_v15 = vld [vmem:[%s4601_s3 + $0x38] sm:$0xff]  }
  0x33   :  { %3412 = vmatprep.subr.bf16.mxu1 %v3664_v0  ;;  %1200 = vmatprep.subr.bf16.mxu0 %v3664_v0 }
  0x36   :  { %3428 = vmatpush2.bf16.msra.mxu1 %v3445_v16  ;;  %1201 = vmatpush2.bf16.msra.mxu0 %v3445_v16  ;;  %v3511_v16 = vld [vmem:[%s4600_s0 + $0x68] ss:$16 sps:$4 sm:$0xff]  }
  0x37   :  { %3413 = vmatprep.subr.bf16.mxu1 %v3664_v0  ;;  %1202 = vmatprep.subr.bf16.mxu0 %v3664_v0 }
  0x3a   :  { %3429 = vmatpush2.bf16.msra.mxu1 %v3446_v17  ;;  %1203 = vmatpush2.bf16.msra.mxu0 %v3446_v17  ;;  %v3558_v17 = vld [vmem:[%s4600_s0 + $0x160] ss:$16 sps:$4 sm:$0xff]  }
  0x3b   :  { %3414 = vmatprep.subr.bf16.mxu1 %v3664_v0  ;;  %1204 = vmatprep.subr.bf16.mxu0 %v3664_v0 }
  0x3e   :  { %3430 = vmatpush2.bf16.msra.mxu1 %v3447_v18  ;;  %1205 = vmatpush2.bf16.msra.mxu0 %v3447_v18  ;;  %v3514_v18 = vld [vmem:[%s4600_s0 + $0x8c] ss:$16 sps:$4 sm:$0xff]  }
  0x3f   :  { %1463 = vmatprep.subr.bf16.mxu1 %v3664_v0  ;;  %3319 = vmatprep.subr.bf16.mxu0 %v3596_v15 }
  0x41   :  { %1399 = vmatmul.mubr.bf16.vlgmr.msra.gmra.mxu1 %v3448_v19  ;;  %1207 = vmatmul.mubr.bf16.vlgmr.msra.gmra.mxu0 %v3488_v21  ;;  %v3560_v19 = vld [vmem:[%s4600_s0 + $0x184] ss:$16 sps:$4 sm:$0xff]   ;;  %v3564_v21 = vld [vmem:[%s4600_s0 + $0x180] ss:$16 sps:$4 sm:$0xff]  }
  0x42   :  { %1464 = vmatpush1.bf16.msra.mxu1 %v3451_v20  ;;  %1406 = vmatprep.mubr.bf16.mxu1 %v3453_v22  ;;  %v3517_v20 = vld [vmem:[%s4600_s0 + $0x88] ss:$16 sps:$4 sm:$0xff]   ;;  %v3520_v22 = vld [vmem:[%s4600_s0 + $0xac] ss:$16 sps:$4 sm:$0xff]  }
  0x43   :  { %1465 = vmatprep.subr.bf16.mxu1 %v3664_v0  ;;  %1214 = vmatprep.mubr.bf16.mxu0 %v3494_v23  ;;  %v3566_v23 = vld [vmem:[%s4600_s0 + $0x1a4] ss:$16 sps:$4 sm:$0xff]  }
  0x44   :  { %3320 = vmatpush3.bf16.msra.mxu0 %v3596_v15 }
  0x46   :  { %1466 = vmatpush1.bf16.msra.mxu1 %v3452_v24  ;;  %v3523_v24 = vld [vmem:[%s4600_s0 + $0xa8] ss:$16 sps:$4 sm:$0xff]  }
  0x47   :  { %1467 = vmatprep.subr.bf16.mxu1 %v3664_v0 }
  0x49   :  { %1407 = vmatmul.mubr.bf16.gmra.mxu1 %v3455_v25  ;;  %1215 = vmatmul.mubr.bf16.gmra.mxu0 %v3498_v28  ;;  %v3570_v25 = vld [vmem:[%s4600_s0 + $0x1a0] ss:$16 sps:$4 sm:$0xff]   ;;  %v3572_v28 = vld [vmem:[%s4600_s0 + $0x1c4] ss:$16 sps:$4 sm:$0xff]  }
  0x4a   :  { %1468 = vmatpush1.bf16.msra.mxu1 %v3456_v26  ;;  %1414 = vmatprep.mubr.bf16.mxu1 %v3458_v27  ;;  %v3615_v26 = vld [vmem:[%s4601_s3 + $0x30] sm:$0xff]   ;;  %v3526_v27 = vld [vmem:[%s4600_s0 + $0xcc] ss:$16 sps:$4 sm:$0xff]  }
  0x4b   :  { %1469 = vmatprep.subr.bf16.mxu1 %v3664_v0  ;;  %1222 = vmatprep.mubr.bf16.mxu0 %v3500_v29  ;;  %v3529_v29 = vld [vmem:[%s4600_s0 + $0xc8] ss:$16 sps:$4 sm:$0xff]  }
  0x4c   :  { %3321 = vmatprep.subr.bf16.mxu0 %v3615_v26 }
  0x4d   :  { %3322 = vmatpush3.bf16.msra.mxu0 %v3615_v26 }
  0x4e   :  { %1470 = vmatpush1.bf16.msra.mxu1 %v3457_v30  ;;  %v3576_v30 = vld [vmem:[%s4600_s0 + $0x1c0] ss:$16 sps:$4 sm:$0xff]  }
  0x4f   :  { %1471 = vmatprep.subr.bf16.mxu1 %v3664_v0 }
  0x51   :  { %1415 = vmatmul.mubr.bf16.gmra.mxu1 %v3460_v31  ;;  %1223 = vmatmul.mubr.bf16.gmra.mxu0 %v3504_v32  ;;  %v3532_v31 = vld [vmem:[%s4600_s0 + $0xec] ss:$16 sps:$4 sm:$0xff]   ;;  %v3578_v32 = vld [vmem:[%s4600_s0 + $0x1e4] ss:$16 sps:$4 sm:$0xff]  }
  0x52   :  { %1472 = vmatpush1.bf16.msra.mxu1 %v3461_v33  ;;  %1422 = vmatprep.mubr.bf16.mxu1 %v3463_v34  ;;  %v3535_v33 = vld [vmem:[%s4600_s0 + $0xe8] ss:$16 sps:$4 sm:$0xff]   ;;  %v3582_v34 = vld [vmem:[%s4600_s0 + $0x1e0] ss:$16 sps:$4 sm:$0xff]  }
  0x53   :  { %1473 = vmatprep.subr.bf16.mxu1 %v3664_v0  ;;  %1230 = vmatprep.mubr.bf16.mxu0 %v3506_v35  ;;  %v3538_v35 = vld [vmem:[%s4600_s0 + $0x10c] ss:$16 sps:$4 sm:$0xff]  }
  0x56   :  { %1474 = vmatpush1.bf16.msra.mxu1 %v3462_v36  ;;  %v3584_v36 = vld [vmem:[%s4600_s0 + $0x204] ss:$16 sps:$4 sm:$0xff]  }
  0x57   :  { %1475 = vmatprep.subr.bf16.mxu1 %v3664_v0 }
  0x59   :  { %1423 = vmatmul.mubr.bf16.gmra.mxu1 %v3465_v37  ;;  %1231 = vmatmul.mubr.bf16.gmra.mxu0 %v3510_v38  ;;  %v3634_v37 = vld [vmem:[%s4601_s3 + $0x28] sm:$0xff]  }
  0x5a   :  { %1476 = vmatpush1.bf16.msra.mxu1 %v3466_v39  ;;  %1430 = vmatprep.mubr.bf16.mxu1 %v3468_v40  ;;  %v3541_v38 = vld [vmem:[%s4600_s0 + $0x108] ss:$16 sps:$4 sm:$0xff]   ;;  %v3588_v39 = vld [vmem:[%s4600_s0 + $0x200] ss:$16 sps:$4 sm:$0xff]   ;;  %v3544_v40 = vld [vmem:[%s4600_s0 + $0x12c] ss:$16 sps:$4 sm:$0xff]  }
  0x5b   :  { %1477 = vmatprep.subr.bf16.mxu1 %v3664_v0  ;;  %1238 = vmatprep.mubr.bf16.mxu0 %v3512_v41  ;;  %v3590_v41 = vld [vmem:[%s4600_s0 + $0x224] ss:$16 sps:$4 sm:$0xff]  }
  0x5c   :  { %3323 = vmatprep.subr.bf16.mxu0 %v3634_v37 }
  0x5d   :  { %3324 = vmatpush3.bf16.msra.mxu0 %v3634_v37  ;;  %v3608_v37 = vld [vmem:[%s4600_s0 + $0x268] ss:$16 sps:$4 sm:$0xff]  }
  0x5e   :  { %1478 = vmatpush1.bf16.msra.mxu1 %v3467_v42  ;;  %v3638_v42 = vld [vmem:[%s4601_s3 + $0x20] sm:$0xff]  }
  0x5f   :  { %1479 = vmatprep.subr.bf16.mxu1 %v3664_v0  ;;  %3325 = vmatprep.subr.bf16.mxu0 %v3638_v42 }
  0x61   :  { %1431 = vmatmul.mubr.bf16.gmra.mxu1 %v3470_v43  ;;  %1239 = vmatmul.mubr.bf16.gmra.mxu0 %v3516_v44  ;;  %v3639_v43 = vld [vmem:[%s4601_s3 + $0x18] sm:$0xff]  }
  0x62   :  { %1480 = vmatpush2.bf16.msra.mxu1 %v3471_v45  ;;  %1438 = vmatprep.mubr.bf16.mxu1 %v3473_v46  ;;  %v3547_v44 = vld [vmem:[%s4600_s0 + $0x128] ss:$16 sps:$4 sm:$0xff]   ;;  %v3594_v45 = vld [vmem:[%s4600_s0 + $0x220] ss:$16 sps:$4 sm:$0xff]   ;;  %v3550_v46 = vld [vmem:[%s4600_s0 + $0x14c] ss:$16 sps:$4 sm:$0xff]  }
  0x63   :  { %1481 = vmatprep.subr.bf16.mxu1 %v3664_v0  ;;  %1246 = vmatprep.mubr.bf16.mxu0 %v3518_v47  ;;  %v3597_v47 = vld [vmem:[%s4600_s0 + $0x244] ss:$16 sps:$4 sm:$0xff]  }
  0x64   :  { %3326 = vmatpush3.bf16.msra.mxu0 %v3638_v42 }
  0x65   :  { %3327 = vmatprep.subr.bf16.mxu0 %v3639_v43 }
  0x66   :  { %1482 = vmatpush2.bf16.msra.mxu1 %v3472_v48  ;;  %v3643_v48 = vld [vmem:[%s4601_s3 + $0x10] sm:$0xff]  }
  0x67   :  { %1483 = vmatprep.subr.bf16.mxu1 %v3664_v0 }
  0x68   :  { %3328 = vmatpush3.bf16.msra.mxu0 %v3639_v43 }
  0x69   :  { %1439 = vmatmul.mubr.bf16.gmra.mxu1 %v3475_v49  ;;  %1247 = vmatmul.mubr.bf16.gmra.mxu0 %v3522_v50  ;;  %v3644_v49 = vld [vmem:[%s4601_s3 + $0x8] sm:$0xff]  }
  0x6a   :  { %1484 = vmatpush2.bf16.msra.mxu1 %v3476_v51  ;;  %1446 = vmatprep.mubr.bf16.mxu1 %v3478_v52  ;;  %v3553_v50 = vld [vmem:[%s4600_s0 + $0x148] ss:$16 sps:$4 sm:$0xff]   ;;  %v3601_v51 = vld [vmem:[%s4600_s0 + $0x240] ss:$16 sps:$4 sm:$0xff]   ;;  %v3556_v52 = vld [vmem:[%s4600_s0 + $0x16c] ss:$16 sps:$4 sm:$0xff]  }
  0x6b   :  { %1485 = vmatprep.subr.bf16.mxu1 %v3664_v0  ;;  %1254 = vmatprep.mubr.bf16.mxu0 %v3524_v53  ;;  %v3603_v53 = vld [vmem:[%s4600_s0 + $0x264] ss:$16 sps:$4 sm:$0xff]  }
  0x6c   :  { %3329 = vmatprep.subr.bf16.mxu0 %v3643_v48 }
  0x6d   :  { %3330 = vmatpush3.bf16.msra.mxu0 %v3643_v48 }
  0x6e   :  { %1486 = vmatpush2.bf16.msra.mxu1 %v3477_v54  ;;  %3331 = vmatprep.subr.bf16.mxu0 %v3644_v49  ;;  %v3648_v54 = vld [vmem:[%s4601_s3] sm:$0xff]  }
  0x6f   :  { %1487 = vmatprep.subr.bf16.mxu1 %v3664_v0 }
  0x71   :  { %1447 = vmatmul.mubr.bf16.gmra.mxu1 %v3480_v55  ;;  %1255 = vmatmul.mubr.bf16.gmra.mxu0 %v3528_v56  ;;  %v3559_v55 = vld [vmem:[%s4600_s0 + $0x168] ss:$16 sps:$4 sm:$0xff]   ;;  %v3607_v56 = vld [vmem:[%s4600_s0 + $0x260] ss:$16 sps:$4 sm:$0xff]  }
  0x72   :  { %1488 = vmatpush2.bf16.msra.mxu1 %v3481_v57  ;;  %1454 = vmatprep.mubr.bf16.mxu1 %v3483_v58  ;;  %v3562_v57 = vld [vmem:[%s4600_s0 + $0x18c] ss:$16 sps:$4 sm:$0xff]   ;;  %v3609_v58 = vld [vmem:[%s4600_s0 + $0x284] ss:$16 sps:$4 sm:$0xff]  }
  0x73   :  { %1489 = vmatprep.subr.bf16.mxu1 %v3664_v0  ;;  %1262 = vmatprep.mubr.bf16.mxu0 %v3530_v59  ;;  %v3565_v59 = vld [vmem:[%s4600_s0 + $0x188] ss:$16 sps:$4 sm:$0xff]  }
  0x74   :  { %3332 = vmatpush3.bf16.msra.mxu0 %v3644_v49  ;;  %v3620_v49 = vld [vmem:[%s4600_s0 + $0x2ac] ss:$16 sps:$4 sm:$0xff]  }
  0x75   :  { %3333 = vmatprep.subr.bf16.mxu0 %v3648_v54 }
  0x76   :  { %1490 = vmatpush2.bf16.msra.mxu1 %v3482_v60  ;;  %v3614_v60 = vld [vmem:[%s4600_s0 + $0x280] ss:$16 sps:$4 sm:$0xff]  }
  0x77   :  { %1491 = vmatprep.subr.bf16.mxu1 %v3664_v0 }
  0x78   :  { %3334 = vmatpush3.bf16.msra.mxu0 %v3648_v54 }
  0x79   :  { %1455 = vmatmul.mubr.bf16.gmra.mxu1 %v3485_v61  ;;  %1263 = vmatmul.mubr.bf16.gmra.mxu0 %v3534_v62  ;;  %v3568_v61 = vld [vmem:[%s4600_s0 + $0x1ac] ss:$16 sps:$4 sm:$0xff]   ;;  %v3616_v62 = vld [vmem:[%s4600_s0 + $0x2a4] ss:$16 sps:$4 sm:$0xff]  }
  0x7a   :  { %1492 = vmatpush2.bf16.msra.mxu1 %v3486_v63  ;;  %1495 = vmatprep.mubr.bf16.mxu1 %v3493_v1  ;;  %v3571_v63 = vld [vmem:[%s4600_s0 + $0x1a8] ss:$16 sps:$4 sm:$0xff]   ;;  %v3621_v1 = vld [vmem:[%s4600_s0 + $0x2a0] ss:$16 sps:$4 sm:$0xff]  }
  0x7b   :  { %1493 = vmatprep.subr.bf16.mxu1 %v3664_v0  ;;  %1270 = vmatprep.mubr.bf16.mxu0 %v3536_v2  ;;  %v3499_v0 = vld [vmem:[%s4600_s0 + $0x28] ss:$16 sps:$4 sm:$0xff]   ;;  %v3574_v2 = vld [vmem:[%s4600_s0 + $0x1cc] ss:$16 sps:$4 sm:$0xff]  }
  0x7e   :  { %1494 = vmatpush2.bf16.msra.mxu1 %v3487_v3  ;;  %v3622_v3 = vld [vmem:[%s4600_s0 + $0x2c4] ss:$16 sps:$4 sm:$0xff]  }
  0x81   :  { %1496 = vmatmul.mubr.bf16.vlgmr.msra.gmra.mxu1 %v3491_v4  ;;  %1271 = vmatmul.mubr.bf16.gmra.mxu0 %v3540_v5  ;;  %v3577_v4 = vld [vmem:[%s4600_s0 + $0x1c8] ss:$16 sps:$4 sm:$0xff]   ;;  %v3627_v5 = vld [vmem:[%s4600_s0 + $0x2c0] ss:$16 sps:$4 sm:$0xff]  }
  0x82   :  { %1503 = vmatprep.mubr.bf16.mxu1 %v3496_v6  ;;  %1278 = vmatprep.mubr.bf16.mxu0 %v3542_v7  ;;  %v3580_v6 = vld [vmem:[%s4600_s0 + $0x1ec] ss:$16 sps:$4 sm:$0xff]   ;;  %v3628_v7 = vld [vmem:[%s4600_s0 + $0x2e4] ss:$16 sps:$4 sm:$0xff]  }
  0x89   :  { %1504 = vmatmul.mubr.bf16.gmra.mxu1 %v3499_v0  ;;  %1279 = vmatmul.mubr.bf16.gmra.mxu0 %v3546_v8  ;;  %v3583_v0 = vld [vmem:[%s4600_s0 + $0x1e8] ss:$16 sps:$4 sm:$0xff]   ;;  %v3633_v8 = vld [vmem:[%s4600_s0 + $0x2e0] ss:$16 sps:$4 sm:$0xff]  }
  0x8a   :  { %1511 = vmatprep.mubr.bf16.mxu1 %v3502_v9  ;;  %1286 = vmatprep.mubr.bf16.mxu0 %v3548_v10  ;;  %v3586_v9 = vld [vmem:[%s4600_s0 + $0x20c] ss:$16 sps:$4 sm:$0xff]   ;;  %v3589_v10 = vld [vmem:[%s4600_s0 + $0x208] ss:$16 sps:$4 sm:$0xff]  }
  0x91   :  { %1512 = vmatmul.mubr.bf16.gmra.mxu1 %v3505_v11  ;;  %1287 = vmatmul.mubr.bf16.gmra.mxu0 %v3552_v13  ;;  %v3592_v11 = vld [vmem:[%s4600_s0 + $0x22c] ss:$16 sps:$4 sm:$0xff]  }
  0x92   :  { %1519 = vmatprep.mubr.bf16.mxu1 %v3508_v12  ;;  %1294 = vmatprep.mubr.bf16.mxu0 %v3554_v14 }
  0x99   :  { %1520 = vmatmul.mubr.bf16.gmra.mxu1 %v3511_v16  ;;  %1295 = vmatmul.mubr.bf16.gmra.mxu0 %v3558_v17  ;;  %v3595_v17 = vld [vmem:[%s4600_s0 + $0x228] ss:$16 sps:$4 sm:$0xff]  }
  0x9a   :  { %1527 = vmatprep.mubr.bf16.mxu1 %v3514_v18  ;;  %1302 = vmatprep.mubr.bf16.mxu0 %v3560_v19  ;;  %v3599_v19 = vld [vmem:[%s4600_s0 + $0x24c] ss:$16 sps:$4 sm:$0xff]  }
  0xa1   :  { %1528 = vmatmul.mubr.bf16.gmra.mxu1 %v3517_v20  ;;  %1303 = vmatmul.mubr.bf16.gmra.mxu0 %v3564_v21 }
  0xa2   :  { %1535 = vmatprep.mubr.bf16.mxu1 %v3520_v22  ;;  %1310 = vmatprep.mubr.bf16.mxu0 %v3566_v23 }
  0xa9   :  { %1536 = vmatmul.mubr.bf16.gmra.mxu1 %v3523_v24  ;;  %1311 = vmatmul.mubr.bf16.gmra.mxu0 %v3570_v25 }
  0xaa   :  { %1543 = vmatprep.mubr.bf16.mxu1 %v3526_v27  ;;  %1318 = vmatprep.mubr.bf16.mxu0 %v3572_v28  ;;  %v3602_v27 = vld [vmem:[%s4600_s0 + $0x248] ss:$16 sps:$4 sm:$0xff]  }
  0xb1   :  { %1544 = vmatmul.mubr.bf16.gmra.mxu1 %v3529_v29  ;;  %1319 = vmatmul.mubr.bf16.gmra.mxu0 %v3576_v30  ;;  %v3605_v29 = vld [vmem:[%s4600_s0 + $0x26c] ss:$16 sps:$4 sm:$0xff]  }
  0xb2   :  { %1551 = vmatprep.mubr.bf16.mxu1 %v3532_v31  ;;  %1326 = vmatprep.mubr.bf16.mxu0 %v3578_v32 }
  0xb9   :  { %1552 = vmatmul.mubr.bf16.gmra.mxu1 %v3535_v33  ;;  %1327 = vmatmul.mubr.bf16.gmra.mxu0 %v3582_v34 }
  0xba   :  { %1559 = vmatprep.mubr.bf16.mxu1 %v3538_v35  ;;  %1334 = vmatprep.mubr.bf16.mxu0 %v3584_v36 }
  0xc1   :  { %1560 = vmatmul.mubr.bf16.gmra.mxu1 %v3541_v38  ;;  %1335 = vmatmul.mubr.bf16.gmra.mxu0 %v3588_v39  ;;  %v3613_v39 = vld [vmem:[%s4600_s0 + $0x28c] ss:$16 sps:$4 sm:$0xff]  }
  0xc2   :  { %1567 = vmatprep.mubr.bf16.mxu1 %v3544_v40  ;;  %1342 = vmatprep.mubr.bf16.mxu0 %v3590_v41 }
  0xc9   :  { %1568 = vmatmul.mubr.bf16.gmra.mxu1 %v3547_v44  ;;  %1343 = vmatmul.mubr.bf16.gmra.mxu0 %v3594_v45 }
  0xca   :  { %1575 = vmatprep.mubr.bf16.mxu1 %v3550_v46  ;;  %1350 = vmatprep.mubr.bf16.mxu0 %v3597_v47  ;;  %v3611_v47 = vld [vmem:[%s4600_s0 + $0x288] ss:$16 sps:$4 sm:$0xff]  }
  0xd1   :  { %1576 = vmatmul.mubr.bf16.gmra.mxu1 %v3553_v50  ;;  %1351 = vmatmul.mubr.bf16.gmra.mxu0 %v3601_v51 }
  0xd2   :  { %1583 = vmatprep.mubr.bf16.mxu1 %v3556_v52  ;;  %1358 = vmatprep.mubr.bf16.mxu0 %v3603_v53 }
  0xd9   :  { %1584 = vmatmul.mubr.bf16.gmra.mxu1 %v3559_v55  ;;  %1359 = vmatmul.mubr.bf16.gmra.mxu0 %v3607_v56 }
  0xda   :  { %1591 = vmatprep.mubr.bf16.mxu1 %v3562_v57  ;;  %1366 = vmatprep.mubr.bf16.mxu0 %v3609_v58  ;;  %v3618_v57 = vld [vmem:[%s4600_s0 + $0x2a8] ss:$16 sps:$4 sm:$0xff]  }
  0xe1   :  { %1592 = vmatmul.mubr.bf16.gmra.mxu1 %v3565_v59  ;;  %1367 = vmatmul.mubr.bf16.gmra.mxu0 %v3614_v60  ;;  %v3626_v59 = vld [vmem:[%s4600_s0 + $0x2cc] ss:$16 sps:$4 sm:$0xff]  }
  0xe2   :  { %1599 = vmatprep.mubr.bf16.mxu1 %v3568_v61  ;;  %1374 = vmatprep.mubr.bf16.mxu0 %v3616_v62 }
  0xe9   :  { %1600 = vmatmul.mubr.bf16.gmra.mxu1 %v3571_v63  ;;  %1375 = vmatmul.mubr.bf16.gmra.mxu0 %v3621_v1 }
  0xea   :  { %1607 = vmatprep.mubr.bf16.mxu1 %v3574_v2  ;;  %1382 = vmatprep.mubr.bf16.mxu0 %v3622_v3 }
  0xf1   :  { %1608 = vmatmul.mubr.bf16.gmra.mxu1 %v3577_v4  ;;  %1383 = vmatmul.mubr.bf16.gmra.mxu0 %v3627_v5  ;;  %v3624_v4 = vld [vmem:[%s4600_s0 + $0x2c8] ss:$16 sps:$4 sm:$0xff]  }
  0xf2   :  { %1615 = vmatprep.mubr.bf16.mxu1 %v3580_v6  ;;  %1390 = vmatprep.mubr.bf16.mxu0 %v3628_v7  ;;  %v3632_v6 = vld [vmem:[%s4600_s0 + $0x2ec] ss:$16 sps:$4 sm:$0xff]  }
  0xf9   :  { %1616 = vmatmul.mubr.bf16.gmra.mxu1 %v3583_v0  ;;  %1391 = vmatmul.mubr.bf16.gmra.mxu0 %v3633_v8 }
  0xfa   :  { %1623 = vmatprep.mubr.bf16.mxu1 %v3586_v9 }
 0x101   :  { %v4155_v12 = vpop.f32.mrf.mxu1  ;;  %1624 = vmatmul.mubr.bf16.gmra.mxu1 %v3589_v10  ;;  %v4157_v13 = vpop.f32.mrf.mxu0 }
 0x102   :  { %1631 = vmatprep.mubr.bf16.mxu1 %v3592_v11 }
 0x103   :  { %v1402_v14 = vpop.f32.mrf.mxu1  ;;  %v1210_v15 = vpop.f32.mrf.mxu0 }
 0x104   :  { %v3630_v15 = vld [vmem:[%s4600_s0 + $0x2e8] ss:$16 sps:$4 sm:$0xff]  }
 0x105   :  { %v4159_v16 = vpop.f32.mrf.mxu1  ;;  %v4164_v18 = vpop.f32.mrf.mxu0 }
 0x107   :  { %v1405_v20 = vpop.f32.mrf.mxu1  ;;  %v1213_v21 = vpop.f32.mrf.mxu0 }
 0x109   :  { %v4169_v22 = vpop.f32.mrf.mxu1  ;;  %1632 = vmatmul.mubr.bf16.gmra.mxu1 %v3595_v17  ;;  %v4171_v23 = vpop.f32.mrf.mxu0 }
 0x10a   :  { %1639 = vmatprep.mubr.bf16.mxu1 %v3599_v19  ;;  %v3637_v19 = vld [vmem:[%s4600_s0 + $0x30c] ss:$16 sps:$4 sm:$0xff]  }
 0x10b   :  { %v1410_v24 = vpop.f32.mrf.mxu1  ;;  %v1218_v25 = vpop.f32.mrf.mxu0 }
 0x10d   :  { %v4173_v26 = vpop.f32.mrf.mxu1  ;;  %v4178_v28 = vpop.f32.mrf.mxu0 }
 0x10f   :  { %v1413_v30 = vpop.f32.mrf.mxu1  ;;  %v1221_v31 = vpop.f32.mrf.mxu0 }
 0x110   :  { %v3635_v31 = vld [vmem:[%s4600_s0 + $0x308] ss:$16 sps:$4 sm:$0xff]  }
 0x111   :  { %v4183_v32 = vpop.f32.mrf.mxu1  ;;  %1640 = vmatmul.mubr.bf16.gmra.mxu1 %v3602_v27  ;;  %v4185_v33 = vpop.f32.mrf.mxu0 }
 0x112   :  { %1647 = vmatprep.mubr.bf16.mxu1 %v3605_v29 }
 0x113   :  { %v1418_v34 = vpop.f32.mrf.mxu1  ;;  %v1226_v35 = vpop.f32.mrf.mxu0 }
 0x114   :  { %v3642_v35 = vld [vmem:[%s4600_s0 + $0x32c] ss:$16 sps:$4 sm:$0xff]  }
 0x115   :  { %v4187_v36 = vpop.f32.mrf.mxu1  ;;  %v4192_v38 = vpop.f32.mrf.mxu0 }
 0x117   :  { %v1421_v40 = vpop.f32.mrf.mxu1  ;;  %v1229_v41 = vpop.f32.mrf.mxu0 }
 0x119   :  { %v4197_v42 = vpop.f32.mrf.mxu1  ;;  %1648 = vmatmul.mubr.bf16.gmra.mxu1 %v3608_v37  ;;  %v4199_v43 = vpop.f32.mrf.mxu0 }
 0x11a   :  { %1655 = vmatprep.mubr.bf16.mxu1 %v3613_v39 }
 0x11b   :  { %v1426_v44 = vpop.f32.mrf.mxu1  ;;  %v1234_v45 = vpop.f32.mrf.mxu0 }
 0x11c   :  { %v4273_v45 = vld [vmem:[%s4602_s2] ss:$0 sm:$0xff] }
 0x11d   :  { %v4201_v46 = vpop.f32.mrf.mxu1  ;;  %v4206_v48 = vpop.f32.mrf.mxu0 }
 0x11f   :  { %v1429_v50 = vpop.f32.mrf.mxu1  ;;  %v1237_v51 = vpop.f32.mrf.mxu0 }
 0x120   :  { %v3640_v51 = vld [vmem:[%s4600_s0 + $0x328] ss:$16 sps:$4 sm:$0xff]  }
 0x121   :  { %v4211_v52 = vpop.f32.mrf.mxu1  ;;  %1656 = vmatmul.mubr.bf16.gmra.mxu1 %v3611_v47  ;;  %v4213_v53 = vpop.f32.mrf.mxu0 }
 0x122   :  { %1663 = vmatprep.mubr.bf16.mxu1 %v3620_v49 }
 0x123   :  { %v1434_v54 = vpop.f32.mrf.mxu1  ;;  %v1242_v55 = vpop.f32.mrf.mxu0 }
 0x125   :  { %v4215_v56 = vpop.f32.mrf.mxu1  ;;  %v4220_v58 = vpop.f32.mrf.mxu0 }
 0x127   :  { %v1437_v60 = vpop.f32.mrf.mxu1  ;;  %v1245_v61 = vpop.f32.mrf.mxu0 }
 0x129   :  { %v4225_v62 = vpop.f32.mrf.mxu1  ;;  %1664 = vmatmul.mubr.bf16.gmra.mxu1 %v3618_v57  ;;  %v4227_v63 = vpop.f32.mrf.mxu0 }
 0x12a   :  { %1671 = vmatprep.mubr.bf16.mxu1 %v3626_v59 }
 0x12b   :  { %v1442_v1 = vpop.f32.mrf.mxu1  ;;  %v1250_v2 = vpop.f32.mrf.mxu0 }
 0x12d   :  { %v4229_v3 = vpop.f32.mrf.mxu1  ;;  %v4234_v5 = vpop.f32.mrf.mxu0 }
 0x12f   :  { %v1445_v7 = vpop.f32.mrf.mxu1  ;;  %v1253_v0 = vpop.f32.mrf.mxu0 }
 0x131   :  { %v4239_v8 = vpop.f32.mrf.mxu1  ;;  %1672 = vmatmul.mubr.bf16.gmra.mxu1 %v3624_v4  ;;  %v4241_v9 = vpop.f32.mrf.mxu0 }
 0x132   :  { %1679 = vmatprep.mubr.bf16.mxu1 %v3632_v6 }
 0x133   :  { %v1450_v10 = vpop.f32.mrf.mxu1  ;;  %v1258_v11 = vpop.f32.mrf.mxu0 }
 0x135   :  { %v4243_v14 = vpop.f32.mrf.mxu1  ;;  %v4248_v17 = vpop.f32.mrf.mxu0 }
 0x137   :  { %v1453_v20 = vpop.f32.mrf.mxu1  ;;  %v1261_v21 = vpop.f32.mrf.mxu0 }
 0x139   :  { %v4253_v24 = vpop.f32.mrf.mxu1  ;;  %1680 = vmatmul.mubr.bf16.gmra.mxu1 %v3630_v15  ;;  %v4255_v25 = vpop.f32.mrf.mxu0  ;;  %v3645_v15 = vld [vmem:[%s4600_s0 + $0x348] ss:$16 sps:$4 sm:$0xff]  }
 0x13a   :  { %1687 = vmatprep.mubr.bf16.mxu1 %v3637_v19 }
 0x13b   :  { %v1458_v27 = vpop.f32.mrf.mxu1  ;;  %v1266_v29 = vpop.f32.mrf.mxu0 }
 0x13d   :  { %v4257_v30 = vpop.f32.mrf.mxu1  ;;  %v4262_v34 = vpop.f32.mrf.mxu0 }
 0x13f   :  { %v1461_v37 = vpop.f32.mrf.mxu1  ;;  %v1269_v39 = vpop.f32.mrf.mxu0 }
 0x141   :  { %v1497_v40 = vpop.f32.mrf.mxu1  ;;  %1688 = vmatmul.mubr.bf16.gmra.mxu1 %v3635_v31  ;;  %v4267_v41 = vpop.f32.mrf.mxu0 }
 0x142   :  { %v1498_v44 = vadd.f32 %v1497_v40, %v4157_v13  ;;  %1695 = vmatprep.mubr.bf16.mxu1 %v3642_v35  ;;  %v3647_v13 = vld [vmem:[%s4600_s0 + $0x34c] ss:$16 sps:$4 sm:$0xff]  }
 0x143   :  { %v1499_v47 = vpop.f32.mrf.mxu1  ;;  %v1274_v49 = vpop.f32.mrf.mxu0 }
 0x144   :  { %v1954_v55 = vadd.f32 %v4273_v45, %v1498_v44 }
 0x145   :  { %v1500_v50 = vpop.f32.mrf.mxu1  ;;  %v4278_v54 = vpop.f32.mrf.mxu0 }
 0x146   :  { %v1501_v57 = vadd.f32 %v1500_v50, %v4164_v18  ;;  %v2018_v4 = vmax.f32 %v1954_v55, 0.0 }
 0x147   :  { %v1502_v59 = vpop.f32.mrf.mxu1  ;;  %v1277_v60 = vpop.f32.mrf.mxu0 }
 0x148   :  { %v1955_v61 = vadd.f32 %v4273_v45, %v1501_v57 }
 0x149   :  { %v1505_v1 = vpop.f32.mrf.mxu1  ;;  %1696 = vmatmul.mubr.bf16.gmra.mxu1 %v3640_v51  ;;  %v4286_v2 = vpop.f32.mrf.mxu0  ;;  %v3649_v51 = vld [vmem:[%s4600_s0 + $0x368] ss:$16 sps:$4 sm:$0xff]  }
 0x14a   :  { %v2019_v6 = vmax.f32 %v1955_v61, 0.0  ;;  %v1506_v7 = vadd.f32 %v1505_v1, %v4171_v23  ;;  %1703 = vmatprep.mubr.bf16.mxu1 %v3647_v13  ;;  %v3651_v23 = vld [vmem:[%s4600_s0 + $0x36c] ss:$16 sps:$4 sm:$0xff]  }
 0x14b   :  { %v1507_v0 = vpop.f32.mrf.mxu1  ;;  %v1282_v10 = vpop.f32.mrf.mxu0 }
 0x14c   :  { %v2082_v18 = vpack.c.bf16 %v2019_v6, %v2018_v4  ;;  %v1956_v20 = vadd.f32 %v4273_v45, %v1506_v7 }
 0x14d   :  { %v1508_v11 = vpop.f32.mrf.mxu1  ;;  %v4292_v19 = vpop.f32.mrf.mxu0 }
 0x14e   :  { %v1509_v21 = vadd.f32 %v1508_v11, %v4178_v28  ;;  %3335 = vmatprep.mubr.bf16.mxu0 %v2082_v18  ;;  %v2020_v39 = vmax.f32 %v1956_v20, 0.0 }
 0x14f   :  { %v1510_v27 = vpop.f32.mrf.mxu1  ;;  %v1285_v29 = vpop.f32.mrf.mxu0 }
 0x150   :  { %v1957_v31 = vadd.f32 %v4273_v45, %v1509_v21 }
 0x151   :  { %v1513_v35 = vpop.f32.mrf.mxu1  ;;  %1704 = vmatmul.mubr.bf16.gmra.mxu1 %v3645_v15  ;;  %v4300_v37 = vpop.f32.mrf.mxu0  ;;  %v3652_v15 = vld [vmem:[%s4600_s0 + $0x388] ss:$16 sps:$4 sm:$0xff]  }
 0x152   :  { %v2021_v40 = vmax.f32 %v1957_v31, 0.0  ;;  %v1514_v44 = vadd.f32 %v1513_v35, %v4185_v33  ;;  %1711 = vmatprep.mubr.bf16.mxu1 %v3651_v23  ;;  %v3654_v33 = vld [vmem:[%s4600_s0 + $0x38c] ss:$16 sps:$4 sm:$0xff]  }
 0x153   :  { %v1515_v47 = vpop.f32.mrf.mxu1  ;;  %v1290_v28 = vpop.f32.mrf.mxu0 }
 0x154   :  { %v2083_v49 = vpack.c.bf16 %v2021_v40, %v2020_v39  ;;  %v1958_v57 = vadd.f32 %v4273_v45, %v1514_v44 }
 0x155   :  { %v1516_v50 = vpop.f32.mrf.mxu1  ;;  %v4306_v55 = vpop.f32.mrf.mxu0 }
 0x156   :  { %v1517_v13 = vadd.f32 %v1516_v50, %v4192_v38  ;;  %3336 = vmatmul.mubr.bf16.vlgmr.msra.gmra.mxu0 %v2083_v49  ;;  %v2022_v6 = vmax.f32 %v1958_v57, 0.0 }
 0x157   :  { %v1518_v59 = vpop.f32.mrf.mxu1  ;;  %v1293_v60 = vpop.f32.mrf.mxu0 }
 0x158   :  { %v1959_v61 = vadd.f32 %v4273_v45, %v1517_v13 }
 0x159   :  { %v1521_v1 = vpop.f32.mrf.mxu1  ;;  %1712 = vmatmul.mubr.bf16.gmra.mxu1 %v3649_v51  ;;  %v4314_v4 = vpop.f32.mrf.mxu0  ;;  %v3655_v51 = vld [vmem:[%s4600_s0 + $0x3a8] ss:$16 sps:$4 sm:$0xff]  }
 0x15a   :  { %v2023_v7 = vmax.f32 %v1959_v61, 0.0  ;;  %v1522_v0 = vadd.f32 %v1521_v1, %v4199_v43  ;;  %1719 = vmatprep.mubr.bf16.mxu1 %v3654_v33  ;;  %v3657_v43 = vld [vmem:[%s4600_s0 + $0x3ac] ss:$16 sps:$4 sm:$0xff]  }
 0x15b   :  { %v1523_v10 = vpop.f32.mrf.mxu1  ;;  %v1298_v38 = vpop.f32.mrf.mxu0 }
 0x15c   :  { %v2084_v18 = vpack.c.bf16 %v2023_v7, %v2022_v6  ;;  %v1960_v21 = vadd.f32 %v4273_v45, %v1522_v0 }
 0x15d   :  { %v1524_v11 = vpop.f32.mrf.mxu1  ;;  %v4320_v20 = vpop.f32.mrf.mxu0 }
 0x15e   :  { %v1525_v23 = vadd.f32 %v1524_v11, %v4206_v48  ;;  %3339 = vmatprep.mubr.bf16.mxu0 %v2084_v18  ;;  %v2024_v40 = vmax.f32 %v1960_v21, 0.0 }
 0x15f   :  { %v1526_v27 = vpop.f32.mrf.mxu1  ;;  %v1301_v29 = vpop.f32.mrf.mxu0 }
 0x160   :  { %v1961_v31 = vadd.f32 %v4273_v45, %v1525_v23 }
 0x161   :  { %v1529_v35 = vpop.f32.mrf.mxu1  ;;  %1720 = vmatmul.mubr.bf16.gmra.mxu1 %v3652_v15  ;;  %v4328_v39 = vpop.f32.mrf.mxu0  ;;  %v3658_v15 = vld [vmem:[%s4600_s0 + $0x3c8] ss:$16 sps:$4 sm:$0xff]  }
 0x162   :  { %v2025_v44 = vmax.f32 %v1961_v31, 0.0  ;;  %v1530_v47 = vadd.f32 %v1529_v35, %v4213_v53  ;;  %1727 = vmatprep.mubr.bf16.mxu1 %v3657_v43  ;;  %v3660_v53 = vld [vmem:[%s4600_s0 + $0x3cc] ss:$16 sps:$4 sm:$0xff]  }
 0x163   :  { %v1531_v28 = vpop.f32.mrf.mxu1  ;;  %v1306_v48 = vpop.f32.mrf.mxu0 }
 0x164   :  { %v2085_v49 = vpack.c.bf16 %v2025_v44, %v2024_v40  ;;  %v1962_v13 = vadd.f32 %v4273_v45, %v1530_v47 }
 0x165   :  { %v1532_v50 = vpop.f32.mrf.mxu1  ;;  %v4334_v57 = vpop.f32.mrf.mxu0 }
 0x166   :  { %v1533_v33 = vadd.f32 %v1532_v50, %v4220_v58  ;;  %3340 = vmatmul.mubr.bf16.gmra.mxu0 %v2085_v49  ;;  %v2026_v7 = vmax.f32 %v1962_v13, 0.0 }
 0x167   :  { %v1534_v59 = vpop.f32.mrf.mxu1  ;;  %v1309_v60 = vpop.f32.mrf.mxu0 }
 0x168   :  { %v1963_v61 = vadd.f32 %v4273_v45, %v1533_v33 }
 0x169   :  { %v1537_v1 = vpop.f32.mrf.mxu1  ;;  %1728 = vmatmul.mubr.bf16.gmra.mxu1 %v3655_v51  ;;  %v4342_v6 = vpop.f32.mrf.mxu0  ;;  %v3661_v51 = vld [vmem:[%s4600_s0 + $0x3e8] ss:$16 sps:$4 sm:$0xff]  }
 0x16a   :  { %v2027_v0 = vmax.f32 %v1963_v61, 0.0  ;;  %v1538_v10 = vadd.f32 %v1537_v1, %v4227_v63  ;;  %1735 = vmatprep.mubr.bf16.mxu1 %v3660_v53  ;;  %v3663_v63 = vld [vmem:[%s4600_s0 + $0x3ec] ss:$16 sps:$4 sm:$0xff]  }
 0x16b   :  { %v1539_v38 = vpop.f32.mrf.mxu1  ;;  %v1314_v58 = vpop.f32.mrf.mxu0 }
 0x16c   :  { %v2086_v18 = vpack.c.bf16 %v2027_v0, %v2026_v7  ;;  %v1964_v23 = vadd.f32 %v4273_v45, %v1538_v10 }
 0x16d   :  { %v1540_v11 = vpop.f32.mrf.mxu1  ;;  %v4348_v21 = vpop.f32.mrf.mxu0 }
 0x16e   :  { %v1541_v43 = vadd.f32 %v1540_v11, %v4234_v5  ;;  %3343 = vmatprep.mubr.bf16.mxu0 %v2086_v18  ;;  %v2028_v44 = vmax.f32 %v1964_v23, 0.0 }
 0x16f   :  { %v1542_v27 = vpop.f32.mrf.mxu1  ;;  %v1317_v29 = vpop.f32.mrf.mxu0 }
 0x170   :  { %v1965_v31 = vadd.f32 %v4273_v45, %v1541_v43 }
 0x171   :  { %v1545_v35 = vpop.f32.mrf.mxu1  ;;  %1736 = vmatmul.mubr.bf16.gmra.mxu1 %v3658_v15  ;;  %v4356_v40 = vpop.f32.mrf.mxu0 }
 0x172   :  { %v2029_v47 = vmax.f32 %v1965_v31, 0.0  ;;  %v1546_v28 = vadd.f32 %v1545_v35, %v4241_v9  ;;  %1743 = vmatprep.mubr.bf16.mxu1 %v3663_v63 }
 0x173   :  { %v1547_v48 = vpop.f32.mrf.mxu1  ;;  %v1322_v5 = vpop.f32.mrf.mxu0 }
 0x174   :  { %v2087_v49 = vpack.c.bf16 %v2029_v47, %v2028_v44  ;;  %v1966_v33 = vadd.f32 %v4273_v45, %v1546_v28 }
 0x175   :  { %v1548_v50 = vpop.f32.mrf.mxu1  ;;  %v4362_v13 = vpop.f32.mrf.mxu0 }
 0x176   :  { %v1549_v53 = vadd.f32 %v1548_v50, %v4248_v17  ;;  %3344 = vmatmul.mubr.bf16.gmra.mxu0 %v2087_v49  ;;  %v2030_v7 = vmax.f32 %v1966_v33, 0.0 }
 0x177   :  { %v1550_v59 = vpop.f32.mrf.mxu1  ;;  %v1325_v60 = vpop.f32.mrf.mxu0 }
 0x178   :  { %v1967_v9 = vadd.f32 %v4273_v45, %v1549_v53 }
 0x179   :  { %v1553_v61 = vpop.f32.mrf.mxu1  ;;  %1744 = vmatmul.mubr.bf16.gmra.mxu1 %v3661_v51  ;;  %v4367_v1 = vpop.f32.mrf.mxu0 }
 0x17a   :  { %v2031_v0 = vmax.f32 %v1967_v9, 0.0  ;;  %v1554_v10 = vadd.f32 %v1553_v61, %v4255_v25 }
 0x17b   :  { %v1555_v38 = vpop.f32.mrf.mxu1  ;;  %v1330_v58 = vpop.f32.mrf.mxu0 }
 0x17c   :  { %v2088_v18 = vpack.c.bf16 %v2031_v0, %v2030_v7  ;;  %v1968_v17 = vadd.f32 %v4273_v45, %v1554_v10 }
 0x17d   :  { %v1556_v11 = vpop.f32.mrf.mxu1  ;;  %v4370_v15 = vpop.f32.mrf.mxu0 }
 0x17e   :  { %v1557_v23 = vadd.f32 %v1556_v11, %v4262_v34  ;;  %3347 = vmatprep.mubr.bf16.mxu0 %v2088_v18  ;;  %v2032_v35 = vmax.f32 %v1968_v17, 0.0 }
 0x17f   :  { %v1558_v43 = vpop.f32.mrf.mxu1  ;;  %v1333_v63 = vpop.f32.mrf.mxu0 }
 0x180   :  { %v1969_v27 = vadd.f32 %v4273_v45, %v1557_v23 }
 0x181   :  { %v1561_v29 = vpop.f32.mrf.mxu1  ;;  %v4375_v31 = vpop.f32.mrf.mxu0 }
 0x182   :  { %v2033_v25 = vmax.f32 %v1969_v27, 0.0  ;;  %v1562_v44 = vadd.f32 %v1561_v29, %v4267_v41 }
 0x183   :  { %v1563_v47 = vpop.f32.mrf.mxu1  ;;  %v1338_v28 = vpop.f32.mrf.mxu0 }
 0x184   :  { %v2089_v48 = vpack.c.bf16 %v2033_v25, %v2032_v35  ;;  %v1970_v34 = vadd.f32 %v4273_v45, %v1562_v44 }
 0x185   :  { %v1564_v5 = vpop.f32.mrf.mxu1  ;;  %v4378_v49 = vpop.f32.mrf.mxu0 }
 0x186   :  { %v1565_v50 = vadd.f32 %v1564_v5, %v4278_v54  ;;  %3348 = vmatmul.mubr.bf16.gmra.mxu0 %v2089_v48  ;;  %v2034_v9 = vmax.f32 %v1970_v34, 0.0 }
 0x187   :  { %v1566_v51 = vpop.f32.mrf.mxu1  ;;  %v1341_v33 = vpop.f32.mrf.mxu0 }
 0x188   :  { %v1971_v53 = vadd.f32 %v4273_v45, %v1565_v50 }
 0x189   :  { %v1569_v59 = vpop.f32.mrf.mxu1  ;;  %v4383_v60 = vpop.f32.mrf.mxu0 }
 0x18a   :  { %v2035_v41 = vmax.f32 %v1971_v53, 0.0  ;;  %v1570_v61 = vadd.f32 %v1569_v59, %v4286_v2 }
 0x18b   :  { %v1571_v7 = vpop.f32.mrf.mxu1  ;;  %v1346_v0 = vpop.f32.mrf.mxu0 }
 0x18c   :  { %v2090_v10 = vpack.c.bf16 %v2035_v41, %v2034_v9  ;;  %v1972_v54 = vadd.f32 %v4273_v45, %v1570_v61 }
 0x18d   :  { %v1572_v38 = vpop.f32.mrf.mxu1  ;;  %v4386_v58 = vpop.f32.mrf.mxu0 }
 0x18e   :  { %v1573_v18 = vadd.f32 %v1572_v38, %v4292_v19  ;;  %3351 = vmatprep.mubr.bf16.mxu0 %v2090_v10  ;;  %v2036_v27 = vmax.f32 %v1972_v54, 0.0 }
 0x18f   :  { %v1574_v11 = vpop.f32.mrf.mxu1  ;;  %v1349_v17 = vpop.f32.mrf.mxu0 }
 0x190   :  { %v1973_v23 = vadd.f32 %v4273_v45, %v1573_v18 }
 0x191   :  { %v1577_v43 = vpop.f32.mrf.mxu1  ;;  %v4391_v63 = vpop.f32.mrf.mxu0 }
 0x192   :  { %v2037_v2 = vmax.f32 %v1973_v23, 0.0  ;;  %v1578_v29 = vadd.f32 %v1577_v43, %v4300_v37 }
 0x193   :  { %v1579_v35 = vpop.f32.mrf.mxu1  ;;  %v1354_v25 = vpop.f32.mrf.mxu0 }
 0x194   :  { %v2091_v44 = vpack.c.bf16 %v2037_v2, %v2036_v27  ;;  %v1974_v19 = vadd.f32 %v4273_v45, %v1578_v29 }
 0x195   :  { %v1580_v47 = vpop.f32.mrf.mxu1  ;;  %v4394_v28 = vpop.f32.mrf.mxu0 }
 0x196   :  { %v1581_v48 = vadd.f32 %v1580_v47, %v4306_v55  ;;  %3352 = vmatmul.mubr.bf16.gmra.mxu0 %v2091_v44  ;;  %v2038_v53 = vmax.f32 %v1974_v19, 0.0 }
 0x197   :  { %v1582_v5 = vpop.f32.mrf.mxu1  ;;  %v1357_v34 = vpop.f32.mrf.mxu0 }
 0x198   :  { %v1975_v50 = vadd.f32 %v4273_v45, %v1581_v48 }
 0x199   :  { %v1585_v51 = vpop.f32.mrf.mxu1  ;;  %v4399_v33 = vpop.f32.mrf.mxu0 }
 0x19a   :  { %v2039_v37 = vmax.f32 %v1975_v50, 0.0  ;;  %v1586_v59 = vadd.f32 %v1585_v51, %v4314_v4 }
 0x19b   :  { %v1587_v9 = vpop.f32.mrf.mxu1  ;;  %v1362_v41 = vpop.f32.mrf.mxu0 }
 0x19c   :  { %v2092_v61 = vpack.c.bf16 %v2039_v37, %v2038_v53  ;;  %v1976_v55 = vadd.f32 %v4273_v45, %v1586_v59 }
 0x19d   :  { %v1588_v7 = vpop.f32.mrf.mxu1  ;;  %v4402_v0 = vpop.f32.mrf.mxu0 }
 0x19e   :  { %v1589_v10 = vadd.f32 %v1588_v7, %v4320_v20  ;;  %3355 = vmatprep.mubr.bf16.mxu0 %v2092_v61  ;;  %v2040_v23 = vmax.f32 %v1976_v55, 0.0 }
 0x19f   :  { %v1590_v38 = vpop.f32.mrf.mxu1  ;;  %v1365_v54 = vpop.f32.mrf.mxu0 }
 0x1a0   :  { %v1977_v18 = vadd.f32 %v4273_v45, %v1589_v10 }
 0x1a1   :  { %v1593_v11 = vpop.f32.mrf.mxu1  ;;  %v4407_v17 = vpop.f32.mrf.mxu0 }
 0x1a2   :  { %v2041_v4 = vmax.f32 %v1977_v18, 0.0  ;;  %v1594_v43 = vadd.f32 %v1593_v11, %v4328_v39 }
 0x1a3   :  { %v1595_v27 = vpop.f32.mrf.mxu1  ;;  %v1370_v2 = vpop.f32.mrf.mxu0 }
 0x1a4   :  { %v2093_v29 = vpack.c.bf16 %v2041_v4, %v2040_v23  ;;  %v1978_v20 = vadd.f32 %v4273_v45, %v1594_v43 }
 0x1a5   :  { %v1596_v35 = vpop.f32.mrf.mxu1  ;;  %v4410_v25 = vpop.f32.mrf.mxu0 }
 0x1a6   :  { %v1597_v44 = vadd.f32 %v1596_v35, %v4334_v57  ;;  %3356 = vmatmul.mubr.bf16.gmra.mxu0 %v2093_v29  ;;  %v2042_v50 = vmax.f32 %v1978_v20, 0.0 }
 0x1a7   :  { %v1598_v47 = vpop.f32.mrf.mxu1  ;;  %v1373_v19 = vpop.f32.mrf.mxu0 }
 0x1a8   :  { %v1979_v48 = vadd.f32 %v4273_v45, %v1597_v44 }
 0x1a9   :  { %v1601_v5 = vpop.f32.mrf.mxu1  ;;  %v4415_v34 = vpop.f32.mrf.mxu0 }
 0x1aa   :  { %v2043_v39 = vmax.f32 %v1979_v48, 0.0  ;;  %v1602_v51 = vadd.f32 %v1601_v5, %v4342_v6 }
 0x1ab   :  { %v1603_v53 = vpop.f32.mrf.mxu1  ;;  %v1378_v37 = vpop.f32.mrf.mxu0 }
 0x1ac   :  { %v2094_v59 = vpack.c.bf16 %v2043_v39, %v2042_v50  ;;  %v1980_v57 = vadd.f32 %v4273_v45, %v1602_v51 }
 0x1ad   :  { %v1604_v9 = vpop.f32.mrf.mxu1  ;;  %v4418_v41 = vpop.f32.mrf.mxu0 }
 0x1ae   :  { %v1605_v61 = vadd.f32 %v1604_v9, %v4348_v21  ;;  %3359 = vmatprep.mubr.bf16.mxu0 %v2094_v59  ;;  %v2044_v18 = vmax.f32 %v1980_v57, 0.0 }
 0x1af   :  { %v1606_v7 = vpop.f32.mrf.mxu1  ;;  %v1381_v55 = vpop.f32.mrf.mxu0 }
 0x1b0   :  { %v1981_v10 = vadd.f32 %v4273_v45, %v1605_v61 }
 0x1b1   :  { %v1609_v38 = vpop.f32.mrf.mxu1  ;;  %v4423_v54 = vpop.f32.mrf.mxu0 }
 0x1b2   :  { %v2045_v6 = vmax.f32 %v1981_v10, 0.0  ;;  %v1610_v11 = vadd.f32 %v1609_v38, %v4356_v40 }
 0x1b3   :  { %v1611_v23 = vpop.f32.mrf.mxu1  ;;  %v1386_v4 = vpop.f32.mrf.mxu0 }
 0x1b4   :  { %v2095_v43 = vpack.c.bf16 %v2045_v6, %v2044_v18  ;;  %v1982_v21 = vadd.f32 %v4273_v45, %v1610_v11 }
 0x1b5   :  { %v1612_v27 = vpop.f32.mrf.mxu1  ;;  %v4426_v2 = vpop.f32.mrf.mxu0 }
 0x1b6   :  { %v1613_v29 = vadd.f32 %v1612_v27, %v4362_v13  ;;  %3360 = vmatmul.mubr.bf16.gmra.mxu0 %v2095_v43  ;;  %v2046_v48 = vmax.f32 %v1982_v21, 0.0 }
 0x1b7   :  { %v1614_v35 = vpop.f32.mrf.mxu1  ;;  %v1389_v20 = vpop.f32.mrf.mxu0 }
 0x1b8   :  { %v1983_v44 = vadd.f32 %v4273_v45, %v1613_v29 }
 0x1b9   :  { %v1617_v47 = vpop.f32.mrf.mxu1  ;;  %v4431_v19 = vpop.f32.mrf.mxu0 }
 0x1ba   :  { %v2047_v40 = vmax.f32 %v1983_v44, 0.0  ;;  %v1618_v5 = vadd.f32 %v1617_v47, %v4367_v1 }
 0x1bb   :  { %v1619_v50 = vpop.f32.mrf.mxu1  ;;  %v1394_v39 = vpop.f32.mrf.mxu0 }
 0x1bc   :  { %v2096_v51 = vpack.c.bf16 %v2047_v40, %v2046_v48  ;;  %v1984_v13 = vadd.f32 %v4273_v45, %v1618_v5 }
 0x1bd   :  { %v1620_v53 = vpop.f32.mrf.mxu1  ;;  %v4434_v37 = vpop.f32.mrf.mxu0 }
 0x1be   :  { %v1621_v59 = vadd.f32 %v1620_v53, %v4370_v15  ;;  %3363 = vmatprep.mubr.bf16.mxu0 %v2096_v51  ;;  %v2048_v55 = vmax.f32 %v1984_v13, 0.0 }
 0x1bf   :  { %v1622_v9 = vpop.f32.mrf.mxu1  ;;  %v1397_v57 = vpop.f32.mrf.mxu0 }
 0x1c0   :  { %v1985_v61 = vadd.f32 %v4273_v45, %v1621_v59 }
 0x1c1   :  { %v1625_v7 = vpop.f32.mrf.mxu1 }
 0x1c2   :  { %v2049_v10 = vmax.f32 %v1985_v61, 0.0  ;;  %v1626_v1 = vadd.f32 %v1625_v7, %v4375_v31 }
 0x1c3   :  { %v1627_v38 = vpop.f32.mrf.mxu1 }
 0x1c4   :  { %v2097_v18 = vpack.c.bf16 %v2049_v10, %v2048_v55  ;;  %v1986_v11 = vadd.f32 %v4273_v45, %v1626_v1 }
 0x1c5   :  { %v1628_v6 = vpop.f32.mrf.mxu1 }
 0x1c6   :  { %v1629_v23 = vadd.f32 %v1628_v6, %v4378_v49  ;;  %3364 = vmatmul.mubr.bf16.gmra.mxu0 %v2097_v18  ;;  %v2050_v27 = vmax.f32 %v1986_v11, 0.0 }
 0x1c7   :  { %v1630_v4 = vpop.f32.mrf.mxu1 }
 0x1c8   :  { %v1987_v15 = vadd.f32 %v4273_v45, %v1629_v23 }
 0x1c9   :  { %v1633_v43 = vpop.f32.mrf.mxu1 }
 0x1ca   :  { %v2051_v21 = vmax.f32 %v1987_v15, 0.0  ;;  %v1634_v29 = vadd.f32 %v1633_v43, %v4383_v60 }
 0x1cb   :  { %v1635_v35 = vpop.f32.mrf.mxu1 }
 0x1cc   :  { %v2098_v20 = vpack.c.bf16 %v2051_v21, %v2050_v27  ;;  %v1988_v31 = vadd.f32 %v4273_v45, %v1634_v29 }
 0x1cd   :  { %v1636_v44 = vpop.f32.mrf.mxu1 }
 0x1ce   :  { %v1637_v47 = vadd.f32 %v1636_v44, %v4386_v58  ;;  %3367 = vmatprep.mubr.bf16.mxu0 %v2098_v20  ;;  %v2052_v5 = vmax.f32 %v1988_v31, 0.0 }
 0x1cf   :  { %v1638_v48 = vpop.f32.mrf.mxu1 }
 0x1d0   :  { %v1989_v49 = vadd.f32 %v4273_v45, %v1637_v47 }
 0x1d1   :  { %v1641_v40 = vpop.f32.mrf.mxu1 }
 0x1d2   :  { %v2053_v50 = vmax.f32 %v1989_v49, 0.0  ;;  %v1642_v39 = vadd.f32 %v1641_v40, %v4391_v63 }
 0x1d3   :  { %v1643_v51 = vpop.f32.mrf.mxu1 }
 0x1d4   :  { %v2099_v53 = vpack.c.bf16 %v2053_v50, %v2052_v5  ;;  %v1990_v60 = vadd.f32 %v4273_v45, %v1642_v39 }
 0x1d5   :  { %v1644_v13 = vpop.f32.mrf.mxu1 }
 0x1d6   :  { %v1645_v59 = vadd.f32 %v1644_v13, %v4394_v28  ;;  %3368 = vmatmul.mubr.bf16.gmra.mxu0 %v2099_v53  ;;  %v2054_v61 = vmax.f32 %v1990_v60, 0.0 }
 0x1d7   :  { %v1646_v9 = vpop.f32.mrf.mxu1 }
 0x1d8   :  { %v1991_v58 = vadd.f32 %v4273_v45, %v1645_v59 }
 0x1d9   :  { %v1649_v57 = vpop.f32.mrf.mxu1 }
 0x1da   :  { %v2055_v7 = vmax.f32 %v1991_v58, 0.0  ;;  %v1650_v55 = vadd.f32 %v1649_v57, %v4399_v33 }
 0x1db   :  { %v1651_v10 = vpop.f32.mrf.mxu1 }
 0x1dc   :  { %v2100_v1 = vpack.c.bf16 %v2055_v7, %v2054_v61  ;;  %v1992_v63 = vadd.f32 %v4273_v45, %v1650_v55 }
 0x1dd   :  { %v1652_v38 = vpop.f32.mrf.mxu1 }
 0x1de   :  { %v1653_v18 = vadd.f32 %v1652_v38, %v4402_v0  ;;  %3371 = vmatprep.mubr.bf16.mxu0 %v2100_v1  ;;  %v2056_v23 = vmax.f32 %v1992_v63, 0.0 }
 0x1df   :  { %v1654_v6 = vpop.f32.mrf.mxu1 }
 0x1e0   :  { %v1993_v28 = vadd.f32 %v4273_v45, %v1653_v18 }
 0x1e1   :  { %v1657_v11 = vpop.f32.mrf.mxu1 }
 0x1e2   :  { %v2057_v4 = vmax.f32 %v1993_v28, 0.0  ;;  %v1658_v15 = vadd.f32 %v1657_v11, %v4407_v17 }
 0x1e3   :  { %v1659_v43 = vpop.f32.mrf.mxu1 }
 0x1e4   :  { %v2101_v27 = vpack.c.bf16 %v2057_v4, %v2056_v23  ;;  %v1994_v33 = vadd.f32 %v4273_v45, %v1658_v15 }
 0x1e5   :  { %v1660_v21 = vpop.f32.mrf.mxu1 }
 0x1e6   :  { %v1661_v29 = vadd.f32 %v1660_v21, %v4410_v25  ;;  %3372 = vmatmul.mubr.bf16.gmra.mxu0 %v2101_v27  ;;  %v2058_v44 = vmax.f32 %v1994_v33, 0.0 }
 0x1e7   :  { %v1662_v35 = vpop.f32.mrf.mxu1 }
 0x1e8   :  { %v1995_v0 = vadd.f32 %v4273_v45, %v1661_v29 }
 0x1e9   :  { %v1665_v20 = vpop.f32.mrf.mxu1 }
 0x1ea   :  { %v2059_v31 = vmax.f32 %v1995_v0, 0.0  ;;  %v1666_v47 = vadd.f32 %v1665_v20, %v4415_v34 }
 0x1eb   :  { %v1667_v48 = vpop.f32.mrf.mxu1 }
 0x1ec   :  { %v2102_v49 = vpack.c.bf16 %v2059_v31, %v2058_v44  ;;  %v1996_v17 = vadd.f32 %v4273_v45, %v1666_v47 }
 0x1ed   :  { %v1668_v40 = vpop.f32.mrf.mxu1 }
 0x1ee   :  { %v1669_v5 = vadd.f32 %v1668_v40, %v4418_v41  ;;  %3375 = vmatprep.mubr.bf16.mxu0 %v2102_v49  ;;  %v2060_v51 = vmax.f32 %v1996_v17, 0.0 }
 0x1ef   :  { %v1670_v50 = vpop.f32.mrf.mxu1 }
 0x1f0   :  { %v1997_v25 = vadd.f32 %v4273_v45, %v1669_v5 }
 0x1f1   :  { %v1673_v39 = vpop.f32.mrf.mxu1 }
 0x1f2   :  { %v2061_v53 = vmax.f32 %v1997_v25, 0.0  ;;  %v1674_v13 = vadd.f32 %v1673_v39, %v4423_v54 }
 0x1f3   :  { %v1675_v60 = vpop.f32.mrf.mxu1 }
 0x1f4   :  { %v2103_v59 = vpack.c.bf16 %v2061_v53, %v2060_v51  ;;  %v1998_v34 = vadd.f32 %v4273_v45, %v1674_v13 }
 0x1f5   :  { %v1676_v9 = vpop.f32.mrf.mxu1 }
 0x1f6   :  { %v1677_v58 = vadd.f32 %v1676_v9, %v4426_v2  ;;  %3376 = vmatmul.mubr.bf16.gmra.mxu0 %v2103_v59  ;;  %v2062_v7 = vmax.f32 %v1998_v34, 0.0 }
 0x1f7   :  { %v1678_v57 = vpop.f32.mrf.mxu1 }
 0x1f8   :  { %v1999_v41 = vadd.f32 %v4273_v45, %v1677_v58 }
 0x1f9   :  { %v1681_v61 = vpop.f32.mrf.mxu1 }
 0x1fa   :  { %v2063_v55 = vmax.f32 %v1999_v41, 0.0  ;;  %v1682_v10 = vadd.f32 %v1681_v61, %v4431_v19 }
 0x1fb   :  { %v1683_v1 = vpop.f32.mrf.mxu1 }
 0x1fc   :  { %v2104_v38 = vpack.c.bf16 %v2063_v55, %v2062_v7  ;;  %v2000_v54 = vadd.f32 %v4273_v45, %v1682_v10 }
 0x1fd   :  { %v1684_v63 = vpop.f32.mrf.mxu1 }
 0x1fe   :  { %v1685_v18 = vadd.f32 %v1684_v63, %v4434_v37  ;;  %3379 = vmatprep.mubr.bf16.mxu0 %v2104_v38  ;;  %v2064_v11 = vmax.f32 %v2000_v54, 0.0 }
 0x1ff   :  { %v1686_v6 = vpop.f32.mrf.mxu1 }
 0x200   :  { %v2001_v2 = vadd.f32 %v4273_v45, %v1685_v18 }
 0x201   :  { %v1689_v28 = vpop.f32.mrf.mxu1 }
 0x202   :  { %v2065_v23 = vmax.f32 %v2001_v2, 0.0  ;;  %v1690_v4 = vadd.f32 %v1689_v28, %v4155_v12 }
 0x203   :  { %v1691_v15 = vpop.f32.mrf.mxu1 }
 0x204   :  { %v2105_v43 = vpack.c.bf16 %v2065_v23, %v2064_v11  ;;  %v2002_v19 = vadd.f32 %v4273_v45, %v1690_v4 }
 0x205   :  { %v1692_v27 = vpop.f32.mrf.mxu1 }
 0x206   :  { %v1693_v21 = vadd.f32 %v1692_v27, %v4159_v16  ;;  %3380 = vmatmul.mubr.bf16.gmra.mxu0 %v2105_v43  ;;  %v2066_v35 = vmax.f32 %v2002_v19, 0.0 }
 0x207   :  { %v1694_v33 = vpop.f32.mrf.mxu1 }
 0x208   :  { %v2003_v37 = vadd.f32 %v4273_v45, %v1693_v21 }
 0x209   :  { %v1697_v29 = vpop.f32.mrf.mxu1 }
 0x20a   :  { %v2067_v0 = vmax.f32 %v2003_v37, 0.0  ;;  %v1698_v20 = vadd.f32 %v1697_v29, %v4169_v22 }
 0x20b   :  { %v1699_v44 = vpop.f32.mrf.mxu1 }
 0x20c   :  { %v2106_v31 = vpack.c.bf16 %v2067_v0, %v2066_v35  ;;  %v2004_v12 = vadd.f32 %v4273_v45, %v1698_v20 }
 0x20d   :  { %v1700_v47 = vpop.f32.mrf.mxu1 }
 0x20e   :  { %v1701_v48 = vadd.f32 %v1700_v47, %v4173_v26  ;;  %3383 = vmatprep.mubr.bf16.mxu0 %v2106_v31  ;;  %v2068_v17 = vmax.f32 %v2004_v12, 0.0 }
 0x20f   :  { %v1702_v49 = vpop.f32.mrf.mxu1 }
 0x210   :  { %v2005_v16 = vadd.f32 %v4273_v45, %v1701_v48 }
 0x211   :  { %v1705_v40 = vpop.f32.mrf.mxu1 }
 0x212   :  { %v2069_v5 = vmax.f32 %v2005_v16, 0.0  ;;  %v1706_v50 = vadd.f32 %v1705_v40, %v4183_v32 }
 0x213   :  { %v1707_v25 = vpop.f32.mrf.mxu1 }
 0x214   :  { %v2107_v39 = vpack.c.bf16 %v2069_v5, %v2068_v17  ;;  %v2006_v22 = vadd.f32 %v4273_v45, %v1706_v50 }
 0x215   :  { %v1708_v51 = vpop.f32.mrf.mxu1 }
 0x216   :  { %v1709_v53 = vadd.f32 %v1708_v51, %v4187_v36  ;;  %v3337_v13 = vpop.f32.mrf.mxu0  ;;  %3384 = vmatmul.mubr.bf16.gmra.mxu0 %v2107_v39  ;;  %v2070_v34 = vmax.f32 %v2006_v22, 0.0 }
 0x217   :  { %v1710_v60 = vpop.f32.mrf.mxu1 }
 0x218   :  { %v2007_v26 = vadd.f32 %v4273_v45, %v1709_v53  ;;  %v2212_v59 = vpop.f32.mrf.mxu0 }
 0x219   :  { %v1713_v9 = vpop.f32.mrf.mxu1 }
 0x21a   :  { %v2071_v58 = vmax.f32 %v2007_v26, 0.0  ;;  %v1714_v57 = vadd.f32 %v1713_v9, %v4197_v42  ;;  %v3338_v41 = vpop.f32.mrf.mxu0 }
 0x21b   :  { %v3096_v32 = vpack.c.bf16 %v3338_v41, %v3337_v13  ;;  %v1715_v61 = vpop.f32.mrf.mxu1 }
 0x21c   :  { %v2215_v7 = vpop.f32.mrf.mxu0  ;;  %v2108_v55 = vpack.c.bf16 %v2071_v58, %v2070_v34  ;;  %v2008_v1 = vadd.f32 %v4273_v45, %v1714_v57 }
 0x21d   :  { %3248 = vst [vmem:[%s4603_s4 + $0x8] sm:$0xff] %v3096_v32   ;;  %v3091_v36 = vpack.c.bf16 %v2215_v7, %v2212_v59  ;;  %v1716_v10 = vpop.f32.mrf.mxu1 }
 0x21e   :  { %v1717_v38 = vadd.f32 %v1716_v10, %v4201_v46  ;;  %3387 = vmatprep.mubr.bf16.mxu0 %v2108_v55  ;;  %v2072_v18 = vmax.f32 %v2008_v1, 0.0 }
 0x21f   :  { %3092 = vst [vmem:[%s4603_s4] sm:$0xff] %v3091_v36   ;;  %v1718_v42 = vpop.f32.mrf.mxu1 }
 0x220   :  { %v2009_v63 = vadd.f32 %v4273_v45, %v1717_v38 }
 0x221   :  { %v1721_v54 = vpop.f32.mrf.mxu1 }
 0x222   :  { %v2073_v6 = vmax.f32 %v2009_v63, 0.0  ;;  %v1722_v2 = vadd.f32 %v1721_v54, %v4211_v52 }
 0x223   :  { %v1723_v28 = vpop.f32.mrf.mxu1 }
 0x224   :  { %v2109_v11 = vpack.c.bf16 %v2073_v6, %v2072_v18  ;;  %v2010_v4 = vadd.f32 %v4273_v45, %v1722_v2 }
 0x225   :  { %v1724_v23 = vpop.f32.mrf.mxu1 }
 0x226   :  { %v1725_v46 = vadd.f32 %v1724_v23, %v4215_v56  ;;  %v3341_v15 = vpop.f32.mrf.mxu0  ;;  %3388 = vmatmul.mubr.bf16.gmra.mxu0 %v2109_v11  ;;  %v2074_v33 = vmax.f32 %v2010_v4, 0.0 }
 0x227   :  { %v1726_v43 = vpop.f32.mrf.mxu1 }
 0x228   :  { %v2011_v27 = vadd.f32 %v4273_v45, %v1725_v46  ;;  %v2228_v19 = vpop.f32.mrf.mxu0 }
 0x229   :  { %v1729_v21 = vpop.f32.mrf.mxu1 }
 0x22a   :  { %v2075_v37 = vmax.f32 %v2011_v27, 0.0  ;;  %v1730_v29 = vadd.f32 %v1729_v21, %v4225_v62  ;;  %v3342_v35 = vpop.f32.mrf.mxu0 }
 0x22b   :  { %v3106_v52 = vpack.c.bf16 %v3342_v35, %v3341_v15  ;;  %v1731_v0 = vpop.f32.mrf.mxu1 }
 0x22c   :  { %v2231_v20 = vpop.f32.mrf.mxu0  ;;  %v2110_v44 = vpack.c.bf16 %v2075_v37, %v2074_v33  ;;  %v2012_v47 = vadd.f32 %v4273_v45, %v1730_v29 }
 0x22d   :  { %3250 = vst [vmem:[%s4603_s4 + $0x18] sm:$0xff] %v3106_v52   ;;  %v3101_v56 = vpack.c.bf16 %v2231_v20, %v2228_v19  ;;  %v1732_v31 = vpop.f32.mrf.mxu1 }
 0x22e   :  { %v1733_v12 = vadd.f32 %v1732_v31, %v4229_v3  ;;  %3391 = vmatprep.mubr.bf16.mxu0 %v2110_v44  ;;  %v2076_v16 = vmax.f32 %v2012_v47, 0.0 }
 0x22f   :  { %3249 = vst [vmem:[%s4603_s4 + $0x10] sm:$0xff] %v3101_v56   ;;  %v1734_v62 = vpop.f32.mrf.mxu1 }
 0x230   :  { %v2013_v48 = vadd.f32 %v4273_v45, %v1733_v12 }
 0x231   :  { %v1737_v49 = vpop.f32.mrf.mxu1 }
 0x232   :  { %v2077_v40 = vmax.f32 %v2013_v48, 0.0  ;;  %v1738_v17 = vadd.f32 %v1737_v49, %v4239_v8 }
 0x233   :  { %v1739_v5 = vpop.f32.mrf.mxu1 }
 0x234   :  { %v2111_v50 = vpack.c.bf16 %v2077_v40, %v2076_v16  ;;  %v2014_v39 = vadd.f32 %v4273_v45, %v1738_v17 }
 0x235   :  { %v1740_v25 = vpop.f32.mrf.mxu1 }
 0x236   :  { %v1741_v3 = vadd.f32 %v1740_v25, %v4243_v14  ;;  %v3345_v51 = vpop.f32.mrf.mxu0  ;;  %3392 = vmatmul.mubr.bf16.gmra.mxu0 %v2111_v50  ;;  %v2078_v26 = vmax.f32 %v2014_v39, 0.0 }
 0x237   :  { %v1742_v22 = vpop.f32.mrf.mxu1 }
 0x238   :  { %v2015_v53 = vadd.f32 %v4273_v45, %v1741_v3  ;;  %v2244_v13 = vpop.f32.mrf.mxu0 }
 0x239   :  { %v1745_v60 = vpop.f32.mrf.mxu1 }
 0x23a   :  { %v2079_v59 = vmax.f32 %v2015_v53, 0.0  ;;  %v1746_v9 = vadd.f32 %v1745_v60, %v4253_v24  ;;  %v3346_v34 = vpop.f32.mrf.mxu0 }
 0x23b   :  { %v3116_v8 = vpack.c.bf16 %v3346_v34, %v3345_v51  ;;  %v1747_v58 = vpop.f32.mrf.mxu1 }
 0x23c   :  { %v2247_v57 = vpop.f32.mrf.mxu0  ;;  %v2112_v41 = vpack.c.bf16 %v2079_v59, %v2078_v26  ;;  %v2016_v61 = vadd.f32 %v4273_v45, %v1746_v9 }
 0x23d   :  { %3252 = vst [vmem:[%s4603_s4 + $0x28] sm:$0xff] %v3116_v8   ;;  %v3111_v14 = vpack.c.bf16 %v2247_v57, %v2244_v13  ;;  %v1748_v32 = vpop.f32.mrf.mxu1 }
 0x23e   :  { %v1749_v7 = vadd.f32 %v1748_v32, %v4257_v30  ;;  %3395 = vmatprep.mubr.bf16.mxu0 %v2112_v41  ;;  %v2080_v36 = vmax.f32 %v2016_v61, 0.0 }
 0x23f   :  { %3251 = vst [vmem:[%s4603_s4 + $0x20] sm:$0xff] %v3111_v14   ;;  %v1750_v24 = vpop.f32.mrf.mxu1 }
 0x240   :  { %v2017_v55 = vadd.f32 %v4273_v45, %v1749_v7 }
 0x242   :  { %v2081_v10 = vmax.f32 %v2017_v55, 0.0 }
 0x244   :  { %v2113_v1 = vpack.c.bf16 %v2081_v10, %v2080_v36 }
 0x246   :  { %v3349_v38 = vpop.f32.mrf.mxu0  ;;  %3396 = vmatmul.mubr.bf16.gmra.mxu0 %v2113_v1 }
 0x248   :  { %v2260_v42 = vpop.f32.mrf.mxu0 }
 0x24a   :  { %v3350_v63 = vpop.f32.mrf.mxu0 }
 0x24b   :  { %v3126_v54 = vpack.c.bf16 %v3350_v63, %v3349_v38 }
 0x24c   :  { %v2263_v18 = vpop.f32.mrf.mxu0 }
 0x24d   :  { %3254 = vst [vmem:[%s4603_s4 + $0x38] sm:$0xff] %v3126_v54   ;;  %v3121_v30 = vpack.c.bf16 %v2263_v18, %v2260_v42 }
 0x24f   :  { %3253 = vst [vmem:[%s4603_s4 + $0x30] sm:$0xff] %v3121_v30  }
 0x256   :  { %v3353_v6 = vpop.f32.mrf.mxu0 }
 0x258   :  { %v2276_v45 = vpop.f32.mrf.mxu0 }
 0x25a   :  { %v3354_v2 = vpop.f32.mrf.mxu0 }
 0x25b   :  { %v3136_v28 = vpack.c.bf16 %v3354_v2, %v3353_v6 }
 0x25c   :  { %v2279_v11 = vpop.f32.mrf.mxu0 }
 0x25d   :  { %3256 = vst [vmem:[%s4603_s4 + $0x48] sm:$0xff] %v3136_v28   ;;  %v3131_v23 = vpack.c.bf16 %v2279_v11, %v2276_v45 }
 0x25f   :  { %3255 = vst [vmem:[%s4603_s4 + $0x40] sm:$0xff] %v3131_v23  }
 0x266   :  { %v3357_v4 = vpop.f32.mrf.mxu0 }
 0x268   :  { %v2292_v46 = vpop.f32.mrf.mxu0 }
 0x26a   :  { %v3358_v15 = vpop.f32.mrf.mxu0 }
 0x26b   :  { %v3146_v43 = vpack.c.bf16 %v3358_v15, %v3357_v4 }
 0x26c   :  { %v2295_v27 = vpop.f32.mrf.mxu0 }
 0x26d   :  { %3258 = vst [vmem:[%s4603_s4 + $0x58] sm:$0xff] %v3146_v43   ;;  %v3141_v19 = vpack.c.bf16 %v2295_v27, %v2292_v46 }
 0x26f   :  { %3257 = vst [vmem:[%s4603_s4 + $0x50] sm:$0xff] %v3141_v19  }
 0x276   :  { %v3361_v21 = vpop.f32.mrf.mxu0 }
 0x278   :  { %v2308_v33 = vpop.f32.mrf.mxu0 }
 0x27a   :  { %v3362_v37 = vpop.f32.mrf.mxu0 }
 0x27b   :  { %v3156_v29 = vpack.c.bf16 %v3362_v37, %v3361_v21 }
 0x27c   :  { %v2311_v35 = vpop.f32.mrf.mxu0 }
 0x27d   :  { %3260 = vst [vmem:[%s4603_s4 + $0x68] sm:$0xff] %v3156_v29   ;;  %v3151_v52 = vpack.c.bf16 %v2311_v35, %v2308_v33 }
 0x27f   :  { %3259 = vst [vmem:[%s4603_s4 + $0x60] sm:$0xff] %v3151_v52  }
 0x286   :  { %v3365_v0 = vpop.f32.mrf.mxu0 }
 0x288   :  { %v2324_v20 = vpop.f32.mrf.mxu0 }
 0x28a   :  { %v3366_v44 = vpop.f32.mrf.mxu0 }
 0x28b   :  { %v3166_v56 = vpack.c.bf16 %v3366_v44, %v3365_v0 }
 0x28c   :  { %v2327_v31 = vpop.f32.mrf.mxu0 }
 0x28d   :  { %3262 = vst [vmem:[%s4603_s4 + $0x78] sm:$0xff] %v3166_v56   ;;  %v3161_v47 = vpack.c.bf16 %v2327_v31, %v2324_v20 }
 0x28f   :  { %3261 = vst [vmem:[%s4603_s4 + $0x70] sm:$0xff] %v3161_v47  }
 0x296   :  { %v3369_v12 = vpop.f32.mrf.mxu0 }
 0x298   :  { %v2340_v62 = vpop.f32.mrf.mxu0 }
 0x29a   :  { %v3370_v48 = vpop.f32.mrf.mxu0 }
 0x29b   :  { %v3176_v49 = vpack.c.bf16 %v3370_v48, %v3369_v12 }
 0x29c   :  { %v2343_v16 = vpop.f32.mrf.mxu0 }
 0x29d   :  { %3264 = vst [vmem:[%s4603_s4 + $0x88] sm:$0xff] %v3176_v49   ;;  %v3171_v40 = vpack.c.bf16 %v2343_v16, %v2340_v62 }
 0x29f   :  { %3263 = vst [vmem:[%s4603_s4 + $0x80] sm:$0xff] %v3171_v40  }
 0x2a6   :  { %v3373_v17 = vpop.f32.mrf.mxu0 }
 0x2a8   :  { %v2356_v5 = vpop.f32.mrf.mxu0 }
 0x2aa   :  { %v3374_v50 = vpop.f32.mrf.mxu0 }
 0x2ab   :  { %v3186_v25 = vpack.c.bf16 %v3374_v50, %v3373_v17 }
 0x2ac   :  { %v2359_v39 = vpop.f32.mrf.mxu0 }
 0x2ad   :  { %3266 = vst [vmem:[%s4603_s4 + $0x98] sm:$0xff] %v3186_v25   ;;  %v3181_v3 = vpack.c.bf16 %v2359_v39, %v2356_v5 }
 0x2af   :  { %3265 = vst [vmem:[%s4603_s4 + $0x90] sm:$0xff] %v3181_v3  }
 0x2b6   :  { %v3377_v51 = vpop.f32.mrf.mxu0 }
 0x2b8   :  { %v2372_v22 = vpop.f32.mrf.mxu0 }
 0x2ba   :  { %v3378_v53 = vpop.f32.mrf.mxu0 }
 0x2bb   :  { %v3196_v13 = vpack.c.bf16 %v3378_v53, %v3377_v51 }
 0x2bc   :  { %v2375_v60 = vpop.f32.mrf.mxu0 }
 0x2bd   :  { %3268 = vst [vmem:[%s4603_s4 + $0xa8] sm:$0xff] %v3196_v13   ;;  %v3191_v26 = vpack.c.bf16 %v2375_v60, %v2372_v22 }
 0x2bf   :  { %3267 = vst [vmem:[%s4603_s4 + $0xa0] sm:$0xff] %v3191_v26  }
 0x2c6   :  { %v3381_v59 = vpop.f32.mrf.mxu0 }
 0x2c8   :  { %v2388_v9 = vpop.f32.mrf.mxu0 }
 0x2ca   :  { %v3382_v34 = vpop.f32.mrf.mxu0 }
 0x2cb   :  { %v3206_v8 = vpack.c.bf16 %v3382_v34, %v3381_v59 }
 0x2cc   :  { %v2391_v58 = vpop.f32.mrf.mxu0 }
 0x2cd   :  { %3270 = vst [vmem:[%s4603_s4 + $0xb8] sm:$0xff] %v3206_v8   ;;  %v3201_v57 = vpack.c.bf16 %v2391_v58, %v2388_v9 }
 0x2cf   :  { %3269 = vst [vmem:[%s4603_s4 + $0xb0] sm:$0xff] %v3201_v57  }
 0x2d6   :  { %v3385_v41 = vpop.f32.mrf.mxu0 }
 0x2d8   :  { %v2404_v14 = vpop.f32.mrf.mxu0 }
 0x2da   :  { %v3386_v32 = vpop.f32.mrf.mxu0 }
 0x2db   :  { %v3216_v61 = vpack.c.bf16 %v3386_v32, %v3385_v41 }
 0x2dc   :  { %v2407_v7 = vpop.f32.mrf.mxu0 }
 0x2dd   :  { %3272 = vst [vmem:[%s4603_s4 + $0xc8] sm:$0xff] %v3216_v61   ;;  %v3211_v24 = vpack.c.bf16 %v2407_v7, %v2404_v14 }
 0x2df   :  { %3271 = vst [vmem:[%s4603_s4 + $0xc0] sm:$0xff] %v3211_v24  }
 0x2e6   :  { %v3389_v55 = vpop.f32.mrf.mxu0 }
 0x2e8   :  { %v2420_v36 = vpop.f32.mrf.mxu0 }
 0x2ea   :  { %v3390_v10 = vpop.f32.mrf.mxu0 }
 0x2eb   :  { %v3226_v1 = vpack.c.bf16 %v3390_v10, %v3389_v55 }
 0x2ec   :  { %v2423_v38 = vpop.f32.mrf.mxu0 }
 0x2ed   :  { %3274 = vst [vmem:[%s4603_s4 + $0xd8] sm:$0xff] %v3226_v1   ;;  %v3221_v42 = vpack.c.bf16 %v2423_v38, %v2420_v36 }
 0x2ef   :  { %3273 = vst [vmem:[%s4603_s4 + $0xd0] sm:$0xff] %v3221_v42  }
 0x2f6   :  { %v3393_v63 = vpop.f32.mrf.mxu0 }
 0x2f8   :  { %v2436_v54 = vpop.f32.mrf.mxu0 }
 0x2fa   :  { %v3394_v18 = vpop.f32.mrf.mxu0 }
 0x2fb   :  { %v3236_v30 = vpack.c.bf16 %v3394_v18, %v3393_v63 }
 0x2fc   :  { %v2439_v6 = vpop.f32.mrf.mxu0 }
 0x2fd   :  { %3276 = vst [vmem:[%s4603_s4 + $0xe8] sm:$0xff] %v3236_v30   ;;  %v3231_v45 = vpack.c.bf16 %v2439_v6, %v2436_v54 }
 0x2ff   :  { %3275 = vst [vmem:[%s4603_s4 + $0xe0] sm:$0xff] %v3231_v45  }
 0x306   :  { %v3397_v2 = vpop.f32.mrf.mxu0 }
 0x308   :  { %v2452_v28 = vpop.f32.mrf.mxu0 }
 0x30a   :  { %v3398_v11 = vpop.f32.mrf.mxu0 }
 0x30b   :  { %v3246_v23 = vpack.c.bf16 %v3398_v11, %v3397_v2 }
 0x30c   :  { %v2455_v4 = vpop.f32.mrf.mxu0 }
 0x30d   :  { %3278 = vst [vmem:[%s4603_s4 + $0xf8] sm:$0xff] %v3246_v23   ;;  %v3241_v46 = vpack.c.bf16 %v2455_v4, %v2452_v28 }
 0x30f   :  { %3277 = vst [vmem:[%s4603_s4 + $0xf0] sm:$0xff] %v3241_v46  }

</bundles_post_ra>
